<compile_context>
chip_gen: v6e
topology: v6e:2x2x1
jax: 0.10.0
libtpu: 0.0.40
codegen_flags: <defaults>
</compile_context>

<pallas_src>
import jax
import jax.numpy as jnp
from jax.experimental import pallas as pl
from jax.experimental.pallas import tpu as pltpu

D_IN, H1, H2 = 1024, 512, 128
POS_WEIGHT = 2.2


# ----------------------------- Pallas kernel --------------------------------
def _mlp_kernel(x_ref, w1_ref, b1_ref, w2_ref, b2_ref, w3_ref, b3_ref, out_ref):
    # x_ref: (ROWS, 1024) f32 or bf16; out_ref: (1, ROWS//128, 128) f32 lane-dense logits.
    x = x_ref[...].astype(jnp.bfloat16)            # in-kernel cast; no extra HBM pass
    # Linear(1024->512): bf16 MXU, f32 accumulate; bias + ReLU in f32.
    h1 = jnp.dot(x, w1_ref[...], preferred_element_type=jnp.float32) + b1_ref[...]
    h1 = jnp.maximum(h1, 0.0).astype(jnp.bfloat16)
    # Linear(512->128): bf16 MXU, f32 accumulate; bias + ReLU in f32.
    h2 = jnp.dot(h1, w2_ref[...], preferred_element_type=jnp.float32) + b2_ref[...]
    h2 = jnp.maximum(h2, 0.0)                      # (ROWS, 128) f32
    # Linear(128->1) as per-128-row transpose (XLU) + sublane reduction (VPU),
    # producing one lane-dense (1, 128) logit row per chunk.  bf16 transposes
    # (halve VEX/XLU bytes), f32 accumulate via promotion against f32 w3.
    s = out_ref.shape[1]                           # ROWS // 128 (static)
    h2_b = h2.astype(jnp.bfloat16)
    w3_col = w3_ref[...]                           # (128, 1) f32
    rows = []
    for i in range(s):                             # unrolled at trace time
        chunk_t = h2_b[i * 128:(i + 1) * 128, :].T              # (128 feat, 128 rows)
        rows.append(jnp.sum(chunk_t * w3_col, axis=0, keepdims=True))   # (1, 128) f32
    logits = jnp.concatenate(rows, axis=0) + b3_ref[...]        # (s, 128) f32
    out_ref[...] = logits[None, :, :]


def _round_up(n, m):
    return ((n + m - 1) // m) * m


def mlp_logits(x_flat, prepared, rows_per_step=None):
    """x_flat: [N, 1024] (f32 or bf16) -> logits [N] f32 via the Pallas MLP kernel."""
    N, D = x_flat.shape
    assert D == D_IN
    if rows_per_step is None:
        # bf16 features: 2 B/elem x stream -> 2048-row tiles; f32 features: 1024
        # rows keeps double-buffered x + f32 intermediates well under 32 MiB.
        cap = 2048 if x_flat.dtype == jnp.bfloat16 else 1024
        rows_per_step = min(_round_up(max(N, 1), 128), cap)
    assert rows_per_step % 128 == 0
    s = rows_per_step // 128
    n_steps = pl.cdiv(N, rows_per_step)            # no forced 2nd padded step

    w1, b1, w2, b2, w3, b3 = prepared
    out = pl.pallas_call(
        _mlp_kernel,
        out_shape=jax.ShapeDtypeStruct((n_steps, s, 128), jnp.float32),
        grid_spec=pltpu.PrefetchScalarGridSpec(
            num_scalar_prefetch=0,
            grid=(n_steps,),
            in_specs=[
                pl.BlockSpec((rows_per_step, D_IN), lambda i: (i, 0)),  # x tile
                pl.BlockSpec((D_IN, H1), lambda i: (0, 0)),             # W1 (bf16, resident)
                pl.BlockSpec((1, H1), lambda i: (0, 0)),                # b1 (f32)
                pl.BlockSpec((H1, H2), lambda i: (0, 0)),               # W2 (bf16, resident)
                pl.BlockSpec((1, H2), lambda i: (0, 0)),                # b2 (f32)
                pl.BlockSpec((H2, 1), lambda i: (0, 0)),                # w3 column (f32)
                pl.BlockSpec((1, 128), lambda i: (0, 0)),               # b3 broadcast row (f32)
            ],
            out_specs=pl.BlockSpec((1, s, 128), lambda i: (i, 0, 0)),   # lane-dense logits
        ),
        compiler_params=pltpu.CompilerParams(
            dimension_semantics=("parallel",),
            vmem_limit_bytes=32 * 1024 * 1024,
        ),
    )(x_flat, w1, b1, w2, b2, w3, b3)
    # Padded-tail rows (undefined values) are sliced off before any reduction.
    return out.reshape(n_steps * rows_per_step)[:N]


# ------------------------------- module glue ---------------------------------
def init_params(key):
    """Deterministic PyTorch-style uniform(-1/sqrt(fan_in), 1/sqrt(fan_in)) init (f32)."""
    ks = jax.random.split(key, 6)

    def lin(kw, kb, fan_in, fan_out):
        bound = 1.0 / (fan_in ** 0.5)
        w = jax.random.uniform(kw, (fan_in, fan_out), jnp.float32, -bound, bound)
        b = jax.random.uniform(kb, (1, fan_out), jnp.float32, -bound, bound)
        return w, b

    w1, b1 = lin(ks[0], ks[1], D_IN, H1)
    w2, b2 = lin(ks[2], ks[3], H1, H2)
    w3, b3 = lin(ks[4], ks[5], H2, 1)
    return (w1, b1, w2, b2, w3, b3)


def prepare_params(params):
    """One-time kernel-side param prep: bf16 GEMM weights, f32 biases, b3 broadcast row."""
    w1, b1, w2, b2, w3, b3 = params
    return (
        w1.astype(jnp.bfloat16),
        b1.reshape(1, H1).astype(jnp.float32),
        w2.astype(jnp.bfloat16),
        b2.reshape(1, H2).astype(jnp.float32),
        w3.reshape(H2, 1).astype(jnp.float32),     # kept f32 (VPU/XLU path)
        jnp.zeros((1, 128), jnp.float32) + b3.reshape(1, 1).astype(jnp.float32),
    )


def binary_classifier_region_selection(
    top_region_features,       # [B, R, 1024] float32 (bf16 also accepted)
    class_detected,            # [B, R] bool
    prepared_params,
    return_loss,
    region_has_sentence=None,  # [B, R] bool
    training=False,
):
    B, R, D = top_region_features.shape
    x_flat = top_region_features.reshape(B * R, D)
    logits = mlp_logits(x_flat, prepared_params).reshape(B, R)   # == classifier(x).squeeze(-1)

    loss = None
    if return_loss:
        y = region_has_sentence.astype(jnp.float32)
        # BCEWithLogitsLoss(pos_weight=2.2) averaged over class_detected entries
        # (mirrors logits[class_detected] indexing in the PyTorch module).
        per_elem = POS_WEIGHT * y * jax.nn.softplus(-logits) + (1.0 - y) * jax.nn.softplus(logits)
        mask = class_detected.astype(jnp.float32)
        # NOTE: empty mask -> 0.0 here (PyTorch would give NaN); intentional.
        loss = jnp.sum(per_elem * mask) / jnp.maximum(jnp.sum(mask), 1.0)

    if training:
        return loss

    selected_regions = jnp.logical_and(logits > -1.0, class_detected)
    # TODO(synk): boolean-mask gather has a data-dependent output shape; done on
    # concrete arrays outside jit (mirrors torch boolean indexing), not in-kernel.
    selected_region_features = top_region_features[selected_regions]

    if return_loss:
        return loss, selected_regions, selected_region_features
    return selected_regions, selected_region_features


# ---------------------------------- main --------------------------------------
if __name__ == "__main__":
    key = jax.random.PRNGKey(0)
    k_par, k_x, k_det, k_sent = jax.random.split(key, 4)

    B, R = 2, 128  # batch=2, regions=128 -> N = 256 rows (one 256-row tile, s=2 chunks)
    params = init_params(k_par)
    prepared = prepare_params(params)      # one-time cast/layout prep (hoisted)

    top_region_features = jax.random.normal(k_x, (B, R, D_IN), jnp.float32)
    class_detected = jax.random.bernoulli(k_det, 0.7, (B, R))
    region_has_sentence = jax.random.bernoulli(k_sent, 0.5, (B, R))

    loss, selected_regions, selected_region_features = binary_classifier_region_selection(
        top_region_features,
        class_detected,
        prepared,
        return_loss=True,
        region_has_sentence=region_has_sentence,
        training=False,
    )

    jax.block_until_ready((loss, selected_regions, selected_region_features))
    print("KERNEL_OK")
</pallas_src>

<mosaic_0001>
module attributes {stable_mosaic.version = 11 : i64} {
  func.func @_mlp_kernel(%arg0: i32, %arg1: memref<256x1024xf32, #tpu.memory_space<vmem>>, %arg2: memref<1024x512xbf16, #tpu.memory_space<vmem>>, %arg3: memref<1x512xf32, #tpu.memory_space<vmem>>, %arg4: memref<512x128xbf16, #tpu.memory_space<vmem>>, %arg5: memref<1x128xf32, #tpu.memory_space<vmem>>, %arg6: memref<128x1xf32, #tpu.memory_space<vmem>>, %arg7: memref<1x128xf32, #tpu.memory_space<vmem>>, %arg8: memref<1x2x128xf32, #tpu.memory_space<vmem>>) attributes {dimension_semantics = [#tpu.dimension_semantics<parallel>], iteration_bounds = array<i64: 1>, scalar_prefetch = 0 : i64, scratch_operands = 0 : i64, tpu.core_type = #tpu.core_type<tc>, window_params = [{transform_indices = @transform_0, window_bounds = array<i64: 256, 1024>}, {pipeline_mode = #tpu.pipeline_mode<synchronous>, transform_indices = @transform_1, window_bounds = array<i64: 1024, 512>}, {pipeline_mode = #tpu.pipeline_mode<synchronous>, transform_indices = @transform_2, window_bounds = array<i64: 1, 512>}, {pipeline_mode = #tpu.pipeline_mode<synchronous>, transform_indices = @transform_3, window_bounds = array<i64: 512, 128>}, {pipeline_mode = #tpu.pipeline_mode<synchronous>, transform_indices = @transform_4, window_bounds = array<i64: 1, 128>}, {pipeline_mode = #tpu.pipeline_mode<synchronous>, transform_indices = @transform_5, window_bounds = array<i64: 128, 1>}, {pipeline_mode = #tpu.pipeline_mode<synchronous>, transform_indices = @transform_6, window_bounds = array<i64: 1, 128>}, {transform_indices = @transform_7, window_bounds = array<i64: 1, 2, 128>}]} {
    %c0 = arith.constant 0 : index
    %c0_0 = arith.constant 0 : index
    %0 = vector.load %arg1[%c0, %c0_0] : memref<256x1024xf32, #tpu.memory_space<vmem>>, vector<256x1024xf32>
    %1 = arith.truncf %0 : vector<256x1024xf32> to vector<256x1024xbf16>
    %c0_1 = arith.constant 0 : index
    %c0_2 = arith.constant 0 : index
    %2 = vector.load %arg2[%c0_1, %c0_2] : memref<1024x512xbf16, #tpu.memory_space<vmem>>, vector<1024x512xbf16>
    %cst = arith.constant dense<0.000000e+00> : vector<256x512xf32>
    %3 = tpu.matmul %1, %2, %cst {dimension_numbers = #tpu.dot_dimension_numbers<[1], [0], [0], [1], [0, 0, 1, 1], [], []>} : vector<256x1024xbf16>, vector<1024x512xbf16>, vector<256x512xf32> -> vector<256x512xf32>
    %c0_3 = arith.constant 0 : index
    %c0_4 = arith.constant 0 : index
    %4 = vector.load %arg3[%c0_3, %c0_4] : memref<1x512xf32, #tpu.memory_space<vmem>>, vector<1x512xf32>
    %5 = vector.broadcast %4 : vector<1x512xf32> to vector<256x512xf32>
    %6 = arith.addf %3, %5 : vector<256x512xf32>
    %cst_5 = arith.constant 0.000000e+00 : f32
    %7 = vector.broadcast %cst_5 : f32 to vector<256x512xf32>
    %8 = arith.maximumf %6, %7 : vector<256x512xf32>
    %9 = arith.truncf %8 : vector<256x512xf32> to vector<256x512xbf16>
    %c0_6 = arith.constant 0 : index
    %c0_7 = arith.constant 0 : index
    %10 = vector.load %arg4[%c0_6, %c0_7] : memref<512x128xbf16, #tpu.memory_space<vmem>>, vector<512x128xbf16>
    %cst_8 = arith.constant dense<0.000000e+00> : vector<256x128xf32>
    %11 = tpu.matmul %9, %10, %cst_8 {dimension_numbers = #tpu.dot_dimension_numbers<[1], [0], [0], [1], [0, 0, 1, 1], [], []>} : vector<256x512xbf16>, vector<512x128xbf16>, vector<256x128xf32> -> vector<256x128xf32>
    %c0_9 = arith.constant 0 : index
    %c0_10 = arith.constant 0 : index
    %12 = vector.load %arg5[%c0_9, %c0_10] : memref<1x128xf32, #tpu.memory_space<vmem>>, vector<1x128xf32>
    %13 = vector.broadcast %12 : vector<1x128xf32> to vector<256x128xf32>
    %14 = arith.addf %11, %13 : vector<256x128xf32>
    %cst_11 = arith.constant 0.000000e+00 : f32
    %15 = vector.broadcast %cst_11 : f32 to vector<256x128xf32>
    %16 = arith.maximumf %14, %15 : vector<256x128xf32>
    %17 = arith.truncf %16 : vector<256x128xf32> to vector<256x128xbf16>
    %c0_12 = arith.constant 0 : index
    %c0_13 = arith.constant 0 : index
    %18 = vector.load %arg6[%c0_12, %c0_13] : memref<128x1xf32, #tpu.memory_space<vmem>>, vector<128x1xf32>
    %19 = vector.extract_strided_slice %17 {offsets = [0, 0], sizes = [128, 128], strides = [1, 1]} : vector<256x128xbf16> to vector<128x128xbf16>
    %20 = tpu.transpose %19, [1, 0] : vector<128x128xbf16> -> vector<128x128xbf16>
    %21 = arith.extf %20 : vector<128x128xbf16> to vector<128x128xf32>
    %22 = vector.broadcast %18 : vector<128x1xf32> to vector<128x128xf32>
    %23 = arith.mulf %21, %22 : vector<128x128xf32>
    %cst_14 = arith.constant dense<0.000000e+00> : vector<128xf32>
    %24 = vector.multi_reduction <add>, %23, %cst_14 [0] : vector<128x128xf32> to vector<128xf32>
    %25 = vector.shape_cast %24 : vector<128xf32> to vector<1x128xf32>
    %26 = vector.extract_strided_slice %17 {offsets = [128, 0], sizes = [128, 128], strides = [1, 1]} : vector<256x128xbf16> to vector<128x128xbf16>
    %27 = tpu.transpose %26, [1, 0] : vector<128x128xbf16> -> vector<128x128xbf16>
    %28 = arith.extf %27 : vector<128x128xbf16> to vector<128x128xf32>
    %29 = vector.broadcast %18 : vector<128x1xf32> to vector<128x128xf32>
    %30 = arith.mulf %28, %29 : vector<128x128xf32>
    %cst_15 = arith.constant dense<0.000000e+00> : vector<128xf32>
    %31 = vector.multi_reduction <add>, %30, %cst_15 [0] : vector<128x128xf32> to vector<128xf32>
    %32 = vector.shape_cast %31 : vector<128xf32> to vector<1x128xf32>
    %33 = tpu.concatenate %25, %32 in 0 : vector<1x128xf32>, vector<1x128xf32> -> vector<2x128xf32>
    %c0_16 = arith.constant 0 : index
    %c0_17 = arith.constant 0 : index
    %34 = vector.load %arg7[%c0_16, %c0_17] : memref<1x128xf32, #tpu.memory_space<vmem>>, vector<1x128xf32>
    %35 = vector.broadcast %34 : vector<1x128xf32> to vector<2x128xf32>
    %36 = arith.addf %33, %35 : vector<2x128xf32>
    %37 = vector.shape_cast %36 : vector<2x128xf32> to vector<1x2x128xf32>
    %c0_18 = arith.constant 0 : index
    %c0_19 = arith.constant 0 : index
    %c0_20 = arith.constant 0 : index
    %38 = vector.load %arg8[%c0_18, %c0_19, %c0_20] : memref<1x2x128xf32, #tpu.memory_space<vmem>>, vector<1x2x128xf32>
    tpu.vector_store %arg8[%c0_18, %c0_19, %c0_20], %37 {strides = array<i32>} : memref<1x2x128xf32, #tpu.memory_space<vmem>>, vector<1x2x128xf32>,
    return
  }
  func.func @transform_0(%arg0: i32) -> (i32, i32) {
    %c0_i32 = arith.constant 0 : i32
    %c0_i32_0 = arith.constant 0 : i32
    return %arg0, %c0_i32 : i32, i32
  }
  func.func @transform_1(%arg0: i32) -> (i32, i32) {
    %c0_i32 = arith.constant 0 : i32
    %c0_i32_0 = arith.constant 0 : i32
    %c0_i32_1 = arith.constant 0 : i32
    return %c0_i32, %c0_i32_0 : i32, i32
  }
  func.func @transform_2(%arg0: i32) -> (i32, i32) {
    %c0_i32 = arith.constant 0 : i32
    %c0_i32_0 = arith.constant 0 : i32
    %c0_i32_1 = arith.constant 0 : i32
    return %c0_i32, %c0_i32_0 : i32, i32
  }
  func.func @transform_3(%arg0: i32) -> (i32, i32) {
    %c0_i32 = arith.constant 0 : i32
    %c0_i32_0 = arith.constant 0 : i32
    %c0_i32_1 = arith.constant 0 : i32
    return %c0_i32, %c0_i32_0 : i32, i32
  }
  func.func @transform_4(%arg0: i32) -> (i32, i32) {
    %c0_i32 = arith.constant 0 : i32
    %c0_i32_0 = arith.constant 0 : i32
    %c0_i32_1 = arith.constant 0 : i32
    return %c0_i32, %c0_i32_0 : i32, i32
  }
  func.func @transform_5(%arg0: i32) -> (i32, i32) {
    %c0_i32 = arith.constant 0 : i32
    %c0_i32_0 = arith.constant 0 : i32
    %c0_i32_1 = arith.constant 0 : i32
    return %c0_i32, %c0_i32_0 : i32, i32
  }
  func.func @transform_6(%arg0: i32) -> (i32, i32) {
    %c0_i32 = arith.constant 0 : i32
    %c0_i32_0 = arith.constant 0 : i32
    %c0_i32_1 = arith.constant 0 : i32
    return %c0_i32, %c0_i32_0 : i32, i32
  }
  func.func @transform_7(%arg0: i32) -> (i32, i32, i32) {
    %c0_i32 = arith.constant 0 : i32
    %c0_i32_0 = arith.constant 0 : i32
    %c0_i32_1 = arith.constant 0 : i32
    return %arg0, %c0_i32, %c0_i32_0 : i32, i32, i32
  }
}

</mosaic_0001>

<bundles_post_ra>
// kernel: tpu_custom_call.1
= control target key start
LH: loop header
LB: loop body
LE: loop exit
PB: predicated region body
PF: predicated region fallthrough
CT: control target
= control target key end

     0   :  { %12 = vsyncpa [#allocation3], 0  ;;  %s7140_s0 = inlined_call_operand.hbm [shape: f32[256,1024], index: 0, kind: input, shape index: {}]   ;;  %s7141_s1 = inlined_call_operand.hbm [shape: bf16[1024,512], index: 1, kind: input, shape index: {}]   ;;  %s7142_s2 = inlined_call_operand.vmem [shape: f32[1,512], index: 2, kind: input, shape index: {}]   ;;  %s7143_s3 = inlined_call_operand.hbm [shape: bf16[512,128], index: 3, kind: input, shape index: {}]   ;;  %s7144_s4 = inlined_call_operand.vmem [shape: f32[1,128], index: 4, kind: input, shape index: {}]   ;;  %s7145_s5 = inlined_call_operand.vmem [shape: f32[128,1], index: 5, kind: input, shape index: {}]   ;;  %s7146_s6 = inlined_call_operand.vmem [shape: f32[1,128], index: 6, kind: input, shape index: {}]   ;;  %s7147_s7 = inlined_call_operand.hbm [shape: f32[1,2,128], index: 7, kind: output, shape index: {}]  }
   0x1   :  { %13 = vsyncpa [#allocation6], 0 }
   0x2   :  { %14 = vsyncpa [#allocation4], 0  ;;  %s5670_s24 = smov [#allocation5]  }
   0x3   :  { %s32_s25 = sshll.u32 %s5670_s24, 4  ;;  %s33_s25 = int_to_ptr.vmem [resolvable:$true] %s32_s25 }
   0x4   :  { %s5592_s26 = scalar_lea.vmem %s33_s25, 32768  ;;  %p5597_p1 = scmp.lt.s32.totalorder %s33_s25, %s33_s25 }
   0x5   :  { %p5593_p0 = scmp.ne.s32.totalorder %s33_s25, %s5592_s26  ;;  %p5598_p2 = scmp.lt.s32.totalorder %s5592_s26, %s5592_s26 }
   0x7   :  { %p5599_p3 = por %p5598_p2, %p5597_p1 }
   0x9   :  { %p5600_p4 = pnand %p5599_p3, %p5593_p0 }
   0xb   :  { %5603 = shalt.err (!%p5600_p4)
}
   0xc   :  { %s5671_s27 = smov 256   ;;  %s5672_s28 = smov 16  }
   0xd   :  { %38 = dma.hbm_to_vmem [thread:$0]  %s7141_s1, 32768, %s33_s25, [#allocation6], %s5671_s27, %s5671_s27, %s5672_s28  }
   0xe   :  { %s5673_s8 = smov [#allocation2]  }
   0xf   :  { %s20_s9 = sshll.u32 %s5673_s8, 4  ;;  %s21_s9 = int_to_ptr.vmem [resolvable:$true] %s20_s9 }
  0x10   :  { %s5612_s10 = scalar_lea.vmem %s21_s9, 32768  ;;  %p5617_p6 = scmp.lt.s32.totalorder %s21_s9, %s21_s9 }
  0x11   :  { %p5613_p5 = scmp.ne.s32.totalorder %s21_s9, %s5612_s10  ;;  %p5618_p7 = scmp.lt.s32.totalorder %s5612_s10, %s5612_s10 }
  0x13   :  { %p5619_p8 = por %p5618_p7, %p5617_p6 }
  0x15   :  { %p5620_p9 = pnand %p5619_p8, %p5613_p5 }
  0x17   :  { %5623 = shalt.err (!%p5620_p9)
}
  0x18   :  { %s5674_s11 = smov 1024   ;;  %s5675_s12 = smov 64  }
  0x19   :  { %26 = dma.hbm_to_vmem [thread:$0]  %s7140_s0, 32768, %s21_s9, [#allocation3], %s5674_s11, %s5674_s11, %s5675_s12  }
  0x1a   :  { %s5676_s15 = smov [#allocation7]  }
  0x1b   :  { %s46_s16 = sshll.u32 %s5676_s15, 4  ;;  %s47_s16 = int_to_ptr.vmem [resolvable:$true] %s46_s16 }
  0x1c   :  { %s5632_s1 = scalar_lea.vmem %s47_s16, 4096  ;;  %p5637_p11 = scmp.lt.s32.totalorder %s47_s16, %s47_s16 }
  0x1d   :  { %p5633_p10 = scmp.ne.s32.totalorder %s47_s16, %s5632_s1  ;;  %p5638_p12 = scmp.lt.s32.totalorder %s5632_s1, %s5632_s1 }
  0x1f   :  { %p5639_p13 = por %p5638_p12, %p5637_p11 }
  0x21   :  { %p5640_p0 = pnand %p5639_p13, %p5633_p10 }
  0x23   :  { %5643 = shalt.err (!%p5640_p0)
}
  0x24   :  { %s5677_s17 = smov 4  }
  0x25   :  { %52 = dma.hbm_to_vmem [thread:$0]  %s7143_s3, 4096, %s47_s16, [#allocation6], %s5675_s12, %s5675_s12, %s5677_s17  }
  0x26   :  { %5664 = dma.done.wait [#allocation3], 32768  }
  0x27   :  { %5665 = vsyncadd [#allocation3], 4294934528 }
  0x28   :  { %5666 = dma.done.wait [#allocation6], 36864  }
  0x29   :  { %5667 = vsyncadd [#allocation6], 4294930432  ;;  %v5167_v0 = vld [vmem:[#allocation5 + $0xe4] ss:$16 sps:$4 sm:$0xff]   ;;  %v5171_v2 = vld [vmem:[#allocation5 + $0xe0] ss:$16 sps:$4 sm:$0xff]  }
  0x2a   :  { %v5169_v1 = vld [vmem:[#allocation5 + $0x2e4] ss:$16 sps:$4 sm:$0xff]   ;;  %2011 = vmatprep.subr.bf16.mxu0 %v5167_v0  ;;  %v5172_v3 = vld [vmem:[#allocation5 + $0x2e0] ss:$16 sps:$4 sm:$0xff]   ;;  %v70_v46 = vld [vmem:[#allocation2 + $0x8] sm:$0xff]  ;;  %vm4614_vm0 = vcmask 1040384  }
  0x2b   :  { %2204 = vmatprep.subr.bf16.mxu1 %v5169_v1  ;;  %v5173_v4 = vld [vmem:[#allocation5 + $0xc4] ss:$16 sps:$4 sm:$0xff]   ;;  %2012 = vmatpush1.bf16.msra.mxu0 %v5171_v2  ;;  %v5177_v6 = vld [vmem:[#allocation5 + $0xc0] ss:$16 sps:$4 sm:$0xff]   ;;  %v78_v47 = vld [vmem:[#allocation2 + $0x48] sm:$0xff]  ;;  %s5679_s28 = smov [#allocation8]  }
  0x2c   :  { %2205 = vmatpush1.bf16.msra.mxu1 %v5172_v3  ;;  %v5175_v5 = vld [vmem:[#allocation5 + $0x2c4] ss:$16 sps:$4 sm:$0xff]   ;;  %2013 = vmatprep.subr.bf16.mxu0 %v5173_v4  ;;  %v5178_v7 = vld [vmem:[#allocation5 + $0x2c0] ss:$16 sps:$4 sm:$0xff]   ;;  %v72_v48 = vld [vmem:[#allocation2 + $0x18] sm:$0xff]  ;;  %v5729_v53 = vpack.c.bf16 %v78_v47, %v70_v46  ;;  %s4631_s29 = sshll.u32 %s5679_s28, 4  ;;  %s4632_s29 = int_to_ptr.vmem [resolvable:$true] %s4631_s29 }
  0x2d   :  { %2206 = vmatprep.subr.bf16.mxu1 %v5175_v5  ;;  %v5179_v8 = vld [vmem:[#allocation5 + $0xa4] ss:$16 sps:$4 sm:$0xff]   ;;  %v5183_v10 = vld [vmem:[#allocation5 + $0xa0] ss:$16 sps:$4 sm:$0xff]   ;;  %v80_v49 = vld [vmem:[#allocation2 + $0x58] sm:$0xff]  ;;  %s5644_s30 = scalar_lea.vmem %s4632_s29, 32  ;;  %p5649_p2 = scmp.lt.s32.totalorder %s4632_s29, %s4632_s29 }
  0x2e   :  { %v5181_v9 = vld [vmem:[#allocation5 + $0x2a4] ss:$16 sps:$4 sm:$0xff]   ;;  %v5184_v11 = vld [vmem:[#allocation5 + $0x2a0] ss:$16 sps:$4 sm:$0xff]   ;;  %v5731_v54 = vpack.c.bf16 %v80_v49, %v72_v48  ;;  %2043 = vmatprep.mubr.bf16.mxu0 %v5729_v53  ;;  %v118_v48 = vld [vmem:[#allocation2 + $0x188] sm:$0xff]  ;;  %p5645_p1 = scmp.ne.s32.totalorder %s4632_s29, %s5644_s30  ;;  %p5650_p3 = scmp.lt.s32.totalorder %s5644_s30, %s5644_s30 }
  0x2f   :  { %2014 = vmatpush1.bf16.msra.mxu0 %v5177_v6  ;;  %v5185_v12 = vld [vmem:[#allocation5 + $0x84] ss:$16 sps:$4 sm:$0xff]   ;;  %v5189_v14 = vld [vmem:[#allocation5 + $0x80] ss:$16 sps:$4 sm:$0xff]   ;;  %v126_v49 = vld [vmem:[#allocation2 + $0x1c8] sm:$0xff] }
  0x30   :  { %2207 = vmatpush1.bf16.msra.mxu1 %v5178_v7  ;;  %2015 = vmatprep.subr.bf16.mxu0 %v5179_v8  ;;  %v5187_v13 = vld [vmem:[#allocation5 + $0x284] ss:$16 sps:$4 sm:$0xff]   ;;  %v5190_v15 = vld [vmem:[#allocation5 + $0x280] ss:$16 sps:$4 sm:$0xff]   ;;  %p5651_p4 = por %p5650_p3, %p5649_p2 }
  0x31   :  { %2208 = vmatprep.subr.bf16.mxu1 %v5181_v9  ;;  %v5191_v16 = vld [vmem:[#allocation5 + $0x64] ss:$16 sps:$4 sm:$0xff]   ;;  %v5195_v18 = vld [vmem:[#allocation5 + $0x60] ss:$16 sps:$4 sm:$0xff]   ;;  %2236 = vmatprep.mubr.bf16.mxu1 %v5731_v54 }
  0x32   :  { %v5193_v17 = vld [vmem:[#allocation5 + $0x264] ss:$16 sps:$4 sm:$0xff]   ;;  %v5196_v19 = vld [vmem:[#allocation5 + $0x260] ss:$16 sps:$4 sm:$0xff]   ;;  %p5652_p5 = pnand %p5651_p4, %p5645_p1 }
  0x33   :  { %2016 = vmatpush1.bf16.msra.mxu0 %v5183_v10  ;;  %v5197_v20 = vld [vmem:[#allocation5 + $0x44] ss:$16 sps:$4 sm:$0xff]   ;;  %v5201_v22 = vld [vmem:[#allocation5 + $0x40] ss:$16 sps:$4 sm:$0xff]  }
  0x34   :  { %2209 = vmatpush1.bf16.msra.mxu1 %v5184_v11  ;;  %2017 = vmatprep.subr.bf16.mxu0 %v5185_v12  ;;  %v5199_v21 = vld [vmem:[#allocation5 + $0x244] ss:$16 sps:$4 sm:$0xff]   ;;  %v5202_v23 = vld [vmem:[#allocation5 + $0x240] ss:$16 sps:$4 sm:$0xff]   ;;  %v86_v12 = vld [vmem:[#allocation2 + $0x88] sm:$0xff] }
  0x35   :  { %2210 = vmatprep.subr.bf16.mxu1 %v5187_v13  ;;  %v5203_v24 = vld [vmem:[#allocation5 + $0x24] ss:$16 sps:$4 sm:$0xff]   ;;  %v5207_v26 = vld [vmem:[#allocation5 + $0x20] ss:$16 sps:$4 sm:$0xff]   ;;  %v94_v13 = vld [vmem:[#allocation2 + $0xc8] sm:$0xff] }
  0x36   :  { %v5205_v25 = vld [vmem:[#allocation5 + $0x224] ss:$16 sps:$4 sm:$0xff]   ;;  %v5208_v27 = vld [vmem:[#allocation5 + $0x220] ss:$16 sps:$4 sm:$0xff]  }
  0x37   :  { %2018 = vmatpush1.bf16.msra.mxu0 %v5189_v14  ;;  %v5209_v28 = vld [vmem:[#allocation5 + $0x4] ss:$16 sps:$4 sm:$0xff]   ;;  %v5213_v30 = vld [vmem:[#allocation5] ss:$16 sps:$4 sm:$0xff]   ;;  %v88_v14 = vld [vmem:[#allocation2 + $0x98] sm:$0xff] }
  0x38   :  { %2211 = vmatpush1.bf16.msra.mxu1 %v5190_v15  ;;  %2019 = vmatprep.subr.bf16.mxu0 %v5191_v16  ;;  %v5211_v29 = vld [vmem:[#allocation5 + $0x204] ss:$16 sps:$4 sm:$0xff]   ;;  %v5214_v31 = vld [vmem:[#allocation5 + $0x200] ss:$16 sps:$4 sm:$0xff]   ;;  %v96_v15 = vld [vmem:[#allocation2 + $0xd8] sm:$0xff] }
  0x39   :  { %2212 = vmatprep.subr.bf16.mxu1 %v5193_v17  ;;  %v5215_v32 = vld [vmem:[#allocation5 + $0x1e4] ss:$16 sps:$4 sm:$0xff]   ;;  %v5219_v34 = vld [vmem:[#allocation5 + $0x1e0] ss:$16 sps:$4 sm:$0xff]  }
  0x3a   :  { %v5217_v33 = vld [vmem:[#allocation5 + $0x3e4] ss:$16 sps:$4 sm:$0xff]   ;;  %v5220_v35 = vld [vmem:[#allocation5 + $0x3e0] ss:$16 sps:$4 sm:$0xff]  }
  0x3b   :  { %2020 = vmatpush1.bf16.msra.mxu0 %v5195_v18  ;;  %v5221_v36 = vld [vmem:[#allocation5 + $0x1c4] ss:$16 sps:$4 sm:$0xff]   ;;  %v5225_v38 = vld [vmem:[#allocation5 + $0x1c0] ss:$16 sps:$4 sm:$0xff]  }
  0x3c   :  { %2213 = vmatpush1.bf16.msra.mxu1 %v5196_v19  ;;  %2021 = vmatprep.subr.bf16.mxu0 %v5197_v20  ;;  %v5223_v37 = vld [vmem:[#allocation5 + $0x3c4] ss:$16 sps:$4 sm:$0xff]   ;;  %v5226_v39 = vld [vmem:[#allocation5 + $0x3c0] ss:$16 sps:$4 sm:$0xff]   ;;  %v5739_v20 = vpack.c.bf16 %v94_v13, %v86_v12 }
  0x3d   :  { %2214 = vmatprep.subr.bf16.mxu1 %v5199_v21  ;;  %v5227_v40 = vld [vmem:[#allocation5 + $0x1a4] ss:$16 sps:$4 sm:$0xff]   ;;  %v5231_v42 = vld [vmem:[#allocation5 + $0x1a0] ss:$16 sps:$4 sm:$0xff]   ;;  %v5741_v21 = vpack.c.bf16 %v96_v15, %v88_v14 }
  0x3e   :  { %v5229_v41 = vld [vmem:[#allocation5 + $0x3a4] ss:$16 sps:$4 sm:$0xff]   ;;  %v5232_v43 = vld [vmem:[#allocation5 + $0x3a0] ss:$16 sps:$4 sm:$0xff]  }
  0x3f   :  { %2022 = vmatpush1.bf16.msra.mxu0 %v5201_v22  ;;  %v5233_v44 = vld [vmem:[#allocation5 + $0x184] ss:$16 sps:$4 sm:$0xff]   ;;  %v5237_v50 = vld [vmem:[#allocation5 + $0x180] ss:$16 sps:$4 sm:$0xff]  }
  0x40   :  { %2215 = vmatpush1.bf16.msra.mxu1 %v5202_v23  ;;  %2023 = vmatprep.subr.bf16.mxu0 %v5203_v24  ;;  %v5235_v45 = vld [vmem:[#allocation5 + $0x384] ss:$16 sps:$4 sm:$0xff]   ;;  %v5238_v51 = vld [vmem:[#allocation5 + $0x380] ss:$16 sps:$4 sm:$0xff]  }
  0x41   :  { %2216 = vmatprep.subr.bf16.mxu1 %v5205_v25  ;;  %v5239_v52 = vld [vmem:[#allocation5 + $0x164] ss:$16 sps:$4 sm:$0xff]   ;;  %v5243_v56 = vld [vmem:[#allocation5 + $0x160] ss:$16 sps:$4 sm:$0xff]  }
  0x42   :  { %v5241_v55 = vld [vmem:[#allocation5 + $0x364] ss:$16 sps:$4 sm:$0xff]   ;;  %v5244_v57 = vld [vmem:[#allocation5 + $0x360] ss:$16 sps:$4 sm:$0xff]  }
  0x43   :  { %2024 = vmatpush1.bf16.msra.mxu0 %v5207_v26  ;;  %v5245_v58 = vld [vmem:[#allocation5 + $0x144] ss:$16 sps:$4 sm:$0xff]   ;;  %v5249_v60 = vld [vmem:[#allocation5 + $0x140] ss:$16 sps:$4 sm:$0xff]  }
  0x44   :  { %2217 = vmatpush1.bf16.msra.mxu1 %v5208_v27  ;;  %2025 = vmatprep.subr.bf16.mxu0 %v5209_v28  ;;  %v5247_v59 = vld [vmem:[#allocation5 + $0x344] ss:$16 sps:$4 sm:$0xff]   ;;  %v5250_v61 = vld [vmem:[#allocation5 + $0x340] ss:$16 sps:$4 sm:$0xff]  }
  0x45   :  { %2218 = vmatprep.subr.bf16.mxu1 %v5211_v29  ;;  %v5251_v62 = vld [vmem:[#allocation5 + $0x124] ss:$16 sps:$4 sm:$0xff]   ;;  %v5255_v0 = vld [vmem:[#allocation5 + $0x120] ss:$16 sps:$4 sm:$0xff]  }
  0x46   :  { %v5253_v63 = vld [vmem:[#allocation5 + $0x324] ss:$16 sps:$4 sm:$0xff]   ;;  %v5256_v1 = vld [vmem:[#allocation5 + $0x320] ss:$16 sps:$4 sm:$0xff]  }
  0x47   :  { %2026 = vmatpush1.bf16.msra.mxu0 %v5213_v30  ;;  %v5257_v2 = vld [vmem:[#allocation5 + $0x104] ss:$16 sps:$4 sm:$0xff]   ;;  %v5261_v4 = vld [vmem:[#allocation5 + $0x100] ss:$16 sps:$4 sm:$0xff]   ;;  %v102_v30 = vld [vmem:[#allocation2 + $0x108] sm:$0xff] }
  0x48   :  { %2219 = vmatpush1.bf16.msra.mxu1 %v5214_v31  ;;  %2027 = vmatprep.subr.bf16.mxu0 %v5215_v32  ;;  %v5259_v3 = vld [vmem:[#allocation5 + $0x304] ss:$16 sps:$4 sm:$0xff]   ;;  %v5262_v5 = vld [vmem:[#allocation5 + $0x300] ss:$16 sps:$4 sm:$0xff]   ;;  %v110_v31 = vld [vmem:[#allocation2 + $0x148] sm:$0xff] }
  0x49   :  { %2220 = vmatprep.subr.bf16.mxu1 %v5217_v33  ;;  %v69_v6 = vld [vmem:[#allocation2] sm:$0xff]  ;;  %v71_v8 = vld [vmem:[#allocation2 + $0x10] sm:$0xff]  ;;  %v104_v32 = vld [vmem:[#allocation2 + $0x118] sm:$0xff] }
  0x4a   :  { %v77_v7 = vld [vmem:[#allocation2 + $0x40] sm:$0xff]  ;;  %v79_v9 = vld [vmem:[#allocation2 + $0x50] sm:$0xff]  ;;  %v112_v33 = vld [vmem:[#allocation2 + $0x158] sm:$0xff] }
  0x4b   :  { %2028 = vmatpush2.bf16.msra.mxu0 %v5219_v34  ;;  %v5265_v10 = vld [vmem:[#allocation5 + $0x4e4] ss:$16 sps:$4 sm:$0xff]   ;;  %v5735_v16 = vpack.c.bf16 %v77_v7, %v69_v6  ;;  %v5737_v17 = vpack.c.bf16 %v79_v9, %v71_v8  ;;  %v5263_v18 = vld [vmem:[#allocation5 + $0x4e0] ss:$16 sps:$4 sm:$0xff]   ;;  %v134_v6 = vld [vmem:[#allocation2 + $0x208] sm:$0xff] }
  0x4c   :  { %2221 = vmatpush2.bf16.msra.mxu1 %v5220_v35  ;;  %2029 = vmatprep.subr.bf16.mxu0 %v5221_v36  ;;  %v5268_v11 = vld [vmem:[#allocation5 + $0x6e4] ss:$16 sps:$4 sm:$0xff]   ;;  %v5266_v19 = vld [vmem:[#allocation5 + $0x6e0] ss:$16 sps:$4 sm:$0xff]   ;;  %v142_v7 = vld [vmem:[#allocation2 + $0x248] sm:$0xff] }
  0x4d   :  { %2222 = vmatprep.subr.bf16.mxu1 %v5223_v37  ;;  %v5271_v22 = vld [vmem:[#allocation5 + $0x4c4] ss:$16 sps:$4 sm:$0xff]   ;;  %v5269_v27 = vld [vmem:[#allocation5 + $0x4c0] ss:$16 sps:$4 sm:$0xff]   ;;  %v136_v8 = vld [vmem:[#allocation2 + $0x218] sm:$0xff] }
  0x4e   :  { %v85_v23 = vld [vmem:[#allocation2 + $0x80] sm:$0xff]  ;;  %v87_v25 = vld [vmem:[#allocation2 + $0x90] sm:$0xff]  ;;  %v144_v9 = vld [vmem:[#allocation2 + $0x258] sm:$0xff] }
  0x4f   :  { %2030 = vmatpush2.bf16.msra.mxu0 %v5225_v38  ;;  %v93_v24 = vld [vmem:[#allocation2 + $0xc0] sm:$0xff]  ;;  %v95_v26 = vld [vmem:[#allocation2 + $0xd0] sm:$0xff]  ;;  %v5751_v38 = vpack.c.bf16 %v110_v31, %v102_v30  ;;  %v150_v30 = vld [vmem:[#allocation2 + $0x288] sm:$0xff] }
  0x50   :  { %2223 = vmatpush2.bf16.msra.mxu1 %v5226_v39  ;;  %2031 = vmatprep.subr.bf16.mxu0 %v5227_v40  ;;  %v5272_v28 = vld [vmem:[#allocation5 + $0x6c0] ss:$16 sps:$4 sm:$0xff]   ;;  %v5274_v29 = vld [vmem:[#allocation5 + $0x6c4] ss:$16 sps:$4 sm:$0xff]   ;;  %v5747_v36 = vpack.c.bf16 %v93_v24, %v85_v23  ;;  %v5749_v37 = vpack.c.bf16 %v95_v26, %v87_v25  ;;  %v5753_v39 = vpack.c.bf16 %v112_v33, %v104_v32  ;;  %v158_v31 = vld [vmem:[#allocation2 + $0x2c8] sm:$0xff] }
  0x51   :  { %2224 = vmatprep.subr.bf16.mxu1 %v5229_v41  ;;  %v5277_v34 = vld [vmem:[#allocation5 + $0x4a4] ss:$16 sps:$4 sm:$0xff]   ;;  %v5275_v40 = vld [vmem:[#allocation5 + $0x4a0] ss:$16 sps:$4 sm:$0xff]   ;;  %v152_v32 = vld [vmem:[#allocation2 + $0x298] sm:$0xff] }
  0x52   :  { %v5280_v35 = vld [vmem:[#allocation5 + $0x6a4] ss:$16 sps:$4 sm:$0xff]   ;;  %v5278_v41 = vld [vmem:[#allocation5 + $0x6a0] ss:$16 sps:$4 sm:$0xff]   ;;  %v160_v33 = vld [vmem:[#allocation2 + $0x2d8] sm:$0xff] }
  0x53   :  { %2032 = vmatpush2.bf16.msra.mxu0 %v5231_v42  ;;  %v101_v42 = vld [vmem:[#allocation2 + $0x100] sm:$0xff]  ;;  %v111_v47 = vld [vmem:[#allocation2 + $0x150] sm:$0xff] }
  0x54   :  { %2225 = vmatpush2.bf16.msra.mxu1 %v5232_v43  ;;  %2033 = vmatprep.subr.bf16.mxu0 %v5233_v44  ;;  %v109_v43 = vld [vmem:[#allocation2 + $0x140] sm:$0xff]  ;;  %v103_v44 = vld [vmem:[#allocation2 + $0x110] sm:$0xff] }
  0x55   :  { %2226 = vmatprep.subr.bf16.mxu1 %v5235_v45  ;;  %v5283_v45 = vld [vmem:[#allocation5 + $0x484] ss:$16 sps:$4 sm:$0xff]   ;;  %v5302_v23 = vld [vmem:[#allocation5 + $0x620] ss:$16 sps:$4 sm:$0xff]  }
  0x56   :  { %v5286_v46 = vld [vmem:[#allocation5 + $0x684] ss:$16 sps:$4 sm:$0xff]  }
  0x57   :  { %2034 = vmatpush2.bf16.msra.mxu0 %v5237_v50  ;;  %v120_v50 = vld [vmem:[#allocation2 + $0x198] sm:$0xff]  ;;  %v5301_v12 = vld [vmem:[#allocation5 + $0x424] ss:$16 sps:$4 sm:$0xff]  }
  0x58   :  { %2227 = vmatpush2.bf16.msra.mxu1 %v5238_v51  ;;  %2035 = vmatprep.subr.bf16.mxu0 %v5239_v52  ;;  %v128_v51 = vld [vmem:[#allocation2 + $0x1d8] sm:$0xff]  ;;  %v5281_v52 = vld [vmem:[#allocation5 + $0x480] ss:$16 sps:$4 sm:$0xff]   ;;  %v5304_v13 = vld [vmem:[#allocation5 + $0x624] ss:$16 sps:$4 sm:$0xff]  }
  0x59   :  { %2228 = vmatprep.subr.bf16.mxu1 %v5241_v55  ;;  %v5284_v55 = vld [vmem:[#allocation5 + $0x680] ss:$16 sps:$4 sm:$0xff]  }
  0x5a   :  { %v133_v24 = vld [vmem:[#allocation2 + $0x200] sm:$0xff]  ;;  %v135_v26 = vld [vmem:[#allocation2 + $0x210] sm:$0xff] }
  0x5b   :  { %2036 = vmatpush2.bf16.msra.mxu0 %v5243_v56  ;;  %v5289_v56 = vld [vmem:[#allocation5 + $0x464] ss:$16 sps:$4 sm:$0xff]  }
  0x5c   :  { %2229 = vmatpush2.bf16.msra.mxu1 %v5244_v57  ;;  %2037 = vmatprep.subr.bf16.mxu0 %v5245_v58  ;;  %v5292_v57 = vld [vmem:[#allocation5 + $0x664] ss:$16 sps:$4 sm:$0xff]   ;;  %v5759_v58 = vpack.c.bf16 %v109_v43, %v101_v42 }
  0x5d   :  { %2230 = vmatprep.subr.bf16.mxu1 %v5247_v59  ;;  %v5761_v59 = vpack.c.bf16 %v111_v47, %v103_v44  ;;  %v141_v25 = vld [vmem:[#allocation2 + $0x240] sm:$0xff]  ;;  %v5787_v44 = vpack.c.bf16 %v158_v31, %v150_v30 }
  0x5e   :  { %v5783_v42 = vpack.c.bf16 %v141_v25, %v133_v24  ;;  %v5314_v47 = vld [vmem:[#allocation5 + $0x7e0] ss:$16 sps:$4 sm:$0xff]   ;;  %v182_v24 = vld [vmem:[#allocation2 + $0x388] sm:$0xff]  ;;  %v5337_v30 = vld [vmem:[#allocation5 + $0x564] ss:$16 sps:$4 sm:$0xff]  }
  0x5f   :  { %2038 = vmatpush2.bf16.msra.mxu0 %v5249_v60  ;;  %v5763_v60 = vpack.c.bf16 %v126_v49, %v118_v48  ;;  %v149_v48 = vld [vmem:[#allocation2 + $0x280] sm:$0xff]  ;;  %v190_v25 = vld [vmem:[#allocation2 + $0x3c8] sm:$0xff] }
  0x60   :  { %2231 = vmatpush2.bf16.msra.mxu1 %v5250_v61  ;;  %2039 = vmatprep.subr.bf16.mxu0 %v5251_v62  ;;  %v5765_v61 = vpack.c.bf16 %v128_v51, %v120_v50  ;;  %v5287_v62 = vld [vmem:[#allocation5 + $0x460] ss:$16 sps:$4 sm:$0xff]  }
  0x61   :  { %2232 = vmatprep.subr.bf16.mxu1 %v5253_v63  ;;  %v5290_v63 = vld [vmem:[#allocation5 + $0x660] ss:$16 sps:$4 sm:$0xff]  }
  0x62   :  { %v157_v49 = vld [vmem:[#allocation2 + $0x2c0] sm:$0xff]  ;;  %v151_v50 = vld [vmem:[#allocation2 + $0x290] sm:$0xff] }
  0x63   :  { %2040 = vmatpush2.bf16.msra.mxu0 %v5255_v0  ;;  %v117_v0 = vld [vmem:[#allocation2 + $0x180] sm:$0xff]  ;;  %v159_v51 = vld [vmem:[#allocation2 + $0x2d0] sm:$0xff] }
  0x64   :  { %2233 = vmatpush2.bf16.msra.mxu1 %v5256_v1  ;;  %2041 = vmatprep.subr.bf16.mxu0 %v5257_v2  ;;  %v125_v1 = vld [vmem:[#allocation2 + $0x1c0] sm:$0xff]  ;;  %v119_v2 = vld [vmem:[#allocation2 + $0x190] sm:$0xff] }
  0x65   :  { %2234 = vmatprep.subr.bf16.mxu1 %v5259_v3  ;;  %v127_v3 = vld [vmem:[#allocation2 + $0x1d0] sm:$0xff]  ;;  %v5771_v14 = vpack.c.bf16 %v125_v1, %v117_v0 }
  0x66   :  { %v5773_v15 = vpack.c.bf16 %v127_v3, %v119_v2  ;;  %v5317_v0 = vld [vmem:[#allocation5 + $0x5c0] ss:$16 sps:$4 sm:$0xff]   ;;  %v5325_v2 = vld [vmem:[#allocation5 + $0x5a4] ss:$16 sps:$4 sm:$0xff]  }
  0x67   :  { %2042 = vmatpush2.bf16.msra.mxu0 %v5261_v4  ;;  %v5295_v4 = vld [vmem:[#allocation5 + $0x444] ss:$16 sps:$4 sm:$0xff]   ;;  %v5320_v1 = vld [vmem:[#allocation5 + $0x7c0] ss:$16 sps:$4 sm:$0xff]  }
  0x68   :  { %2235 = vmatpush2.bf16.msra.mxu1 %v5262_v5  ;;  %2397 = vmatprep.subr.bf16.mxu0 %v5265_v10  ;;  %v5298_v5 = vld [vmem:[#allocation5 + $0x644] ss:$16 sps:$4 sm:$0xff]   ;;  %v5293_v10 = vld [vmem:[#allocation5 + $0x440] ss:$16 sps:$4 sm:$0xff]  }
  0x69   :  { %2590 = vmatprep.subr.bf16.mxu1 %v5268_v11  ;;  %v5296_v11 = vld [vmem:[#allocation5 + $0x640] ss:$16 sps:$4 sm:$0xff]   ;;  %v5328_v3 = vld [vmem:[#allocation5 + $0x7a4] ss:$16 sps:$4 sm:$0xff]  }
  0x6a   :  { %2044 = vmatmul.mubr.bf16.vlgmr.msra.gmra.mxu0 %v5735_v16 }
  0x6b   :  { %2237 = vmatmul.mubr.bf16.vlgmr.msra.gmra.mxu1 %v5737_v17  ;;  %2398 = vmatpush1.bf16.msra.mxu0 %v5263_v18  ;;  %v5775_v18 = vpack.c.bf16 %v142_v7, %v134_v6 }
  0x6c   :  { %2591 = vmatpush1.bf16.msra.mxu1 %v5266_v19  ;;  %2053 = vmatprep.mubr.bf16.mxu0 %v5739_v20  ;;  %v5777_v19 = vpack.c.bf16 %v144_v9, %v136_v8  ;;  %v5323_v8 = vld [vmem:[#allocation5 + $0x5a0] ss:$16 sps:$4 sm:$0xff]  }
  0x6d   :  { %2246 = vmatprep.mubr.bf16.mxu1 %v5741_v21  ;;  %2399 = vmatprep.subr.bf16.mxu0 %v5271_v22  ;;  %v5299_v22 = vld [vmem:[#allocation5 + $0x420] ss:$16 sps:$4 sm:$0xff]  }
  0x6e   :  { %2592 = vmatprep.subr.bf16.mxu1 %v5274_v29  ;;  %v143_v29 = vld [vmem:[#allocation2 + $0x250] sm:$0xff] }
  0x6f   :  { %2400 = vmatpush1.bf16.msra.mxu0 %v5269_v27  ;;  %v5307_v27 = vld [vmem:[#allocation5 + $0x404] ss:$16 sps:$4 sm:$0xff]   ;;  %v5785_v43 = vpack.c.bf16 %v143_v29, %v135_v26  ;;  %v5326_v9 = vld [vmem:[#allocation5 + $0x7a0] ss:$16 sps:$4 sm:$0xff]   ;;  %v184_v26 = vld [vmem:[#allocation2 + $0x398] sm:$0xff] }
  0x70   :  { %2593 = vmatpush1.bf16.msra.mxu1 %v5272_v28  ;;  %2401 = vmatprep.subr.bf16.mxu0 %v5277_v34  ;;  %v5310_v28 = vld [vmem:[#allocation5 + $0x604] ss:$16 sps:$4 sm:$0xff]   ;;  %v5305_v34 = vld [vmem:[#allocation5 + $0x400] ss:$16 sps:$4 sm:$0xff]  }
  0x71   :  { %2594 = vmatprep.subr.bf16.mxu1 %v5280_v35  ;;  %v5308_v35 = vld [vmem:[#allocation5 + $0x600] ss:$16 sps:$4 sm:$0xff]  }
  0x72   :  { %2054 = vmatmul.mubr.bf16.gmra.mxu0 %v5747_v36  ;;  %v5332_v29 = vld [vmem:[#allocation5 + $0x780] ss:$16 sps:$4 sm:$0xff]  }
  0x73   :  { %2247 = vmatmul.mubr.bf16.gmra.mxu1 %v5749_v37  ;;  %2063 = vmatprep.mubr.bf16.mxu0 %v5751_v38 }
  0x74   :  { %2256 = vmatprep.mubr.bf16.mxu1 %v5753_v39  ;;  %2402 = vmatpush1.bf16.msra.mxu0 %v5275_v40  ;;  %v5313_v40 = vld [vmem:[#allocation5 + $0x5e4] ss:$16 sps:$4 sm:$0xff]  }
  0x75   :  { %2595 = vmatpush1.bf16.msra.mxu1 %v5278_v41  ;;  %2403 = vmatprep.subr.bf16.mxu0 %v5283_v45  ;;  %v5316_v41 = vld [vmem:[#allocation5 + $0x7e4] ss:$16 sps:$4 sm:$0xff]   ;;  %v5789_v45 = vpack.c.bf16 %v160_v33, %v152_v32 }
  0x76   :  { %2596 = vmatprep.subr.bf16.mxu1 %v5286_v46  ;;  %v5311_v46 = vld [vmem:[#allocation5 + $0x5e0] ss:$16 sps:$4 sm:$0xff]   ;;  %v5340_v33 = vld [vmem:[#allocation5 + $0x764] ss:$16 sps:$4 sm:$0xff]  }
  0x78   :  { %2404 = vmatpush1.bf16.msra.mxu0 %v5281_v52  ;;  %v5319_v52 = vld [vmem:[#allocation5 + $0x5c4] ss:$16 sps:$4 sm:$0xff]  }
  0x79   :  { %2597 = vmatpush1.bf16.msra.mxu1 %v5284_v55  ;;  %2405 = vmatprep.subr.bf16.mxu0 %v5289_v56  ;;  %v5322_v55 = vld [vmem:[#allocation5 + $0x7c4] ss:$16 sps:$4 sm:$0xff]   ;;  %v166_v56 = vld [vmem:[#allocation2 + $0x308] sm:$0xff] }
  0x7a   :  { %2598 = vmatprep.subr.bf16.mxu1 %v5292_v57  ;;  %2064 = vmatmul.mubr.bf16.gmra.mxu0 %v5759_v58  ;;  %v174_v57 = vld [vmem:[#allocation2 + $0x348] sm:$0xff] }
  0x7b   :  { %2257 = vmatmul.mubr.bf16.gmra.mxu1 %v5761_v59  ;;  %2073 = vmatprep.mubr.bf16.mxu0 %v5763_v60  ;;  %v5799_v6 = vpack.c.bf16 %v174_v57, %v166_v56  ;;  %v208_v56 = vld [vmem:[#allocation2 + $0x458] sm:$0xff]  ;;  %v5341_v57 = vld [vmem:[#allocation5 + $0x540] ss:$16 sps:$4 sm:$0xff]  }
  0x7c   :  { %2266 = vmatprep.mubr.bf16.mxu1 %v5765_v61  ;;  %2406 = vmatpush1.bf16.msra.mxu0 %v5287_v62  ;;  %v168_v62 = vld [vmem:[#allocation2 + $0x318] sm:$0xff] }
  0x7d   :  { %2599 = vmatpush1.bf16.msra.mxu1 %v5290_v63  ;;  %2407 = vmatprep.subr.bf16.mxu0 %v5295_v4  ;;  %v176_v63 = vld [vmem:[#allocation2 + $0x358] sm:$0xff]  ;;  %v5795_v4 = vpack.c.bf16 %v157_v49, %v149_v48  ;;  %v183_v48 = vld [vmem:[#allocation2 + $0x390] sm:$0xff] }
  0x7e   :  { %2600 = vmatprep.subr.bf16.mxu1 %v5298_v5  ;;  %v5797_v5 = vpack.c.bf16 %v159_v51, %v151_v50  ;;  %v5801_v7 = vpack.c.bf16 %v176_v63, %v168_v62  ;;  %v191_v49 = vld [vmem:[#allocation2 + $0x3d0] sm:$0xff]  ;;  %v198_v50 = vld [vmem:[#allocation2 + $0x408] sm:$0xff] }
  0x7f   :  { %v206_v51 = vld [vmem:[#allocation2 + $0x448] sm:$0xff]  ;;  %v5344_v62 = vld [vmem:[#allocation5 + $0x740] ss:$16 sps:$4 sm:$0xff]   ;;  %v5346_v63 = vld [vmem:[#allocation5 + $0x744] ss:$16 sps:$4 sm:$0xff]  }
  0x80   :  { %2408 = vmatpush1.bf16.msra.mxu0 %v5293_v10  ;;  %v165_v10 = vld [vmem:[#allocation2 + $0x300] sm:$0xff] }
  0x81   :  { %2601 = vmatpush1.bf16.msra.mxu1 %v5296_v11  ;;  %2409 = vmatprep.subr.bf16.mxu0 %v5301_v12  ;;  %v173_v11 = vld [vmem:[#allocation2 + $0x340] sm:$0xff]  ;;  %v167_v12 = vld [vmem:[#allocation2 + $0x310] sm:$0xff] }
  0x82   :  { %2602 = vmatprep.subr.bf16.mxu1 %v5304_v13  ;;  %2074 = vmatmul.mubr.bf16.gmra.mxu0 %v5771_v14  ;;  %v5331_v13 = vld [vmem:[#allocation5 + $0x584] ss:$16 sps:$4 sm:$0xff]   ;;  %v5807_v31 = vpack.c.bf16 %v173_v11, %v165_v10  ;;  %v5347_v10 = vld [vmem:[#allocation5 + $0x520] ss:$16 sps:$4 sm:$0xff]  }
  0x83   :  { %2267 = vmatmul.mubr.bf16.gmra.mxu1 %v5773_v15  ;;  %2083 = vmatprep.mubr.bf16.mxu0 %v5775_v18  ;;  %v5350_v11 = vld [vmem:[#allocation5 + $0x720] ss:$16 sps:$4 sm:$0xff]  }
  0x84   :  { %2276 = vmatprep.mubr.bf16.mxu1 %v5777_v19  ;;  %2410 = vmatpush1.bf16.msra.mxu0 %v5299_v22  ;;  %v5334_v22 = vld [vmem:[#allocation5 + $0x784] ss:$16 sps:$4 sm:$0xff]  }
  0x85   :  { %2603 = vmatpush1.bf16.msra.mxu1 %v5302_v23  ;;  %2411 = vmatprep.subr.bf16.mxu0 %v5307_v27  ;;  %v175_v23 = vld [vmem:[#allocation2 + $0x350] sm:$0xff]  ;;  %v192_v27 = vld [vmem:[#allocation2 + $0x3d8] sm:$0xff] }
  0x86   :  { %2604 = vmatprep.subr.bf16.mxu1 %v5310_v28  ;;  %v5329_v28 = vld [vmem:[#allocation5 + $0x580] ss:$16 sps:$4 sm:$0xff]   ;;  %v5809_v32 = vpack.c.bf16 %v175_v23, %v167_v12  ;;  %v5352_v12 = vld [vmem:[#allocation5 + $0x724] ss:$16 sps:$4 sm:$0xff]  }
  0x87   :  { %v207_v23 = vld [vmem:[#allocation2 + $0x450] sm:$0xff] }
  0x88   :  { %2412 = vmatpush1.bf16.msra.mxu0 %v5305_v34  ;;  %v5811_v34 = vpack.c.bf16 %v190_v25, %v182_v24  ;;  %v214_v24 = vld [vmem:[#allocation2 + $0x488] sm:$0xff] }
  0x89   :  { %2605 = vmatpush1.bf16.msra.mxu1 %v5308_v35  ;;  %2413 = vmatprep.subr.bf16.mxu0 %v5313_v40  ;;  %v5813_v35 = vpack.c.bf16 %v192_v27, %v184_v26  ;;  %v5335_v40 = vld [vmem:[#allocation5 + $0x560] ss:$16 sps:$4 sm:$0xff]   ;;  %v222_v25 = vld [vmem:[#allocation2 + $0x4c8] sm:$0xff]  ;;  %v216_v26 = vld [vmem:[#allocation2 + $0x498] sm:$0xff] }
  0x8a   :  { %2606 = vmatprep.subr.bf16.mxu1 %v5316_v41  ;;  %2084 = vmatmul.mubr.bf16.gmra.mxu0 %v5783_v42  ;;  %v5338_v41 = vld [vmem:[#allocation5 + $0x760] ss:$16 sps:$4 sm:$0xff]   ;;  %v224_v27 = vld [vmem:[#allocation2 + $0x4d8] sm:$0xff] }
  0x8b   :  { %2277 = vmatmul.mubr.bf16.gmra.mxu1 %v5785_v43  ;;  %2093 = vmatprep.mubr.bf16.mxu0 %v5787_v44 }
  0x8c   :  { %2286 = vmatprep.mubr.bf16.mxu1 %v5789_v45  ;;  %2414 = vmatpush2.bf16.msra.mxu0 %v5311_v46  ;;  %v181_v46 = vld [vmem:[#allocation2 + $0x380] sm:$0xff] }
  0x8d   :  { %2607 = vmatpush2.bf16.msra.mxu1 %v5314_v47  ;;  %2415 = vmatprep.subr.bf16.mxu0 %v5319_v52  ;;  %v189_v47 = vld [vmem:[#allocation2 + $0x3c0] sm:$0xff]  ;;  %v200_v52 = vld [vmem:[#allocation2 + $0x418] sm:$0xff] }
  0x8e   :  { %2608 = vmatprep.subr.bf16.mxu1 %v5322_v55  ;;  %v5343_v55 = vld [vmem:[#allocation5 + $0x544] ss:$16 sps:$4 sm:$0xff]  }
  0x90   :  { %2416 = vmatpush2.bf16.msra.mxu0 %v5317_v0  ;;  %v5819_v0 = vpack.c.bf16 %v189_v47, %v181_v46  ;;  %v5835_v46 = vpack.c.bf16 %v222_v25, %v214_v24  ;;  %v5837_v47 = vpack.c.bf16 %v224_v27, %v216_v26  ;;  %v246_v24 = vld [vmem:[#allocation2 + $0x588] sm:$0xff]  ;;  %v248_v26 = vld [vmem:[#allocation2 + $0x598] sm:$0xff] }
  0x91   :  { %2609 = vmatpush2.bf16.msra.mxu1 %v5320_v1  ;;  %2417 = vmatprep.subr.bf16.mxu0 %v5325_v2  ;;  %v5821_v1 = vpack.c.bf16 %v191_v49, %v183_v48  ;;  %v5823_v2 = vpack.c.bf16 %v206_v51, %v198_v50  ;;  %v213_v48 = vld [vmem:[#allocation2 + $0x480] sm:$0xff]  ;;  %v215_v50 = vld [vmem:[#allocation2 + $0x490] sm:$0xff]  ;;  %v254_v25 = vld [vmem:[#allocation2 + $0x5c8] sm:$0xff] }
  0x92   :  { %2610 = vmatprep.subr.bf16.mxu1 %v5328_v3  ;;  %2094 = vmatmul.mubr.bf16.gmra.mxu0 %v5795_v4  ;;  %v5825_v3 = vpack.c.bf16 %v208_v56, %v200_v52  ;;  %7241 = vst [vmem:[#allocation12_spill] sm:$0xff] %v5837_v47  ;;  %v221_v49 = vld [vmem:[#allocation2 + $0x4c0] sm:$0xff]  ;;  %v223_v51 = vld [vmem:[#allocation2 + $0x4d0] sm:$0xff]  ;;  %v230_v52 = vld [vmem:[#allocation2 + $0x508] sm:$0xff] }
  0x93   :  { %2287 = vmatmul.mubr.bf16.gmra.mxu1 %v5797_v5  ;;  %2103 = vmatprep.mubr.bf16.mxu0 %v5799_v6  ;;  %v238_v56 = vld [vmem:[#allocation2 + $0x548] sm:$0xff]  ;;  %v256_v27 = vld [vmem:[#allocation2 + $0x5d8] sm:$0xff] }
  0x94   :  { %2296 = vmatprep.mubr.bf16.mxu1 %v5801_v7  ;;  %2418 = vmatpush2.bf16.msra.mxu0 %v5323_v8  ;;  %v5349_v8 = vld [vmem:[#allocation5 + $0x524] ss:$16 sps:$4 sm:$0xff]  }
  0x95   :  { %2611 = vmatpush2.bf16.msra.mxu1 %v5326_v9  ;;  %2419 = vmatprep.subr.bf16.mxu0 %v5331_v13  ;;  %v197_v9 = vld [vmem:[#allocation2 + $0x400] sm:$0xff] }
  0x96   :  { %2612 = vmatprep.subr.bf16.mxu1 %v5334_v22  ;;  %v205_v13 = vld [vmem:[#allocation2 + $0x440] sm:$0xff]  ;;  %v199_v22 = vld [vmem:[#allocation2 + $0x410] sm:$0xff] }
  0x98   :  { %2420 = vmatpush2.bf16.msra.mxu0 %v5329_v28  ;;  %v5353_v28 = vld [vmem:[#allocation5 + $0x500] ss:$16 sps:$4 sm:$0xff]  }
  0x99   :  { %2613 = vmatpush2.bf16.msra.mxu1 %v5332_v29  ;;  %2421 = vmatprep.subr.bf16.mxu0 %v5337_v30  ;;  %v5355_v29 = vld [vmem:[#allocation5 + $0x504] ss:$16 sps:$4 sm:$0xff]   ;;  %v5831_v30 = vpack.c.bf16 %v205_v13, %v197_v9  ;;  %v5845_v9 = vpack.c.bf16 %v223_v51, %v215_v50 }
  0x9a   :  { %2614 = vmatprep.subr.bf16.mxu1 %v5340_v33  ;;  %2104 = vmatmul.mubr.bf16.gmra.mxu0 %v5807_v31  ;;  %v5833_v33 = vpack.c.bf16 %v207_v23, %v199_v22  ;;  %v237_v13 = vld [vmem:[#allocation2 + $0x540] sm:$0xff]  ;;  %v231_v22 = vld [vmem:[#allocation2 + $0x510] sm:$0xff] }
  0x9b   :  { %2297 = vmatmul.mubr.bf16.gmra.mxu1 %v5809_v32  ;;  %2113 = vmatprep.mubr.bf16.mxu0 %v5811_v34  ;;  %7243 = vst [vmem:[#allocation14_spill] sm:$0xff] %v5845_v9  ;;  %v239_v23 = vld [vmem:[#allocation2 + $0x550] sm:$0xff] }
  0x9c   :  { %2306 = vmatprep.mubr.bf16.mxu1 %v5813_v35  ;;  %2422 = vmatpush2.bf16.msra.mxu0 %v5335_v40  ;;  %v5356_v40 = vld [vmem:[#allocation5 + $0x700] ss:$16 sps:$4 sm:$0xff]  }
  0x9d   :  { %2615 = vmatpush2.bf16.msra.mxu1 %v5338_v41  ;;  %2423 = vmatprep.subr.bf16.mxu0 %v5343_v55  ;;  %v5358_v41 = vld [vmem:[#allocation5 + $0x704] ss:$16 sps:$4 sm:$0xff]   ;;  %v5361_v55 = vld [vmem:[#allocation5 + $0xec] ss:$16 sps:$4 sm:$0xff]  }
  0x9e   :  { %2616 = vmatprep.subr.bf16.mxu1 %v5346_v63  ;;  %v5364_v63 = vld [vmem:[#allocation5 + $0x2ec] ss:$16 sps:$4 sm:$0xff]   ;;  %v247_v50 = vld [vmem:[#allocation2 + $0x590] sm:$0xff] }
  0x9f   :  { %v255_v51 = vld [vmem:[#allocation2 + $0x5d0] sm:$0xff] }
  0xa0   :  { %2424 = vmatpush2.bf16.msra.mxu0 %v5341_v57  ;;  %v232_v57 = vld [vmem:[#allocation2 + $0x518] sm:$0xff] }
  0xa1   :  { %2617 = vmatpush2.bf16.msra.mxu1 %v5344_v62  ;;  %2425 = vmatprep.subr.bf16.mxu0 %v5349_v8  ;;  %v240_v62 = vld [vmem:[#allocation2 + $0x558] sm:$0xff]  ;;  %v5843_v8 = vpack.c.bf16 %v221_v49, %v213_v48  ;;  %v245_v48 = vld [vmem:[#allocation2 + $0x580] sm:$0xff] }
  0xa2   :  { %2114 = vmatmul.mubr.bf16.gmra.mxu0 %v5819_v0  ;;  %2618 = vmatprep.subr.bf16.mxu1 %v5352_v12  ;;  %v229_v12 = vld [vmem:[#allocation2 + $0x500] sm:$0xff] }
  0xa3   :  { %2307 = vmatmul.mubr.bf16.gmra.mxu1 %v5821_v1  ;;  %2123 = vmatprep.mubr.bf16.mxu0 %v5823_v2  ;;  %7242 = vst [vmem:[#allocation13_spill] sm:$0xff] %v5843_v8  ;;  %v253_v49 = vld [vmem:[#allocation2 + $0x5c0] sm:$0xff] }
  0xa4   :  { %2316 = vmatprep.mubr.bf16.mxu1 %v5825_v3  ;;  %2426 = vmatpush2.bf16.msra.mxu0 %v5347_v10  ;;  %v5847_v10 = vpack.c.bf16 %v238_v56, %v230_v52  ;;  %v262_v52 = vld [vmem:[#allocation2 + $0x608] sm:$0xff]  ;;  %v264_v56 = vld [vmem:[#allocation2 + $0x618] sm:$0xff] }
  0xa5   :  { %2619 = vmatpush2.bf16.msra.mxu1 %v5350_v11  ;;  %2427 = vmatprep.subr.bf16.mxu0 %v5355_v29  ;;  %v5849_v11 = vpack.c.bf16 %v240_v62, %v232_v57  ;;  %v5857_v29 = vpack.c.bf16 %v239_v23, %v231_v22  ;;  %v272_v57 = vld [vmem:[#allocation2 + $0x658] sm:$0xff]  ;;  %v5867_v62 = vpack.c.bf16 %v253_v49, %v245_v48  ;;  %v261_v22 = vld [vmem:[#allocation2 + $0x600] sm:$0xff] }
  0xa6   :  { %2620 = vmatprep.subr.bf16.mxu1 %v5358_v41  ;;  %7244 = vst [vmem:[#allocation15_spill] sm:$0xff] %v5847_v10  ;;  %v5861_v41 = vpack.c.bf16 %v256_v27, %v248_v26  ;;  %v269_v23 = vld [vmem:[#allocation2 + $0x640] sm:$0xff]  ;;  %v278_v26 = vld [vmem:[#allocation2 + $0x688] sm:$0xff]  ;;  %v280_v48 = vld [vmem:[#allocation2 + $0x698] sm:$0xff] }
  0xa7   :  { %7245 = vst [vmem:[#allocation16_spill] sm:$0xff] %v5849_v11  ;;  %7247 = vst [vmem:[#allocation18_spill] sm:$0xff] %v5857_v29  ;;  %v286_v27 = vld [vmem:[#allocation2 + $0x6c8] sm:$0xff]  ;;  %v288_v49 = vld [vmem:[#allocation2 + $0x6d8] sm:$0xff] }
  0xa8   :  { %2428 = vmatpush2.bf16.msra.mxu0 %v5353_v28  ;;  %v5855_v28 = vpack.c.bf16 %v237_v13, %v229_v12  ;;  %7249 = vst [vmem:[#allocation20_spill] sm:$0xff] %v5861_v41  ;;  %7250 = vst [vmem:[#allocation21_spill] sm:$0xff] %v5867_v62  ;;  %v5873_v13 = vpack.c.bf16 %v272_v57, %v264_v56  ;;  %v277_v56 = vld [vmem:[#allocation2 + $0x680] sm:$0xff] }
  0xa9   :  { %2621 = vmatpush2.bf16.msra.mxu1 %v5356_v40  ;;  %2783 = vmatprep.subr.bf16.mxu0 %v5361_v55  ;;  %v5859_v40 = vpack.c.bf16 %v254_v25, %v246_v24  ;;  %v270_v55 = vld [vmem:[#allocation2 + $0x648] sm:$0xff]  ;;  %v263_v24 = vld [vmem:[#allocation2 + $0x610] sm:$0xff]  ;;  %v285_v57 = vld [vmem:[#allocation2 + $0x6c0] sm:$0xff] }
  0xaa   :  { %2124 = vmatmul.mubr.bf16.gmra.mxu0 %v5831_v30  ;;  %2976 = vmatprep.subr.bf16.mxu1 %v5364_v63  ;;  %7246 = vst [vmem:[#allocation17_spill] sm:$0xff] %v5855_v28  ;;  %v5869_v63 = vpack.c.bf16 %v255_v51, %v247_v50  ;;  %v5871_v12 = vpack.c.bf16 %v270_v55, %v262_v52  ;;  %7253 = vst [vmem:[#allocation24_spill] sm:$0xff] %v5873_v13  ;;  %v271_v25 = vld [vmem:[#allocation2 + $0x650] sm:$0xff] }
  0xab   :  { %2317 = vmatmul.mubr.bf16.gmra.mxu1 %v5833_v33  ;;  %2133 = vmatprep.mubr.bf16.mxu0 %v5835_v46  ;;  %7248 = vst [vmem:[#allocation19_spill] sm:$0xff] %v5859_v40  ;;  %v5879_v50 = vpack.c.bf16 %v269_v23, %v261_v22  ;;  %v5881_v51 = vpack.c.bf16 %v271_v25, %v263_v24  ;;  %v294_v22 = vld [vmem:[#allocation2 + $0x708] sm:$0xff]  ;;  %v296_v24 = vld [vmem:[#allocation2 + $0x718] sm:$0xff] }
  0xac   :  { %2326 = vmatprep.mubr.bf16.mxu1 %v5837_v47  ;;  %7251 = vst [vmem:[#allocation22_spill] sm:$0xff] %v5869_v63  ;;  %7252 = vst [vmem:[#allocation23_spill] sm:$0xff] %v5871_v12  ;;  %v5883_v52 = vpack.c.bf16 %v286_v27, %v278_v26  ;;  %v5885_v55 = vpack.c.bf16 %v288_v49, %v280_v48  ;;  %v302_v23 = vld [vmem:[#allocation2 + $0x748] sm:$0xff]  ;;  %v304_v25 = vld [vmem:[#allocation2 + $0x758] sm:$0xff]  ;;  %v5891_v26 = vpack.c.bf16 %v285_v57, %v277_v56 }
  0xad   :  { %7254 = vst [vmem:[#allocation25_spill] sm:$0xff] %v5879_v50  ;;  %7255 = vst [vmem:[#allocation26_spill] sm:$0xff] %v5881_v51  ;;  %v5895_v48 = vpack.c.bf16 %v302_v23, %v294_v22  ;;  %v5897_v49 = vpack.c.bf16 %v304_v25, %v296_v24  ;;  %v310_v56 = vld [vmem:[#allocation2 + $0x788] sm:$0xff] }
  0xae   :  { %7256 = vst [vmem:[#allocation27_spill] sm:$0xff] %v5883_v52  ;;  %7257 = vst [vmem:[#allocation28_spill] sm:$0xff] %v5885_v55  ;;  %v318_v57 = vld [vmem:[#allocation2 + $0x7c8] sm:$0xff] }
  0xaf   :  { %7258 = vst [vmem:[#allocation29_spill] sm:$0xff] %v5891_v26  ;;  %7260 = vst [vmem:[#allocation31_spill] sm:$0xff] %v5895_v48  ;;  %v5907_v24 = vpack.c.bf16 %v318_v57, %v310_v56  ;;  %v5451_v47 = vld [vmem:[#allocation5 + $0x10c] ss:$16 sps:$4 sm:$0xff]  }
  0xb0   :  { %7261 = vst [vmem:[#allocation32_spill] sm:$0xff] %v5897_v49 }
  0xb1   :  { %7264 = vst [vmem:[#allocation35_spill] sm:$0xff] %v5907_v24 }
  0xb2   :  { %2134 = vmatmul.mubr.bf16.gmra.mxu0 %v5843_v8 }
  0xb3   :  { %2327 = vmatmul.mubr.bf16.gmra.mxu1 %v5845_v9  ;;  %2143 = vmatprep.mubr.bf16.mxu0 %v5847_v10  ;;  %v5382_v10 = vld [vmem:[#allocation5 + $0x28c] ss:$16 sps:$4 sm:$0xff]  }
  0xb4   :  { %2336 = vmatprep.mubr.bf16.mxu1 %v5849_v11  ;;  %v5379_v11 = vld [vmem:[#allocation5 + $0x8c] ss:$16 sps:$4 sm:$0xff]  }
  0xb5   :  { %v5427_v9 = vld [vmem:[#allocation5 + $0x18c] ss:$16 sps:$4 sm:$0xff]  }
  0xba   :  { %2144 = vmatmul.mubr.bf16.gmra.mxu0 %v5855_v28  ;;  %v5370_v28 = vld [vmem:[#allocation5 + $0x2cc] ss:$16 sps:$4 sm:$0xff]  }
  0xbb   :  { %2337 = vmatmul.mubr.bf16.gmra.mxu1 %v5857_v29  ;;  %2153 = vmatprep.mubr.bf16.mxu0 %v5859_v40  ;;  %v5367_v40 = vld [vmem:[#allocation5 + $0xcc] ss:$16 sps:$4 sm:$0xff]   ;;  %v5368_v29 = vld [vmem:[#allocation5 + $0x2c8] ss:$16 sps:$4 sm:$0xff]  }
  0xbc   :  { %2346 = vmatprep.mubr.bf16.mxu1 %v5861_v41  ;;  %v5365_v41 = vld [vmem:[#allocation5 + $0xc8] ss:$16 sps:$4 sm:$0xff]  }
  0xc2   :  { %2154 = vmatmul.mubr.bf16.gmra.mxu0 %v5867_v62  ;;  %v99_v62 = vld [vmem:[#allocation2 + $0xf0] sm:$0xff] }
  0xc3   :  { %2347 = vmatmul.mubr.bf16.gmra.mxu1 %v5869_v63  ;;  %2163 = vmatprep.mubr.bf16.mxu0 %v5871_v12  ;;  %v279_v12 = vld [vmem:[#allocation2 + $0x690] sm:$0xff] }
  0xc4   :  { %2356 = vmatprep.mubr.bf16.mxu1 %v5873_v13  ;;  %v287_v13 = vld [vmem:[#allocation2 + $0x6d0] sm:$0xff] }
  0xc5   :  { %v5893_v27 = vpack.c.bf16 %v287_v13, %v279_v12  ;;  %v312_v12 = vld [vmem:[#allocation2 + $0x798] sm:$0xff]  ;;  %v311_v63 = vld [vmem:[#allocation2 + $0x790] sm:$0xff] }
  0xc6   :  { %v320_v13 = vld [vmem:[#allocation2 + $0x7d8] sm:$0xff] }
  0xc7   :  { %7259 = vst [vmem:[#allocation30_spill] sm:$0xff] %v5893_v27  ;;  %v5909_v25 = vpack.c.bf16 %v320_v13, %v312_v12 }
  0xc9   :  { %7265 = vst [vmem:[#allocation36_spill] sm:$0xff] %v5909_v25 }
  0xca   :  { %2164 = vmatmul.mubr.bf16.gmra.mxu0 %v5879_v50  ;;  %v295_v50 = vld [vmem:[#allocation2 + $0x710] sm:$0xff] }
  0xcb   :  { %2357 = vmatmul.mubr.bf16.gmra.mxu1 %v5881_v51  ;;  %2173 = vmatprep.mubr.bf16.mxu0 %v5883_v52  ;;  %v293_v51 = vld [vmem:[#allocation2 + $0x700] sm:$0xff] }
  0xcc   :  { %2366 = vmatprep.mubr.bf16.mxu1 %v5885_v55  ;;  %v301_v52 = vld [vmem:[#allocation2 + $0x740] sm:$0xff]  ;;  %v303_v55 = vld [vmem:[#allocation2 + $0x750] sm:$0xff] }
  0xcd   :  { %v5903_v22 = vpack.c.bf16 %v301_v52, %v293_v51  ;;  %v5905_v23 = vpack.c.bf16 %v303_v55, %v295_v50  ;;  %v74_v51 = vld [vmem:[#allocation2 + $0x28] sm:$0xff]  ;;  %v76_v50 = vld [vmem:[#allocation2 + $0x38] sm:$0xff] }
  0xce   :  { %v82_v52 = vld [vmem:[#allocation2 + $0x68] sm:$0xff]  ;;  %v84_v55 = vld [vmem:[#allocation2 + $0x78] sm:$0xff] }
  0xcf   :  { %7262 = vst [vmem:[#allocation33_spill] sm:$0xff] %v5903_v22  ;;  %7263 = vst [vmem:[#allocation34_spill] sm:$0xff] %v5905_v23  ;;  %v5919_v12 = vpack.c.bf16 %v82_v52, %v74_v51  ;;  %v5921_v13 = vpack.c.bf16 %v84_v55, %v76_v50  ;;  %v5359_v50 = vld [vmem:[#allocation5 + $0xe8] ss:$16 sps:$4 sm:$0xff]  }
  0xd0   :  { %v5362_v55 = vld [vmem:[#allocation5 + $0x2e8] ss:$16 sps:$4 sm:$0xff]  }
  0xd1   :  { %7268 = vst [vmem:[#allocation39_spill] sm:$0xff] %v5919_v12  ;;  %7269 = vst [vmem:[#allocation40_spill] sm:$0xff] %v5921_v13 }
  0xd2   :  { %2174 = vmatmul.mubr.bf16.gmra.mxu0 %v5891_v26  ;;  %v317_v26 = vld [vmem:[#allocation2 + $0x7c0] sm:$0xff] }
  0xd3   :  { %2367 = vmatmul.mubr.bf16.gmra.mxu1 %v5893_v27  ;;  %2183 = vmatprep.mubr.bf16.mxu0 %v5895_v48  ;;  %v309_v27 = vld [vmem:[#allocation2 + $0x780] sm:$0xff] }
  0xd4   :  { %2376 = vmatprep.mubr.bf16.mxu1 %v5897_v49  ;;  %v319_v49 = vld [vmem:[#allocation2 + $0x7d0] sm:$0xff]  ;;  %v5915_v56 = vpack.c.bf16 %v317_v26, %v309_v27  ;;  %v90_v26 = vld [vmem:[#allocation2 + $0xa8] sm:$0xff]  ;;  %v97_v48 = vld [vmem:[#allocation2 + $0xe0] sm:$0xff] }
  0xd5   :  { %v5917_v57 = vpack.c.bf16 %v319_v49, %v311_v63  ;;  %v98_v27 = vld [vmem:[#allocation2 + $0xe8] sm:$0xff]  ;;  %v92_v63 = vld [vmem:[#allocation2 + $0xb8] sm:$0xff] }
  0xd6   :  { %7266 = vst [vmem:[#allocation37_spill] sm:$0xff] %v5915_v56  ;;  %v100_v49 = vld [vmem:[#allocation2 + $0xf8] sm:$0xff] }
  0xd7   :  { %7267 = vst [vmem:[#allocation38_spill] sm:$0xff] %v5917_v57 }
  0xda   :  { %2184 = vmatmul.mubr.bf16.gmra.mxu0 %v5903_v22  ;;  %v83_v22 = vld [vmem:[#allocation2 + $0x70] sm:$0xff] }
  0xdb   :  { %2377 = vmatmul.mubr.bf16.gmra.mxu1 %v5905_v23  ;;  %2193 = vmatprep.mubr.bf16.mxu0 %v5907_v24  ;;  %v73_v23 = vld [vmem:[#allocation2 + $0x20] sm:$0xff]  ;;  %v75_v24 = vld [vmem:[#allocation2 + $0x30] sm:$0xff] }
  0xdc   :  { %2386 = vmatprep.mubr.bf16.mxu1 %v5909_v25  ;;  %v81_v25 = vld [vmem:[#allocation2 + $0x60] sm:$0xff]  ;;  %v5929_v52 = vpack.c.bf16 %v83_v22, %v75_v24  ;;  %v106_v22 = vld [vmem:[#allocation2 + $0x128] sm:$0xff]  ;;  %v108_v24 = vld [vmem:[#allocation2 + $0x138] sm:$0xff] }
  0xdd   :  { %v5927_v51 = vpack.c.bf16 %v81_v25, %v73_v23  ;;  %v114_v23 = vld [vmem:[#allocation2 + $0x168] sm:$0xff]  ;;  %v116_v25 = vld [vmem:[#allocation2 + $0x178] sm:$0xff] }
  0xde   :  { %7271 = vst [vmem:[#allocation42_spill] sm:$0xff] %v5929_v52 }
  0xdf   :  { %7270 = vst [vmem:[#allocation41_spill] sm:$0xff] %v5927_v51 }
  0xe2   :  { %2194 = vmatmul.mubr.bf16.gmra.mxu0 %v5915_v56  ;;  %v5931_v56 = vpack.c.bf16 %v98_v27, %v90_v26  ;;  %v5373_v26 = vld [vmem:[#allocation5 + $0xac] ss:$16 sps:$4 sm:$0xff]  }
  0xe3   :  { %2387 = vmatmul.mubr.bf16.gmra.mxu1 %v5917_v57  ;;  %2429 = vmatprep.mubr.bf16.mxu0 %v5919_v12  ;;  %v5933_v57 = vpack.c.bf16 %v100_v49, %v92_v63  ;;  %v89_v12 = vld [vmem:[#allocation2 + $0xa0] sm:$0xff]  ;;  %v5376_v27 = vld [vmem:[#allocation5 + $0x2ac] ss:$16 sps:$4 sm:$0xff]  }
  0xe4   :  { %2622 = vmatprep.mubr.bf16.mxu1 %v5921_v13  ;;  %7272 = vst [vmem:[#allocation43_spill] sm:$0xff] %v5931_v56  ;;  %v91_v13 = vld [vmem:[#allocation2 + $0xb0] sm:$0xff]  ;;  %v5939_v63 = vpack.c.bf16 %v97_v48, %v89_v12  ;;  %v132_v48 = vld [vmem:[#allocation2 + $0x1f8] sm:$0xff] }
  0xe5   :  { %7273 = vst [vmem:[#allocation44_spill] sm:$0xff] %v5933_v57  ;;  %v5941_v49 = vpack.c.bf16 %v99_v62, %v91_v13  ;;  %v124_v62 = vld [vmem:[#allocation2 + $0x1b8] sm:$0xff] }
  0xe6   :  { %7274 = vst [vmem:[#allocation45_spill] sm:$0xff] %v5939_v63  ;;  %v5377_v12 = vld [vmem:[#allocation5 + $0x88] ss:$16 sps:$4 sm:$0xff]  }
  0xe7   :  { %7275 = vst [vmem:[#allocation46_spill] sm:$0xff] %v5941_v49  ;;  %v5380_v13 = vld [vmem:[#allocation5 + $0x288] ss:$16 sps:$4 sm:$0xff]  }
  0xea   :  { %2430 = vmatmul.mubr.bf16.vlgmr.msra.gmra.mxu0 %v5927_v51  ;;  %v113_v51 = vld [vmem:[#allocation2 + $0x160] sm:$0xff] }
  0xeb   :  { %2623 = vmatmul.mubr.bf16.vlgmr.msra.gmra.mxu1 %v5929_v52  ;;  %2784 = vmatpush1.bf16.msra.mxu0 %v5359_v50  ;;  %v5943_v52 = vpack.c.bf16 %v114_v23, %v106_v22  ;;  %v5945_v50 = vpack.c.bf16 %v116_v25, %v108_v24  ;;  %v5385_v22 = vld [vmem:[#allocation5 + $0x6c] ss:$16 sps:$4 sm:$0xff]  }
  0xec   :  { %2977 = vmatpush1.bf16.msra.mxu1 %v5362_v55  ;;  %2439 = vmatprep.mubr.bf16.mxu0 %v5931_v56  ;;  %v5371_v55 = vld [vmem:[#allocation5 + $0xa8] ss:$16 sps:$4 sm:$0xff]   ;;  %v5388_v23 = vld [vmem:[#allocation5 + $0x26c] ss:$16 sps:$4 sm:$0xff]  }
  0xed   :  { %2632 = vmatprep.mubr.bf16.mxu1 %v5933_v57  ;;  %2785 = vmatprep.subr.bf16.mxu0 %v5367_v40  ;;  %7276 = vst [vmem:[#allocation47_spill] sm:$0xff] %v5943_v52  ;;  %7277 = vst [vmem:[#allocation48_spill] sm:$0xff] %v5945_v50  ;;  %v5374_v56 = vld [vmem:[#allocation5 + $0x2a8] ss:$16 sps:$4 sm:$0xff]   ;;  %v105_v57 = vld [vmem:[#allocation2 + $0x120] sm:$0xff] }
  0xee   :  { %2978 = vmatprep.subr.bf16.mxu1 %v5370_v28  ;;  %v107_v28 = vld [vmem:[#allocation2 + $0x130] sm:$0xff]  ;;  %v5951_v24 = vpack.c.bf16 %v113_v51, %v105_v57  ;;  %v138_v57 = vld [vmem:[#allocation2 + $0x228] sm:$0xff] }
  0xef   :  { %2786 = vmatpush1.bf16.msra.mxu0 %v5365_v41  ;;  %v115_v40 = vld [vmem:[#allocation2 + $0x170] sm:$0xff]  ;;  %v122_v41 = vld [vmem:[#allocation2 + $0x1a8] sm:$0xff] }
  0xf0   :  { %2979 = vmatpush1.bf16.msra.mxu1 %v5368_v29  ;;  %2787 = vmatprep.subr.bf16.mxu0 %v5373_v26  ;;  %v130_v29 = vld [vmem:[#allocation2 + $0x1e8] sm:$0xff]  ;;  %7278 = vst [vmem:[#allocation49_spill] sm:$0xff] %v5951_v24  ;;  %v5953_v25 = vpack.c.bf16 %v115_v40, %v107_v28  ;;  %v140_v28 = vld [vmem:[#allocation2 + $0x238] sm:$0xff] }
  0xf1   :  { %2980 = vmatprep.subr.bf16.mxu1 %v5376_v27  ;;  %v5955_v26 = vpack.c.bf16 %v130_v29, %v122_v41  ;;  %v5957_v27 = vpack.c.bf16 %v132_v48, %v124_v62  ;;  %v146_v51 = vld [vmem:[#allocation2 + $0x268] sm:$0xff]  ;;  %v148_v40 = vld [vmem:[#allocation2 + $0x278] sm:$0xff] }
  0xf2   :  { %2440 = vmatmul.mubr.bf16.gmra.mxu0 %v5939_v63  ;;  %7279 = vst [vmem:[#allocation50_spill] sm:$0xff] %v5953_v25  ;;  %v131_v63 = vld [vmem:[#allocation2 + $0x1f0] sm:$0xff]  ;;  %v5389_v41 = vld [vmem:[#allocation5 + $0x48] ss:$16 sps:$4 sm:$0xff]   ;;  %v5397_v62 = vld [vmem:[#allocation5 + $0x2c] ss:$16 sps:$4 sm:$0xff]  }
  0xf3   :  { %2633 = vmatmul.mubr.bf16.gmra.mxu1 %v5941_v49  ;;  %2449 = vmatprep.mubr.bf16.mxu0 %v5943_v52  ;;  %7280 = vst [vmem:[#allocation51_spill] sm:$0xff] %v5955_v26  ;;  %7281 = vst [vmem:[#allocation52_spill] sm:$0xff] %v5957_v27  ;;  %v5386_v52 = vld [vmem:[#allocation5 + $0x268] ss:$16 sps:$4 sm:$0xff]   ;;  %v123_v49 = vld [vmem:[#allocation2 + $0x1b0] sm:$0xff] }
  0xf4   :  { %2642 = vmatprep.mubr.bf16.mxu1 %v5945_v50  ;;  %2788 = vmatpush1.bf16.msra.mxu0 %v5371_v55  ;;  %v5383_v50 = vld [vmem:[#allocation5 + $0x68] ss:$16 sps:$4 sm:$0xff]   ;;  %v121_v55 = vld [vmem:[#allocation2 + $0x1a0] sm:$0xff]  ;;  %v5400_v48 = vld [vmem:[#allocation5 + $0x22c] ss:$16 sps:$4 sm:$0xff]  }
  0xf5   :  { %2981 = vmatpush1.bf16.msra.mxu1 %v5374_v56  ;;  %2789 = vmatprep.subr.bf16.mxu0 %v5379_v11  ;;  %v129_v56 = vld [vmem:[#allocation2 + $0x1e0] sm:$0xff]  ;;  %v5394_v11 = vld [vmem:[#allocation5 + $0x24c] ss:$16 sps:$4 sm:$0xff]   ;;  %v5392_v29 = vld [vmem:[#allocation5 + $0x248] ss:$16 sps:$4 sm:$0xff]  }
  0xf6   :  { %2982 = vmatprep.subr.bf16.mxu1 %v5382_v10  ;;  %v5391_v10 = vld [vmem:[#allocation5 + $0x4c] ss:$16 sps:$4 sm:$0xff]  }
  0xf8   :  { %2790 = vmatpush1.bf16.msra.mxu0 %v5377_v12  ;;  %v5963_v12 = vpack.c.bf16 %v129_v56, %v121_v55  ;;  %v156_v55 = vld [vmem:[#allocation2 + $0x2b8] sm:$0xff] }
  0xf9   :  { %2983 = vmatpush1.bf16.msra.mxu1 %v5380_v13  ;;  %2791 = vmatprep.subr.bf16.mxu0 %v5385_v22  ;;  %v5965_v13 = vpack.c.bf16 %v131_v63, %v123_v49  ;;  %v5967_v22 = vpack.c.bf16 %v146_v51, %v138_v57  ;;  %v154_v63 = vld [vmem:[#allocation2 + $0x2a8] sm:$0xff]  ;;  %v164_v56 = vld [vmem:[#allocation2 + $0x2f8] sm:$0xff] }
  0xfa   :  { %2984 = vmatprep.subr.bf16.mxu1 %v5388_v23  ;;  %2450 = vmatmul.mubr.bf16.gmra.mxu0 %v5951_v24  ;;  %7282 = vst [vmem:[#allocation53_spill] sm:$0xff] %v5963_v12  ;;  %v5969_v23 = vpack.c.bf16 %v148_v40, %v140_v28  ;;  %v147_v24 = vld [vmem:[#allocation2 + $0x270] sm:$0xff]  ;;  %v162_v49 = vld [vmem:[#allocation2 + $0x2e8] sm:$0xff] }
  0xfb   :  { %2643 = vmatmul.mubr.bf16.gmra.mxu1 %v5953_v25  ;;  %2459 = vmatprep.mubr.bf16.mxu0 %v5955_v26  ;;  %7283 = vst [vmem:[#allocation54_spill] sm:$0xff] %v5965_v13  ;;  %7284 = vst [vmem:[#allocation55_spill] sm:$0xff] %v5967_v22  ;;  %v5398_v26 = vld [vmem:[#allocation5 + $0x228] ss:$16 sps:$4 sm:$0xff]   ;;  %v139_v25 = vld [vmem:[#allocation2 + $0x230] sm:$0xff] }
  0xfc   :  { %2652 = vmatprep.mubr.bf16.mxu1 %v5957_v27  ;;  %2792 = vmatpush1.bf16.msra.mxu0 %v5383_v50  ;;  %7285 = vst [vmem:[#allocation56_spill] sm:$0xff] %v5969_v23  ;;  %v5395_v27 = vld [vmem:[#allocation5 + $0x28] ss:$16 sps:$4 sm:$0xff]   ;;  %v137_v50 = vld [vmem:[#allocation2 + $0x220] sm:$0xff]  ;;  %v5409_v28 = vld [vmem:[#allocation5 + $0x1ec] ss:$16 sps:$4 sm:$0xff]  }
  0xfd   :  { %2985 = vmatpush1.bf16.msra.mxu1 %v5386_v52  ;;  %2793 = vmatprep.subr.bf16.mxu0 %v5391_v10  ;;  %v145_v52 = vld [vmem:[#allocation2 + $0x260] sm:$0xff]  ;;  %v5403_v10 = vld [vmem:[#allocation5 + $0xc] ss:$16 sps:$4 sm:$0xff]   ;;  %v5401_v57 = vld [vmem:[#allocation5 + $0x8] ss:$16 sps:$4 sm:$0xff]  }
  0xfe   :  { %2986 = vmatprep.subr.bf16.mxu1 %v5394_v11  ;;  %v5406_v11 = vld [vmem:[#allocation5 + $0x20c] ss:$16 sps:$4 sm:$0xff]   ;;  %v5404_v51 = vld [vmem:[#allocation5 + $0x208] ss:$16 sps:$4 sm:$0xff]  }
  0xff   :  { %v5412_v40 = vld [vmem:[#allocation5 + $0x3ec] ss:$16 sps:$4 sm:$0xff]  }
 0x100   :  { %2794 = vmatpush1.bf16.msra.mxu0 %v5389_v41  ;;  %v5975_v41 = vpack.c.bf16 %v145_v52, %v137_v50  ;;  %v172_v50 = vld [vmem:[#allocation2 + $0x338] sm:$0xff] }
 0x101   :  { %2987 = vmatpush1.bf16.msra.mxu1 %v5392_v29  ;;  %2795 = vmatprep.subr.bf16.mxu0 %v5397_v62  ;;  %v5977_v29 = vpack.c.bf16 %v147_v24, %v139_v25  ;;  %v5407_v62 = vld [vmem:[#allocation5 + $0x1e8] ss:$16 sps:$4 sm:$0xff]  }
 0x102   :  { %2988 = vmatprep.subr.bf16.mxu1 %v5400_v48  ;;  %2460 = vmatmul.mubr.bf16.gmra.mxu0 %v5963_v12  ;;  %7286 = vst [vmem:[#allocation57_spill] sm:$0xff] %v5975_v41  ;;  %v5410_v48 = vld [vmem:[#allocation5 + $0x3e8] ss:$16 sps:$4 sm:$0xff]   ;;  %v5418_v12 = vld [vmem:[#allocation5 + $0x3cc] ss:$16 sps:$4 sm:$0xff]  }
 0x103   :  { %2653 = vmatmul.mubr.bf16.gmra.mxu1 %v5965_v13  ;;  %2469 = vmatprep.mubr.bf16.mxu0 %v5967_v22  ;;  %7287 = vst [vmem:[#allocation58_spill] sm:$0xff] %v5977_v29  ;;  %v5979_v13 = vpack.c.bf16 %v162_v49, %v154_v63  ;;  %v5981_v22 = vpack.c.bf16 %v164_v56, %v156_v55  ;;  %v170_v24 = vld [vmem:[#allocation2 + $0x328] sm:$0xff]  ;;  %v180_v52 = vld [vmem:[#allocation2 + $0x378] sm:$0xff] }
 0x104   :  { %2662 = vmatprep.mubr.bf16.mxu1 %v5969_v23  ;;  %2796 = vmatpush1.bf16.msra.mxu0 %v5395_v27  ;;  %v5415_v23 = vld [vmem:[#allocation5 + $0x1cc] ss:$16 sps:$4 sm:$0xff]   ;;  %v161_v27 = vld [vmem:[#allocation2 + $0x2e0] sm:$0xff]  ;;  %v5413_v63 = vld [vmem:[#allocation5 + $0x1c8] ss:$16 sps:$4 sm:$0xff]  }
 0x105   :  { %2989 = vmatpush1.bf16.msra.mxu1 %v5398_v26  ;;  %2797 = vmatprep.subr.bf16.mxu0 %v5403_v10  ;;  %7288 = vst [vmem:[#allocation59_spill] sm:$0xff] %v5979_v13  ;;  %7289 = vst [vmem:[#allocation60_spill] sm:$0xff] %v5981_v22  ;;  %v153_v26 = vld [vmem:[#allocation2 + $0x2a0] sm:$0xff]  ;;  %v155_v10 = vld [vmem:[#allocation2 + $0x2b0] sm:$0xff] }
 0x106   :  { %2990 = vmatprep.subr.bf16.mxu1 %v5406_v11  ;;  %v163_v11 = vld [vmem:[#allocation2 + $0x2f0] sm:$0xff]  ;;  %v178_v25 = vld [vmem:[#allocation2 + $0x368] sm:$0xff] }
 0x107   :  { %v5416_v49 = vld [vmem:[#allocation5 + $0x3c8] ss:$16 sps:$4 sm:$0xff]   ;;  %v5421_v55 = vld [vmem:[#allocation5 + $0x1ac] ss:$16 sps:$4 sm:$0xff]  }
 0x108   :  { %2798 = vmatpush1.bf16.msra.mxu0 %v5401_v57  ;;  %v5424_v56 = vld [vmem:[#allocation5 + $0x3ac] ss:$16 sps:$4 sm:$0xff]   ;;  %v5987_v57 = vpack.c.bf16 %v161_v27, %v153_v26 }
 0x109   :  { %2991 = vmatpush1.bf16.msra.mxu1 %v5404_v51  ;;  %2799 = vmatprep.subr.bf16.mxu0 %v5409_v28  ;;  %v5989_v51 = vpack.c.bf16 %v163_v11, %v155_v10  ;;  %v5419_v28 = vld [vmem:[#allocation5 + $0x1a8] ss:$16 sps:$4 sm:$0xff]  }
 0x10a   :  { %2992 = vmatprep.subr.bf16.mxu1 %v5412_v40  ;;  %2470 = vmatmul.mubr.bf16.gmra.mxu0 %v5975_v41  ;;  %7290 = vst [vmem:[#allocation61_spill] sm:$0xff] %v5987_v57  ;;  %v5422_v40 = vld [vmem:[#allocation5 + $0x3a8] ss:$16 sps:$4 sm:$0xff]   ;;  %v5993_v41 = vpack.c.bf16 %v180_v52, %v172_v50  ;;  %v5433_v52 = vld [vmem:[#allocation5 + $0x16c] ss:$16 sps:$4 sm:$0xff]  }
 0x10b   :  { %2663 = vmatmul.mubr.bf16.gmra.mxu1 %v5977_v29  ;;  %2479 = vmatprep.mubr.bf16.mxu0 %v5979_v13  ;;  %7291 = vst [vmem:[#allocation62_spill] sm:$0xff] %v5989_v51  ;;  %v5991_v29 = vpack.c.bf16 %v178_v25, %v170_v24  ;;  %v5430_v13 = vld [vmem:[#allocation5 + $0x38c] ss:$16 sps:$4 sm:$0xff]   ;;  %v5425_v24 = vld [vmem:[#allocation5 + $0x188] ss:$16 sps:$4 sm:$0xff]  }
 0x10c   :  { %2672 = vmatprep.mubr.bf16.mxu1 %v5981_v22  ;;  %2800 = vmatpush2.bf16.msra.mxu0 %v5407_v62  ;;  %7293 = vst [vmem:[#allocation64_spill] sm:$0xff] %v5993_v41  ;;  %v169_v62 = vld [vmem:[#allocation2 + $0x320] sm:$0xff]  ;;  %v711_v22 = vlaneseq  ;;  %v186_v26 = vld [vmem:[#allocation2 + $0x3a8] sm:$0xff]  ;;  %v188_v10 = vld [vmem:[#allocation2 + $0x3b8] sm:$0xff] }
 0x10d   :  { %2993 = vmatpush2.bf16.msra.mxu1 %v5410_v48  ;;  %2801 = vmatprep.subr.bf16.mxu0 %v5415_v23  ;;  %7292 = vst [vmem:[#allocation63_spill] sm:$0xff] %v5991_v29  ;;  %v177_v48 = vld [vmem:[#allocation2 + $0x360] sm:$0xff]  ;;  %v171_v23 = vld [vmem:[#allocation2 + $0x330] sm:$0xff]  ;;  %v194_v27 = vld [vmem:[#allocation2 + $0x3e8] sm:$0xff] }
 0x10e   :  { %2994 = vmatprep.subr.bf16.mxu1 %v5418_v12  ;;  %v179_v12 = vld [vmem:[#allocation2 + $0x370] sm:$0xff]  ;;  %v196_v11 = vld [vmem:[#allocation2 + $0x3f8] sm:$0xff]  ;;  %v5999_v50 = vshrl.u32 %v711_v22, 7  ;;  %v185_v22 = vld [vmem:[#allocation2 + $0x3a0] sm:$0xff] }
 0x10f   :  { %v5428_v25 = vld [vmem:[#allocation5 + $0x388] ss:$16 sps:$4 sm:$0xff]   ;;  %v6007_v8 = vpack.c.bf16 %v196_v11, %v188_v10  ;;  %v5445_v11 = vld [vmem:[#allocation5 + $0x12c] ss:$16 sps:$4 sm:$0xff]  }
 0x110   :  { %2802 = vmatpush2.bf16.msra.mxu0 %v5413_v63  ;;  %7294 = vst [vmem:[#allocation65_spill] sm:$0xff] %v5999_v50  ;;  %v5436_v63 = vld [vmem:[#allocation5 + $0x36c] ss:$16 sps:$4 sm:$0xff]   ;;  %v5440_v10 = vld [vmem:[#allocation5 + $0x348] ss:$16 sps:$4 sm:$0xff]  }
 0x111   :  { %2995 = vmatpush2.bf16.msra.mxu1 %v5416_v49  ;;  %2803 = vmatprep.subr.bf16.mxu0 %v5421_v55  ;;  %v6001_v49 = vpack.c.bf16 %v177_v48, %v169_v62  ;;  %v6003_v55 = vpack.c.bf16 %v179_v12, %v171_v23  ;;  %7298 = vst [vmem:[#allocation69_spill] sm:$0xff] %v6007_v8  ;;  %v717_v62 = vsub.s32 1, %v5999_v50  ;;  %v202_v48 = vld [vmem:[#allocation2 + $0x428] sm:$0xff]  ;;  %v204_v12 = vld [vmem:[#allocation2 + $0x438] sm:$0xff] }
 0x112   :  { %2996 = vmatprep.subr.bf16.mxu1 %v5424_v56  ;;  %2480 = vmatmul.mubr.bf16.gmra.mxu0 %v5987_v57  ;;  %v5431_v56 = vld [vmem:[#allocation5 + $0x168] ss:$16 sps:$4 sm:$0xff]   ;;  %v6005_v57 = vpack.c.bf16 %v194_v27, %v186_v26 }
 0x113   :  { %2673 = vmatmul.mubr.bf16.gmra.mxu1 %v5989_v51  ;;  %2489 = vmatprep.mubr.bf16.mxu0 %v5991_v29  ;;  %7295 = vst [vmem:[#allocation66_spill] sm:$0xff] %v6001_v49  ;;  %7296 = vst [vmem:[#allocation67_spill] sm:$0xff] %v6003_v55  ;;  %v5434_v51 = vld [vmem:[#allocation5 + $0x368] ss:$16 sps:$4 sm:$0xff]   ;;  %v5439_v29 = vld [vmem:[#allocation5 + $0x14c] ss:$16 sps:$4 sm:$0xff]  }
 0x114   :  { %2682 = vmatprep.mubr.bf16.mxu1 %v5993_v41  ;;  %2804 = vmatpush2.bf16.msra.mxu0 %v5419_v28  ;;  %7297 = vst [vmem:[#allocation68_spill] sm:$0xff] %v6005_v57  ;;  %v5442_v41 = vld [vmem:[#allocation5 + $0x34c] ss:$16 sps:$4 sm:$0xff]   ;;  %v193_v28 = vld [vmem:[#allocation2 + $0x3e0] sm:$0xff]  ;;  %v5437_v27 = vld [vmem:[#allocation5 + $0x148] ss:$16 sps:$4 sm:$0xff]  }
 0x115   :  { %2997 = vmatpush2.bf16.msra.mxu1 %v5422_v40  ;;  %2805 = vmatprep.subr.bf16.mxu0 %v5427_v9  ;;  %v187_v9 = vld [vmem:[#allocation2 + $0x3b0] sm:$0xff]  ;;  %v713_v40 = vsub.s32 0, %v5999_v50  ;;  %v210_v23 = vld [vmem:[#allocation2 + $0x468] sm:$0xff]  ;;  %v212_v26 = vld [vmem:[#allocation2 + $0x478] sm:$0xff] }
 0x116   :  { %2998 = vmatprep.subr.bf16.mxu1 %v5430_v13  ;;  %v195_v13 = vld [vmem:[#allocation2 + $0x3f0] sm:$0xff]  ;;  %v5446_v50 = vld [vmem:[#allocation5 + $0x328] ss:$16 sps:$4 sm:$0xff]  }
 0x118   :  { %2806 = vmatpush2.bf16.msra.mxu0 %v5425_v24  ;;  %v5448_v24 = vld [vmem:[#allocation5 + $0x32c] ss:$16 sps:$4 sm:$0xff]  }
 0x119   :  { %2999 = vmatpush2.bf16.msra.mxu1 %v5428_v25  ;;  %2807 = vmatprep.subr.bf16.mxu0 %v5433_v52  ;;  %v6015_v25 = vpack.c.bf16 %v193_v28, %v185_v22  ;;  %v6017_v52 = vpack.c.bf16 %v195_v13, %v187_v9  ;;  %v709_v22 = vld [vmem:[%s7142_s2] sm:$0xf]  ;;  %v218_v28 = vld [vmem:[#allocation2 + $0x4a8] sm:$0xff]  ;;  %v220_v13 = vld [vmem:[#allocation2 + $0x4b8] sm:$0xff] }
 0x11a   :  { %3000 = vmatprep.subr.bf16.mxu1 %v5436_v63  ;;  %2490 = vmatmul.mubr.bf16.gmra.mxu0 %v6001_v49  ;;  %v5443_v63 = vld [vmem:[#allocation5 + $0x128] ss:$16 sps:$4 sm:$0xff]   ;;  %v6021_v49 = vpack.c.bf16 %v212_v26, %v204_v12  ;;  %v5457_v26 = vld [vmem:[#allocation5 + $0x4ec] ss:$16 sps:$4 sm:$0xff]  }
 0x11b   :  { %2683 = vmatmul.mubr.bf16.gmra.mxu1 %v6003_v55  ;;  %2499 = vmatprep.mubr.bf16.mxu0 %v6005_v57  ;;  %7299 = vst [vmem:[#allocation70_spill] sm:$0xff] %v6015_v25  ;;  %7300 = vst [vmem:[#allocation71_spill] sm:$0xff] %v6017_v52  ;;  %v6019_v55 = vpack.c.bf16 %v210_v23, %v202_v48  ;;  %v5454_v57 = vld [vmem:[#allocation5 + $0x30c] ss:$16 sps:$4 sm:$0xff]   ;;  %v5449_v23 = vld [vmem:[#allocation5 + $0x108] ss:$16 sps:$4 sm:$0xff]  }
 0x11c   :  { %2692 = vmatprep.mubr.bf16.mxu1 %v6007_v8  ;;  %2808 = vmatpush2.bf16.msra.mxu0 %v5431_v56  ;;  %7302 = vst [vmem:[#allocation73_spill] sm:$0xff] %v6021_v49  ;;  %v201_v56 = vld [vmem:[#allocation2 + $0x420] sm:$0xff]  ;;  %v226_v9 = vld [vmem:[#allocation2 + $0x4e8] sm:$0xff]  ;;  %v228_v48 = vld [vmem:[#allocation2 + $0x4f8] sm:$0xff] }
 0x11d   :  { %3001 = vmatpush2.bf16.msra.mxu1 %v5434_v51  ;;  %2809 = vmatprep.subr.bf16.mxu0 %v5439_v29  ;;  %7301 = vst [vmem:[#allocation72_spill] sm:$0xff] %v6019_v55  ;;  %v209_v51 = vld [vmem:[#allocation2 + $0x460] sm:$0xff]  ;;  %v203_v29 = vld [vmem:[#allocation2 + $0x430] sm:$0xff]  ;;  %v5452_v12 = vld [vmem:[#allocation5 + $0x308] ss:$16 sps:$4 sm:$0xff]  }
 0x11e   :  { %3002 = vmatprep.subr.bf16.mxu1 %v5442_v41  ;;  %v211_v41 = vld [vmem:[#allocation2 + $0x470] sm:$0xff]  ;;  %v241_v8 = vld [vmem:[#allocation2 + $0x560] sm:$0xff] }
 0x120   :  { %2810 = vmatpush2.bf16.msra.mxu0 %v5437_v27  ;;  %v5460_v27 = vld [vmem:[#allocation5 + $0x6ec] ss:$16 sps:$4 sm:$0xff]  }
 0x121   :  { %3003 = vmatpush2.bf16.msra.mxu1 %v5440_v10  ;;  %2811 = vmatprep.subr.bf16.mxu0 %v5445_v11  ;;  %v6030_v10 = vpack.c.bf16 %v209_v51, %v201_v56  ;;  %v6032_v11 = vpack.c.bf16 %v211_v41, %v203_v29  ;;  %v242_v29 = vld [vmem:[#allocation2 + $0x568] sm:$0xff]  ;;  %v236_v41 = vld [vmem:[#allocation2 + $0x538] sm:$0xff] }
 0x122   :  { %3004 = vmatprep.subr.bf16.mxu1 %v5448_v24  ;;  %2500 = vmatmul.mubr.bf16.gmra.mxu0 %v6015_v25  ;;  %v6034_v24 = vrot.slane %v709_v22, %v713_v40  ;;  %v6038_v25 = vpack.c.bf16 %v228_v48, %v220_v13  ;;  %v234_v40 = vld [vmem:[#allocation2 + $0x528] sm:$0xff] }
 0x123   :  { %2693 = vmatmul.mubr.bf16.gmra.mxu1 %v6017_v52  ;;  %2509 = vmatprep.mubr.bf16.mxu0 %v6019_v55  ;;  %7303 = vst [vmem:[#allocation74_spill] sm:$0xff] %v6030_v10  ;;  %7304 = vst [vmem:[#allocation75_spill] sm:$0xff] %v6032_v11  ;;  %v6036_v52 = vpack.c.bf16 %v226_v9, %v218_v28  ;;  %v6040_v55 = vrot.slane %v709_v22, %v717_v62  ;;  %v244_v28 = vld [vmem:[#allocation2 + $0x578] sm:$0xff] }
 0x124   :  { %2702 = vmatprep.mubr.bf16.mxu1 %v6021_v49  ;;  %2812 = vmatpush2.bf16.msra.mxu0 %v5443_v63  ;;  %7306 = vst [vmem:[#allocation77_spill] sm:$0xff] %v6038_v25  ;;  %v217_v63 = vld [vmem:[#allocation2 + $0x4a0] sm:$0xff] }
 0x125   :  { %3005 = vmatpush2.bf16.msra.mxu1 %v5446_v50  ;;  %2813 = vmatprep.subr.bf16.mxu0 %v5451_v47  ;;  %7305 = vst [vmem:[#allocation76_spill] sm:$0xff] %v6036_v52  ;;  %v225_v50 = vld [vmem:[#allocation2 + $0x4e0] sm:$0xff]  ;;  %v219_v47 = vld [vmem:[#allocation2 + $0x4b0] sm:$0xff] }
 0x126   :  { %3006 = vmatprep.subr.bf16.mxu1 %v5454_v57  ;;  %v227_v57 = vld [vmem:[#allocation2 + $0x4f0] sm:$0xff] }
 0x128   :  { %2814 = vmatpush2.bf16.msra.mxu0 %v5449_v23 }
 0x129   :  { %3007 = vmatpush2.bf16.msra.mxu1 %v5452_v12  ;;  %3169 = vmatprep.subr.bf16.mxu0 %v5457_v26  ;;  %v6050_v26 = vpack.c.bf16 %v225_v50, %v217_v63  ;;  %v235_v63 = vld [vmem:[#allocation2 + $0x530] sm:$0xff] }
 0x12a   :  { %3362 = vmatprep.subr.bf16.mxu1 %v5460_v27  ;;  %v2045_v56 = vpop.f32.mrf.mxu0  ;;  %2510 = vmatmul.mubr.bf16.gmra.mxu0 %v6030_v10  ;;  %v6052_v27 = vpack.c.bf16 %v227_v57, %v219_v47  ;;  %v6057_v10 = vpack.c.bf16 %v242_v29, %v234_v40  ;;  %v243_v29 = vld [vmem:[#allocation2 + $0x570] sm:$0xff] }
 0x12b   :  { %v2238_v51 = vpop.f32.mrf.mxu1  ;;  %2703 = vmatmul.mubr.bf16.gmra.mxu1 %v6032_v11  ;;  %v2046_v9 = vadd.f32 %v2045_v56, %v6034_v24  ;;  %2519 = vmatprep.mubr.bf16.mxu0 %v6036_v52  ;;  %7307 = vst [vmem:[#allocation78_spill] sm:$0xff] %v6050_v26  ;;  %v6059_v52 = vpack.c.bf16 %v244_v28, %v236_v41  ;;  %v250_v41 = vld [vmem:[#allocation2 + $0x5a8] sm:$0xff] }
 0x12c   :  { %2712 = vmatprep.mubr.bf16.mxu1 %v6038_v25  ;;  %v2047_v62 = vpop.f32.mrf.mxu0  ;;  %7308 = vst [vmem:[#allocation79_spill] sm:$0xff] %v6052_v27  ;;  %7310 = vst [vmem:[#allocation81_spill] sm:$0xff] %v6057_v10 }
 0x12d   :  { %v2240_v22 = vpop.f32.mrf.mxu1  ;;  %v6047_v13 = vadd.f32 %v2238_v51, %v2046_v9  ;;  %v2048_v48 = vadd.f32 %v2047_v62, %v6040_v55  ;;  %7311 = vst [vmem:[#allocation82_spill] sm:$0xff] %v6059_v52  ;;  %v233_v62 = vld [vmem:[#allocation2 + $0x520] sm:$0xff] }
 0x12e   :  { %v2049_v23 = vpop.f32.mrf.mxu0 }
 0x12f   :  { %v2242_v12 = vpop.f32.mrf.mxu1  ;;  %v6054_v11 = vadd.f32 %v2240_v22, %v2048_v48  ;;  %v2050_v56 = vadd.f32 %v2049_v23, %v6034_v24  ;;  %v258_v22 = vld [vmem:[#allocation2 + $0x5e8] sm:$0xff]  ;;  %v252_v48 = vld [vmem:[#allocation2 + $0x5b8] sm:$0xff] }
 0x130   :  { %v2051_v25 = vpop.f32.mrf.mxu0  ;;  %v260_v23 = vld [vmem:[#allocation2 + $0x5f8] sm:$0xff] }
 0x131   :  { %7309 = vst [vmem:[#allocation80_spill] sm:$0xff] %v6054_v11  ;;  %v2244_v49 = vpop.f32.mrf.mxu1  ;;  %v6061_v51 = vadd.f32 %v2242_v12, %v2050_v56  ;;  %v2052_v9 = vadd.f32 %v2051_v25, %v6040_v55 }
 0x132   :  { %v2055_v50 = vpop.f32.mrf.mxu0  ;;  %2520 = vmatmul.mubr.bf16.gmra.mxu0 %v6050_v26  ;;  %v6081_v26 = vpack.c.bf16 %v258_v22, %v250_v41  ;;  %v266_v41 = vld [vmem:[#allocation2 + $0x628] sm:$0xff] }
 0x133   :  { %7312 = vst [vmem:[#allocation83_spill] sm:$0xff] %v6061_v51  ;;  %v2248_v47 = vpop.f32.mrf.mxu1  ;;  %2713 = vmatmul.mubr.bf16.gmra.mxu1 %v6052_v27  ;;  %v6066_v57 = vadd.f32 %v2244_v49, %v2052_v9  ;;  %v2056_v40 = vadd.f32 %v2055_v50, %v6034_v24  ;;  %2529 = vmatprep.mubr.bf16.mxu0 %v6057_v10  ;;  %v274_v22 = vld [vmem:[#allocation2 + $0x668] sm:$0xff] }
 0x134   :  { %2722 = vmatprep.mubr.bf16.mxu1 %v6059_v52  ;;  %v2057_v25 = vpop.f32.mrf.mxu0  ;;  %v6074_v9 = vpack.c.bf16 %v241_v8, %v233_v62  ;;  %v6076_v50 = vpack.c.bf16 %v243_v29, %v235_v63  ;;  %7318 = vst [vmem:[#allocation89_spill] sm:$0xff] %v6081_v26  ;;  %v249_v8 = vld [vmem:[#allocation2 + $0x5a0] sm:$0xff]  ;;  %v259_v29 = vld [vmem:[#allocation2 + $0x5f0] sm:$0xff] }
 0x135   :  { %7313 = vst [vmem:[#allocation84_spill] sm:$0xff] %v6066_v57  ;;  %v2250_v28 = vpop.f32.mrf.mxu1  ;;  %v6071_v12 = vadd.f32 %v2248_v47, %v2056_v40  ;;  %v2058_v56 = vadd.f32 %v2057_v25, %v6040_v55  ;;  %v6083_v57 = vpack.c.bf16 %v260_v23, %v252_v48  ;;  %v257_v62 = vld [vmem:[#allocation2 + $0x5e0] sm:$0xff]  ;;  %v268_v48 = vld [vmem:[#allocation2 + $0x638] sm:$0xff] }
 0x136   :  { %v2059_v27 = vpop.f32.mrf.mxu0  ;;  %7315 = vst [vmem:[#allocation86_spill] sm:$0xff] %v6074_v9  ;;  %7316 = vst [vmem:[#allocation87_spill] sm:$0xff] %v6076_v50  ;;  %v276_v23 = vld [vmem:[#allocation2 + $0x678] sm:$0xff] }
 0x137   :  { %7314 = vst [vmem:[#allocation85_spill] sm:$0xff] %v6071_v12  ;;  %v2252_v49 = vpop.f32.mrf.mxu1  ;;  %v6078_v10 = vadd.f32 %v2250_v28, %v2058_v56  ;;  %v2060_v52 = vadd.f32 %v2059_v27, %v6034_v24  ;;  %7319 = vst [vmem:[#allocation90_spill] sm:$0xff] %v6083_v57 }
 0x138   :  { %v2061_v51 = vpop.f32.mrf.mxu0 }
 0x139   :  { %7317 = vst [vmem:[#allocation88_spill] sm:$0xff] %v6078_v10  ;;  %v2254_v11 = vpop.f32.mrf.mxu1  ;;  %v6085_v47 = vadd.f32 %v2252_v49, %v2060_v52  ;;  %v2062_v40 = vadd.f32 %v2061_v51, %v6040_v55  ;;  %v251_v52 = vld [vmem:[#allocation2 + $0x5b0] sm:$0xff] }
 0x13a   :  { %v2065_v25 = vpop.f32.mrf.mxu0  ;;  %2530 = vmatmul.mubr.bf16.gmra.mxu0 %v6074_v9  ;;  %v6105_v9 = vpack.c.bf16 %v274_v22, %v266_v41  ;;  %v275_v41 = vld [vmem:[#allocation2 + $0x670] sm:$0xff] }
 0x13b   :  { %7320 = vst [vmem:[#allocation91_spill] sm:$0xff] %v6085_v47  ;;  %v2258_v12 = vpop.f32.mrf.mxu1  ;;  %2723 = vmatmul.mubr.bf16.gmra.mxu1 %v6076_v50  ;;  %v6090_v63 = vadd.f32 %v2254_v11, %v2062_v40  ;;  %v2066_v27 = vadd.f32 %v2065_v25, %v6034_v24  ;;  %2539 = vmatprep.mubr.bf16.mxu0 %v6081_v26 }
 0x13c   :  { %2732 = vmatprep.mubr.bf16.mxu1 %v6083_v57  ;;  %v2067_v51 = vpop.f32.mrf.mxu0  ;;  %v6098_v50 = vpack.c.bf16 %v257_v62, %v249_v8  ;;  %v6100_v25 = vpack.c.bf16 %v259_v29, %v251_v52  ;;  %7326 = vst [vmem:[#allocation97_spill] sm:$0xff] %v6105_v9  ;;  %v265_v8 = vld [vmem:[#allocation2 + $0x620] sm:$0xff] }
 0x13d   :  { %7321 = vst [vmem:[#allocation92_spill] sm:$0xff] %v6090_v63  ;;  %v2260_v28 = vpop.f32.mrf.mxu1  ;;  %v6095_v56 = vadd.f32 %v2258_v12, %v2066_v27  ;;  %v2068_v49 = vadd.f32 %v2067_v51, %v6040_v55  ;;  %v6107_v63 = vpack.c.bf16 %v276_v23, %v268_v48  ;;  %v273_v62 = vld [vmem:[#allocation2 + $0x660] sm:$0xff]  ;;  %v290_v48 = vld [vmem:[#allocation2 + $0x6e8] sm:$0xff]  ;;  %v284_v23 = vld [vmem:[#allocation2 + $0x6b8] sm:$0xff] }
 0x13e   :  { %v2069_v11 = vpop.f32.mrf.mxu0  ;;  %7323 = vst [vmem:[#allocation94_spill] sm:$0xff] %v6098_v50  ;;  %7324 = vst [vmem:[#allocation95_spill] sm:$0xff] %v6100_v25 }
 0x13f   :  { %7322 = vst [vmem:[#allocation93_spill] sm:$0xff] %v6095_v56  ;;  %v2262_v40 = vpop.f32.mrf.mxu1  ;;  %v6102_v26 = vadd.f32 %v2260_v28, %v2068_v49  ;;  %v2070_v57 = vadd.f32 %v2069_v11, %v6034_v24  ;;  %7327 = vst [vmem:[#allocation98_spill] sm:$0xff] %v6107_v63  ;;  %v282_v28 = vld [vmem:[#allocation2 + $0x6a8] sm:$0xff]  ;;  %v292_v49 = vld [vmem:[#allocation2 + $0x6f8] sm:$0xff] }
 0x140   :  { %v2071_v47 = vpop.f32.mrf.mxu0 }
 0x141   :  { %7325 = vst [vmem:[#allocation96_spill] sm:$0xff] %v6102_v26  ;;  %v2264_v10 = vpop.f32.mrf.mxu1  ;;  %v6109_v12 = vadd.f32 %v2262_v40, %v2070_v57  ;;  %v2072_v27 = vadd.f32 %v2071_v47, %v6040_v55  ;;  %v267_v57 = vld [vmem:[#allocation2 + $0x630] sm:$0xff] }
 0x142   :  { %v2075_v51 = vpop.f32.mrf.mxu0  ;;  %2540 = vmatmul.mubr.bf16.gmra.mxu0 %v6098_v50  ;;  %v6129_v50 = vpack.c.bf16 %v290_v48, %v282_v28  ;;  %v291_v28 = vld [vmem:[#allocation2 + $0x6f0] sm:$0xff] }
 0x143   :  { %7328 = vst [vmem:[#allocation99_spill] sm:$0xff] %v6109_v12  ;;  %v2268_v56 = vpop.f32.mrf.mxu1  ;;  %2733 = vmatmul.mubr.bf16.gmra.mxu1 %v6100_v25  ;;  %v6114_v52 = vadd.f32 %v2264_v10, %v2072_v27  ;;  %v2076_v29 = vadd.f32 %v2075_v51, %v6034_v24  ;;  %2549 = vmatprep.mubr.bf16.mxu0 %v6105_v9 }
 0x144   :  { %2742 = vmatprep.mubr.bf16.mxu1 %v6107_v63  ;;  %v2077_v47 = vpop.f32.mrf.mxu0  ;;  %v6122_v25 = vpack.c.bf16 %v273_v62, %v265_v8  ;;  %v6124_v51 = vpack.c.bf16 %v275_v41, %v267_v57  ;;  %7334 = vst [vmem:[#allocation105_spill] sm:$0xff] %v6129_v50  ;;  %v281_v8 = vld [vmem:[#allocation2 + $0x6a0] sm:$0xff] }
 0x145   :  { %7329 = vst [vmem:[#allocation100_spill] sm:$0xff] %v6114_v52  ;;  %v2270_v22 = vpop.f32.mrf.mxu1  ;;  %v6119_v11 = vadd.f32 %v2268_v56, %v2076_v29  ;;  %v2078_v40 = vadd.f32 %v2077_v47, %v6040_v55  ;;  %v6131_v52 = vpack.c.bf16 %v292_v49, %v284_v23  ;;  %v289_v62 = vld [vmem:[#allocation2 + $0x6e0] sm:$0xff]  ;;  %v306_v23 = vld [vmem:[#allocation2 + $0x768] sm:$0xff]  ;;  %v300_v49 = vld [vmem:[#allocation2 + $0x738] sm:$0xff] }
 0x146   :  { %v2079_v10 = vpop.f32.mrf.mxu0  ;;  %7331 = vst [vmem:[#allocation102_spill] sm:$0xff] %v6122_v25  ;;  %7332 = vst [vmem:[#allocation103_spill] sm:$0xff] %v6124_v51 }
 0x147   :  { %7330 = vst [vmem:[#allocation101_spill] sm:$0xff] %v6119_v11  ;;  %v2272_v27 = vpop.f32.mrf.mxu1  ;;  %v6126_v9 = vadd.f32 %v2270_v22, %v2078_v40  ;;  %v2080_v63 = vadd.f32 %v2079_v10, %v6034_v24  ;;  %7335 = vst [vmem:[#allocation106_spill] sm:$0xff] %v6131_v52  ;;  %v298_v22 = vld [vmem:[#allocation2 + $0x728] sm:$0xff]  ;;  %v308_v40 = vld [vmem:[#allocation2 + $0x778] sm:$0xff] }
 0x148   :  { %v2081_v12 = vpop.f32.mrf.mxu0 }
 0x149   :  { %7333 = vst [vmem:[#allocation104_spill] sm:$0xff] %v6126_v9  ;;  %v2274_v26 = vpop.f32.mrf.mxu1  ;;  %v6133_v56 = vadd.f32 %v2272_v27, %v2080_v63  ;;  %v2082_v29 = vadd.f32 %v2081_v12, %v6040_v55  ;;  %v283_v63 = vld [vmem:[#allocation2 + $0x6b0] sm:$0xff] }
 0x14a   :  { %v2085_v47 = vpop.f32.mrf.mxu0  ;;  %2550 = vmatmul.mubr.bf16.gmra.mxu0 %v6122_v25  ;;  %v6153_v25 = vpack.c.bf16 %v306_v23, %v298_v22  ;;  %v307_v22 = vld [vmem:[#allocation2 + $0x770] sm:$0xff] }
 0x14b   :  { %7336 = vst [vmem:[#allocation107_spill] sm:$0xff] %v6133_v56  ;;  %v2278_v11 = vpop.f32.mrf.mxu1  ;;  %2743 = vmatmul.mubr.bf16.gmra.mxu1 %v6124_v51  ;;  %v6138_v57 = vadd.f32 %v2274_v26, %v2082_v29  ;;  %v2086_v41 = vadd.f32 %v2085_v47, %v6034_v24  ;;  %2559 = vmatprep.mubr.bf16.mxu0 %v6129_v50 }
 0x14c   :  { %2752 = vmatprep.mubr.bf16.mxu1 %v6131_v52  ;;  %v2087_v12 = vpop.f32.mrf.mxu0  ;;  %v6146_v51 = vpack.c.bf16 %v289_v62, %v281_v8  ;;  %v6148_v47 = vpack.c.bf16 %v291_v28, %v283_v63  ;;  %7342 = vst [vmem:[#allocation113_spill] sm:$0xff] %v6153_v25  ;;  %v297_v8 = vld [vmem:[#allocation2 + $0x720] sm:$0xff] }
 0x14d   :  { %7337 = vst [vmem:[#allocation108_spill] sm:$0xff] %v6138_v57  ;;  %v2280_v48 = vpop.f32.mrf.mxu1  ;;  %v6143_v10 = vadd.f32 %v2278_v11, %v2086_v41  ;;  %v2088_v27 = vadd.f32 %v2087_v12, %v6040_v55  ;;  %v6155_v57 = vpack.c.bf16 %v308_v40, %v300_v49  ;;  %v305_v62 = vld [vmem:[#allocation2 + $0x760] sm:$0xff]  ;;  %v322_v49 = vld [vmem:[#allocation2 + $0x7e8] sm:$0xff]  ;;  %v316_v40 = vld [vmem:[#allocation2 + $0x7b8] sm:$0xff] }
 0x14e   :  { %v2089_v26 = vpop.f32.mrf.mxu0  ;;  %7339 = vst [vmem:[#allocation110_spill] sm:$0xff] %v6146_v51  ;;  %7340 = vst [vmem:[#allocation111_spill] sm:$0xff] %v6148_v47 }
 0x14f   :  { %7338 = vst [vmem:[#allocation109_spill] sm:$0xff] %v6143_v10  ;;  %v2282_v29 = vpop.f32.mrf.mxu1  ;;  %v6150_v50 = vadd.f32 %v2280_v48, %v2088_v27  ;;  %v2090_v52 = vadd.f32 %v2089_v26, %v6034_v24  ;;  %7343 = vst [vmem:[#allocation114_spill] sm:$0xff] %v6155_v57  ;;  %v314_v48 = vld [vmem:[#allocation2 + $0x7a8] sm:$0xff]  ;;  %v324_v27 = vld [vmem:[#allocation2 + $0x7f8] sm:$0xff] }
 0x150   :  { %v2091_v56 = vpop.f32.mrf.mxu0 }
 0x151   :  { %7341 = vst [vmem:[#allocation112_spill] sm:$0xff] %v6150_v50  ;;  %v2284_v9 = vpop.f32.mrf.mxu1  ;;  %v6157_v11 = vadd.f32 %v2282_v29, %v2090_v52  ;;  %v2092_v41 = vadd.f32 %v2091_v56, %v6040_v55  ;;  %v299_v52 = vld [vmem:[#allocation2 + $0x730] sm:$0xff] }
 0x152   :  { %v2095_v12 = vpop.f32.mrf.mxu0  ;;  %2560 = vmatmul.mubr.bf16.gmra.mxu0 %v6146_v51  ;;  %v6177_v51 = vpack.c.bf16 %v322_v49, %v314_v48  ;;  %v323_v48 = vld [vmem:[#allocation2 + $0x7f0] sm:$0xff] }
 0x153   :  { %7344 = vst [vmem:[#allocation115_spill] sm:$0xff] %v6157_v11  ;;  %v2288_v10 = vpop.f32.mrf.mxu1  ;;  %2753 = vmatmul.mubr.bf16.gmra.mxu1 %v6148_v47  ;;  %v6162_v63 = vadd.f32 %v2284_v9, %v2092_v41  ;;  %v2096_v28 = vadd.f32 %v2095_v12, %v6034_v24  ;;  %2569 = vmatprep.mubr.bf16.mxu0 %v6153_v25 }
 0x154   :  { %2762 = vmatprep.mubr.bf16.mxu1 %v6155_v57  ;;  %v2097_v56 = vpop.f32.mrf.mxu0  ;;  %v6170_v47 = vpack.c.bf16 %v305_v62, %v297_v8  ;;  %v6172_v12 = vpack.c.bf16 %v307_v22, %v299_v52  ;;  %7349 = vst [vmem:[#allocation120_spill] sm:$0xff] %v6177_v51  ;;  %v313_v8 = vld [vmem:[#allocation2 + $0x7a0] sm:$0xff] }
 0x155   :  { %7345 = vst [vmem:[#allocation116_spill] sm:$0xff] %v6162_v63  ;;  %v2290_v23 = vpop.f32.mrf.mxu1  ;;  %v6167_v26 = vadd.f32 %v2288_v10, %v2096_v28  ;;  %v2098_v29 = vadd.f32 %v2097_v56, %v6040_v55  ;;  %v6179_v63 = vpack.c.bf16 %v324_v27, %v316_v40  ;;  %v321_v22 = vld [vmem:[#allocation2 + $0x7e0] sm:$0xff] }
 0x156   :  { %v2099_v9 = vpop.f32.mrf.mxu0  ;;  %7347 = vst [vmem:[#allocation118_spill] sm:$0xff] %v6170_v47  ;;  %7348 = vst [vmem:[#allocation119_spill] sm:$0xff] %v6172_v12 }
 0x157   :  { %7346 = vst [vmem:[#allocation117_spill] sm:$0xff] %v6167_v26  ;;  %v2292_v41 = vpop.f32.mrf.mxu1  ;;  %v6174_v25 = vadd.f32 %v2290_v23, %v2098_v29  ;;  %v2100_v57 = vadd.f32 %v2099_v9, %v6034_v24  ;;  %7350 = vst [vmem:[#allocation121_spill] sm:$0xff] %v6179_v63  ;;  %v6194_v9 = vpack.c.bf16 %v321_v22, %v313_v8 }
 0x158   :  { %v2101_v11 = vpop.f32.mrf.mxu0 }
 0x159   :  { %v2294_v50 = vpop.f32.mrf.mxu1  ;;  %v6181_v10 = vadd.f32 %v2292_v41, %v2100_v57  ;;  %v2102_v28 = vadd.f32 %v2101_v11, %v6040_v55  ;;  %v315_v57 = vld [vmem:[#allocation2 + $0x7b0] sm:$0xff]  ;;  %7351 = vst [vmem:[#allocation122_spill] sm:$0xff] %v6194_v9 }
 0x15a   :  { %v2105_v56 = vpop.f32.mrf.mxu0  ;;  %2570 = vmatmul.mubr.bf16.gmra.mxu0 %v6170_v47  ;;  %v5472_v47 = vld [vmem:[#allocation5 + $0x6ac] ss:$16 sps:$4 sm:$0xff]  }
 0x15b   :  { %v2298_v26 = vpop.f32.mrf.mxu1  ;;  %2763 = vmatmul.mubr.bf16.gmra.mxu1 %v6172_v12  ;;  %v6186_v62 = vadd.f32 %v2294_v50, %v2102_v28  ;;  %v2106_v52 = vadd.f32 %v2105_v56, %v6034_v24  ;;  %2579 = vmatprep.mubr.bf16.mxu0 %v6177_v51  ;;  %v6196_v50 = vpack.c.bf16 %v323_v48, %v315_v57 }
 0x15c   :  { %2772 = vmatprep.mubr.bf16.mxu1 %v6179_v63  ;;  %v2107_v23 = vpop.f32.mrf.mxu0 }
 0x15d   :  { %v2300_v11 = vpop.f32.mrf.mxu1  ;;  %v6191_v49 = vadd.f32 %v2298_v26, %v2106_v52  ;;  %v2108_v40 = vadd.f32 %v2107_v23, %v6040_v55  ;;  %7352 = vst [vmem:[#allocation123_spill] sm:$0xff] %v6196_v50 }
 0x15e   :  { %v2109_v27 = vpop.f32.mrf.mxu0 }
 0x15f   :  { %v2302_v29 = vpop.f32.mrf.mxu1  ;;  %v6198_v41 = vadd.f32 %v2300_v11, %v2108_v40  ;;  %v2110_v28 = vadd.f32 %v2109_v27, %v6034_v24 }
 0x160   :  { %v2111_v56 = vpop.f32.mrf.mxu0 }
 0x161   :  { %v2304_v63 = vpop.f32.mrf.mxu1  ;;  %v6201_v51 = vadd.f32 %v2302_v29, %v2110_v28  ;;  %v2112_v12 = vadd.f32 %v2111_v56, %v6040_v55 }
 0x162   :  { %v2115_v26 = vpop.f32.mrf.mxu0  ;;  %2580 = vmatmul.mubr.bf16.gmra.mxu0 %v6194_v9  ;;  %v5466_v9 = vld [vmem:[#allocation5 + $0x6cc] ss:$16 sps:$4 sm:$0xff]  }
 0x163   :  { %v2308_v52 = vpop.f32.mrf.mxu1  ;;  %2773 = vmatmul.mubr.bf16.gmra.mxu1 %v6196_v50  ;;  %v6206_v8 = vadd.f32 %v2304_v63, %v2112_v12  ;;  %v2116_v22 = vadd.f32 %v2115_v26, %v6034_v24  ;;  %2815 = vmatprep.mubr.bf16.mxu0 %v5729_v53  ;;  %v5455_v63 = vld [vmem:[#allocation5 + $0x4e8] ss:$16 sps:$4 sm:$0xff]  }
 0x164   :  { %3008 = vmatprep.mubr.bf16.mxu1 %v5731_v54  ;;  %v2117_v57 = vpop.f32.mrf.mxu0  ;;  %v5458_v12 = vld [vmem:[#allocation5 + $0x6e8] ss:$16 sps:$4 sm:$0xff]   ;;  %v5463_v54 = vld [vmem:[#allocation5 + $0x4cc] ss:$16 sps:$4 sm:$0xff]  }
 0x165   :  { %v2310_v48 = vpop.f32.mrf.mxu1  ;;  %v6211_v23 = vadd.f32 %v2308_v52, %v2116_v22  ;;  %v2118_v11 = vadd.f32 %v2117_v57, %v6040_v55 }
 0x166   :  { %v2119_v40 = vpop.f32.mrf.mxu0 }
 0x167   :  { %v2312_v27 = vpop.f32.mrf.mxu1  ;;  %v6214_v29 = vadd.f32 %v2310_v48, %v2118_v11  ;;  %v2120_v28 = vadd.f32 %v2119_v40, %v6034_v24  ;;  %v5461_v11 = vld [vmem:[#allocation5 + $0x4c8] ss:$16 sps:$4 sm:$0xff]  }
 0x168   :  { %v2121_v56 = vpop.f32.mrf.mxu0  ;;  %v5464_v40 = vld [vmem:[#allocation5 + $0x6c8] ss:$16 sps:$4 sm:$0xff]  }
 0x169   :  { %v2314_v26 = vpop.f32.mrf.mxu1  ;;  %v6217_v50 = vadd.f32 %v2312_v27, %v2120_v28  ;;  %v2122_v53 = vadd.f32 %v2121_v56, %v6040_v55  ;;  %v5469_v56 = vld [vmem:[#allocation5 + $0x4ac] ss:$16 sps:$4 sm:$0xff]  }
 0x16a   :  { %v2125_v52 = vpop.f32.mrf.mxu0  ;;  %2816 = vmatmul.mubr.bf16.vlgmr.msra.gmra.mxu0 %v5735_v16 }
 0x16b   :  { %7353 = vst [vmem:[#allocation124_spill] sm:$0xff] %v6217_v50  ;;  %v2318_v22 = vpop.f32.mrf.mxu1  ;;  %3009 = vmatmul.mubr.bf16.vlgmr.msra.gmra.mxu1 %v5737_v17  ;;  %v6222_v57 = vadd.f32 %v2314_v26, %v2122_v53  ;;  %v2126_v48 = vadd.f32 %v2125_v52, %v6034_v24  ;;  %3170 = vmatpush1.bf16.msra.mxu0 %v5455_v63  ;;  %v5467_v52 = vld [vmem:[#allocation5 + $0x4a8] ss:$16 sps:$4 sm:$0xff]  }
 0x16c   :  { %3363 = vmatpush1.bf16.msra.mxu1 %v5458_v12  ;;  %v2127_v27 = vpop.f32.mrf.mxu0  ;;  %2825 = vmatprep.mubr.bf16.mxu0 %v5739_v20 }
 0x16d   :  { %v2320_v28 = vpop.f32.mrf.mxu1  ;;  %3018 = vmatprep.mubr.bf16.mxu1 %v5741_v21  ;;  %v6227_v50 = vadd.f32 %v2318_v22, %v2126_v48  ;;  %v2128_v16 = vadd.f32 %v2127_v27, %v6040_v55  ;;  %3171 = vmatprep.subr.bf16.mxu0 %v5463_v54  ;;  %v5470_v21 = vld [vmem:[#allocation5 + $0x6a8] ss:$16 sps:$4 sm:$0xff]   ;;  %v5475_v54 = vld [vmem:[#allocation5 + $0x48c] ss:$16 sps:$4 sm:$0xff]  }
 0x16e   :  { %3364 = vmatprep.subr.bf16.mxu1 %v5466_v9  ;;  %v2129_v17 = vpop.f32.mrf.mxu0  ;;  %v5478_v9 = vld [vmem:[#allocation5 + $0x68c] ss:$16 sps:$4 sm:$0xff]  }
 0x16f   :  { %7354 = vst [vmem:[#allocation125_spill] sm:$0xff] %v6227_v50  ;;  %v2322_v26 = vpop.f32.mrf.mxu1  ;;  %v6230_v63 = vadd.f32 %v2320_v28, %v2128_v16  ;;  %v2130_v12 = vadd.f32 %v2129_v17, %v6034_v24  ;;  %3172 = vmatpush1.bf16.msra.mxu0 %v5461_v11  ;;  %v5476_v16 = vld [vmem:[#allocation5 + $0x688] ss:$16 sps:$4 sm:$0xff]  }
 0x170   :  { %3365 = vmatpush1.bf16.msra.mxu1 %v5464_v40  ;;  %v2131_v53 = vpop.f32.mrf.mxu0  ;;  %3173 = vmatprep.subr.bf16.mxu0 %v5469_v56  ;;  %v5473_v56 = vld [vmem:[#allocation5 + $0x488] ss:$16 sps:$4 sm:$0xff]  }
 0x171   :  { %v2324_v20 = vpop.f32.mrf.mxu1  ;;  %3366 = vmatprep.subr.bf16.mxu1 %v5472_v47  ;;  %v6233_v22 = vadd.f32 %v2322_v26, %v2130_v12  ;;  %v2132_v48 = vadd.f32 %v2131_v53, %v6040_v55  ;;  %v5484_v26 = vld [vmem:[#allocation5 + $0x66c] ss:$16 sps:$4 sm:$0xff]  }
 0x172   :  { %v2135_v27 = vpop.f32.mrf.mxu0  ;;  %2826 = vmatmul.mubr.bf16.gmra.mxu0 %v5747_v36 }
 0x173   :  { %v2328_v50 = vpop.f32.mrf.mxu1  ;;  %3019 = vmatmul.mubr.bf16.gmra.mxu1 %v5749_v37  ;;  %v6238_v11 = vadd.f32 %v2324_v20, %v2132_v48  ;;  %v2136_v40 = vadd.f32 %v2135_v27, %v6034_v24  ;;  %2835 = vmatprep.mubr.bf16.mxu0 %v5751_v38  ;;  %v5481_v37 = vld [vmem:[#allocation5 + $0x46c] ss:$16 sps:$4 sm:$0xff]  }
 0x174   :  { %3028 = vmatprep.mubr.bf16.mxu1 %v5753_v39  ;;  %v2137_v47 = vpop.f32.mrf.mxu0  ;;  %3174 = vmatpush1.bf16.msra.mxu0 %v5467_v52  ;;  %v5479_v52 = vld [vmem:[#allocation5 + $0x468] ss:$16 sps:$4 sm:$0xff]  }
 0x175   :  { %v2330_v28 = vpop.f32.mrf.mxu1  ;;  %3367 = vmatpush1.bf16.msra.mxu1 %v5470_v21  ;;  %v6243_v17 = vadd.f32 %v2328_v50, %v2136_v40  ;;  %v2138_v36 = vadd.f32 %v2137_v47, %v6040_v55  ;;  %3175 = vmatprep.subr.bf16.mxu0 %v5475_v54  ;;  %v5482_v21 = vld [vmem:[#allocation5 + $0x668] ss:$16 sps:$4 sm:$0xff]   ;;  %v5487_v54 = vld [vmem:[#allocation5 + $0x44c] ss:$16 sps:$4 sm:$0xff]  }
 0x176   :  { %3368 = vmatprep.subr.bf16.mxu1 %v5478_v9  ;;  %v2139_v12 = vpop.f32.mrf.mxu0  ;;  %v5490_v9 = vld [vmem:[#allocation5 + $0x64c] ss:$16 sps:$4 sm:$0xff]  }
 0x177   :  { %v2332_v53 = vpop.f32.mrf.mxu1  ;;  %v6246_v20 = vadd.f32 %v2330_v28, %v2138_v36  ;;  %v2140_v38 = vadd.f32 %v2139_v12, %v6034_v24 }
 0x178   :  { %v2141_v39 = vpop.f32.mrf.mxu0  ;;  %3176 = vmatpush1.bf16.msra.mxu0 %v5473_v56 }
 0x179   :  { %v2334_v48 = vpop.f32.mrf.mxu1  ;;  %3369 = vmatpush1.bf16.msra.mxu1 %v5476_v16  ;;  %v6249_v50 = vadd.f32 %v2332_v53, %v2140_v38  ;;  %v2142_v27 = vadd.f32 %v2141_v39, %v6040_v55  ;;  %3177 = vmatprep.subr.bf16.mxu0 %v5481_v37  ;;  %v5485_v37 = vld [vmem:[#allocation5 + $0x448] ss:$16 sps:$4 sm:$0xff]   ;;  %v5496_v53 = vld [vmem:[#allocation5 + $0x62c] ss:$16 sps:$4 sm:$0xff]  }
 0x17a   :  { %3370 = vmatprep.subr.bf16.mxu1 %v5484_v26  ;;  %v2145_v40 = vpop.f32.mrf.mxu0  ;;  %2836 = vmatmul.mubr.bf16.gmra.mxu0 %v5759_v58  ;;  %v5488_v26 = vld [vmem:[#allocation5 + $0x648] ss:$16 sps:$4 sm:$0xff]  }
 0x17b   :  { %v2338_v47 = vpop.f32.mrf.mxu1  ;;  %3029 = vmatmul.mubr.bf16.gmra.mxu1 %v5761_v59  ;;  %v6254_v28 = vadd.f32 %v2334_v48, %v2142_v27  ;;  %v2146_v56 = vadd.f32 %v2145_v40, %v6034_v24  ;;  %2845 = vmatprep.mubr.bf16.mxu0 %v5763_v60  ;;  %v5493_v59 = vld [vmem:[#allocation5 + $0x42c] ss:$16 sps:$4 sm:$0xff]  }
 0x17c   :  { %3038 = vmatprep.mubr.bf16.mxu1 %v5765_v61  ;;  %v2147_v16 = vpop.f32.mrf.mxu0  ;;  %3178 = vmatpush1.bf16.msra.mxu0 %v5479_v52  ;;  %v5491_v52 = vld [vmem:[#allocation5 + $0x428] ss:$16 sps:$4 sm:$0xff]  }
 0x17d   :  { %v2340_v36 = vpop.f32.mrf.mxu1  ;;  %3371 = vmatpush1.bf16.msra.mxu1 %v5482_v21  ;;  %v6259_v12 = vadd.f32 %v2338_v47, %v2146_v56  ;;  %v2148_v58 = vadd.f32 %v2147_v16, %v6040_v55  ;;  %3179 = vmatprep.subr.bf16.mxu0 %v5487_v54  ;;  %v5494_v21 = vld [vmem:[#allocation5 + $0x628] ss:$16 sps:$4 sm:$0xff]   ;;  %v5499_v54 = vld [vmem:[#allocation5 + $0x40c] ss:$16 sps:$4 sm:$0xff]  }
 0x17e   :  { %3372 = vmatprep.subr.bf16.mxu1 %v5490_v9  ;;  %v2149_v38 = vpop.f32.mrf.mxu0  ;;  %v5502_v9 = vld [vmem:[#allocation5 + $0x60c] ss:$16 sps:$4 sm:$0xff]  }
 0x17f   :  { %v2342_v39 = vpop.f32.mrf.mxu1  ;;  %v6262_v48 = vadd.f32 %v2340_v36, %v2148_v58  ;;  %v2150_v60 = vadd.f32 %v2149_v38, %v6034_v24 }
 0x180   :  { %v2151_v61 = vpop.f32.mrf.mxu0  ;;  %3180 = vmatpush1.bf16.msra.mxu0 %v5485_v37 }
 0x181   :  { %v2344_v27 = vpop.f32.mrf.mxu1  ;;  %3373 = vmatpush1.bf16.msra.mxu1 %v5488_v26  ;;  %v6265_v40 = vadd.f32 %v2342_v39, %v2150_v60  ;;  %v2152_v47 = vadd.f32 %v2151_v61, %v6040_v55  ;;  %3181 = vmatprep.subr.bf16.mxu0 %v5493_v59  ;;  %v5497_v59 = vld [vmem:[#allocation5 + $0x408] ss:$16 sps:$4 sm:$0xff]   ;;  %v5508_v39 = vld [vmem:[#allocation5 + $0x7ec] ss:$16 sps:$4 sm:$0xff]  }
 0x182   :  { %3374 = vmatprep.subr.bf16.mxu1 %v5496_v53  ;;  %v2155_v56 = vpop.f32.mrf.mxu0  ;;  %2846 = vmatmul.mubr.bf16.gmra.mxu0 %v5771_v14  ;;  %v5500_v53 = vld [vmem:[#allocation5 + $0x608] ss:$16 sps:$4 sm:$0xff]  }
 0x183   :  { %v2348_v16 = vpop.f32.mrf.mxu1  ;;  %3039 = vmatmul.mubr.bf16.gmra.mxu1 %v5773_v15  ;;  %v6270_v36 = vadd.f32 %v2344_v27, %v2152_v47  ;;  %v2156_v37 = vadd.f32 %v2155_v56, %v6034_v24  ;;  %2855 = vmatprep.mubr.bf16.mxu0 %v5775_v18  ;;  %v5505_v15 = vld [vmem:[#allocation5 + $0x5ec] ss:$16 sps:$4 sm:$0xff]  }
 0x184   :  { %3048 = vmatprep.mubr.bf16.mxu1 %v5777_v19  ;;  %v2157_v26 = vpop.f32.mrf.mxu0  ;;  %3182 = vmatpush1.bf16.msra.mxu0 %v5491_v52  ;;  %v5503_v52 = vld [vmem:[#allocation5 + $0x5e8] ss:$16 sps:$4 sm:$0xff]  }
 0x185   :  { %v2350_v58 = vpop.f32.mrf.mxu1  ;;  %3375 = vmatpush1.bf16.msra.mxu1 %v5494_v21  ;;  %v6275_v38 = vadd.f32 %v2348_v16, %v2156_v37  ;;  %v2158_v14 = vadd.f32 %v2157_v26, %v6040_v55  ;;  %3183 = vmatprep.subr.bf16.mxu0 %v5499_v54  ;;  %v5506_v21 = vld [vmem:[#allocation5 + $0x7e8] ss:$16 sps:$4 sm:$0xff]   ;;  %v5511_v54 = vld [vmem:[#allocation5 + $0x5cc] ss:$16 sps:$4 sm:$0xff]  }
 0x186   :  { %3376 = vmatprep.subr.bf16.mxu1 %v5502_v9  ;;  %v2159_v60 = vpop.f32.mrf.mxu0  ;;  %v5514_v9 = vld [vmem:[#allocation5 + $0x7cc] ss:$16 sps:$4 sm:$0xff]  }
 0x187   :  { %v2352_v61 = vpop.f32.mrf.mxu1  ;;  %v6278_v27 = vadd.f32 %v2350_v58, %v2158_v14  ;;  %v2160_v18 = vadd.f32 %v2159_v60, %v6034_v24 }
 0x188   :  { %v2161_v19 = vpop.f32.mrf.mxu0  ;;  %3184 = vmatpush1.bf16.msra.mxu0 %v5497_v59 }
 0x189   :  { %v2354_v47 = vpop.f32.mrf.mxu1  ;;  %3377 = vmatpush1.bf16.msra.mxu1 %v5500_v53  ;;  %v6281_v56 = vadd.f32 %v2352_v61, %v2160_v18  ;;  %v2162_v16 = vadd.f32 %v2161_v19, %v6040_v55  ;;  %3185 = vmatprep.subr.bf16.mxu0 %v5505_v15  ;;  %v5509_v15 = vld [vmem:[#allocation5 + $0x5c8] ss:$16 sps:$4 sm:$0xff]   ;;  %v5520_v61 = vld [vmem:[#allocation5 + $0x7ac] ss:$16 sps:$4 sm:$0xff]  }
 0x18a   :  { %3378 = vmatprep.subr.bf16.mxu1 %v5508_v39  ;;  %v2165_v37 = vpop.f32.mrf.mxu0  ;;  %2856 = vmatmul.mubr.bf16.gmra.mxu0 %v5783_v42  ;;  %v5512_v39 = vld [vmem:[#allocation5 + $0x7c8] ss:$16 sps:$4 sm:$0xff]  }
 0x18b   :  { %v2358_v26 = vpop.f32.mrf.mxu1  ;;  %3049 = vmatmul.mubr.bf16.gmra.mxu1 %v5785_v43  ;;  %v6286_v58 = vadd.f32 %v2354_v47, %v2162_v16  ;;  %v2166_v59 = vadd.f32 %v2165_v37, %v6034_v24  ;;  %2865 = vmatprep.mubr.bf16.mxu0 %v5787_v44  ;;  %v5517_v43 = vld [vmem:[#allocation5 + $0x5ac] ss:$16 sps:$4 sm:$0xff]  }
 0x18c   :  { %3058 = vmatprep.mubr.bf16.mxu1 %v5789_v45  ;;  %v2167_v53 = vpop.f32.mrf.mxu0  ;;  %3186 = vmatpush2.bf16.msra.mxu0 %v5503_v52  ;;  %v5515_v52 = vld [vmem:[#allocation5 + $0x5a8] ss:$16 sps:$4 sm:$0xff]  }
 0x18d   :  { %v2360_v14 = vpop.f32.mrf.mxu1  ;;  %3379 = vmatpush2.bf16.msra.mxu1 %v5506_v21  ;;  %v6291_v60 = vadd.f32 %v2358_v26, %v2166_v59  ;;  %v2168_v42 = vadd.f32 %v2167_v53, %v6040_v55  ;;  %3187 = vmatprep.subr.bf16.mxu0 %v5511_v54  ;;  %v5518_v21 = vld [vmem:[#allocation5 + $0x7a8] ss:$16 sps:$4 sm:$0xff]   ;;  %v5523_v54 = vld [vmem:[#allocation5 + $0x58c] ss:$16 sps:$4 sm:$0xff]  }
 0x18e   :  { %3380 = vmatprep.subr.bf16.mxu1 %v5514_v9  ;;  %v2169_v18 = vpop.f32.mrf.mxu0  ;;  %v5526_v9 = vld [vmem:[#allocation5 + $0x78c] ss:$16 sps:$4 sm:$0xff]  }
 0x18f   :  { %v2362_v19 = vpop.f32.mrf.mxu1  ;;  %v6294_v47 = vadd.f32 %v2360_v14, %v2168_v42  ;;  %v2170_v44 = vadd.f32 %v2169_v18, %v6034_v24 }
 0x190   :  { %v2171_v45 = vpop.f32.mrf.mxu0  ;;  %3188 = vmatpush2.bf16.msra.mxu0 %v5509_v15 }
 0x191   :  { %v2364_v16 = vpop.f32.mrf.mxu1  ;;  %3381 = vmatpush2.bf16.msra.mxu1 %v5512_v39  ;;  %v6297_v37 = vadd.f32 %v2362_v19, %v2170_v44  ;;  %v2172_v26 = vadd.f32 %v2171_v45, %v6040_v55  ;;  %3189 = vmatprep.subr.bf16.mxu0 %v5517_v43  ;;  %v5521_v43 = vld [vmem:[#allocation5 + $0x588] ss:$16 sps:$4 sm:$0xff]   ;;  %v5532_v19 = vld [vmem:[#allocation5 + $0x76c] ss:$16 sps:$4 sm:$0xff]  }
 0x192   :  { %3382 = vmatprep.subr.bf16.mxu1 %v5520_v61  ;;  %v2175_v59 = vpop.f32.mrf.mxu0  ;;  %2866 = vmatmul.mubr.bf16.gmra.mxu0 %v5795_v4  ;;  %v5524_v61 = vld [vmem:[#allocation5 + $0x788] ss:$16 sps:$4 sm:$0xff]  }
 0x193   :  { %v2368_v53 = vpop.f32.mrf.mxu1  ;;  %3059 = vmatmul.mubr.bf16.gmra.mxu1 %v5797_v5  ;;  %v6302_v14 = vadd.f32 %v2364_v16, %v2172_v26  ;;  %v2176_v15 = vadd.f32 %v2175_v59, %v6034_v24  ;;  %2875 = vmatprep.mubr.bf16.mxu0 %v5799_v6  ;;  %v5529_v5 = vld [vmem:[#allocation5 + $0x56c] ss:$16 sps:$4 sm:$0xff]  }
 0x194   :  { %3068 = vmatprep.mubr.bf16.mxu1 %v5801_v7  ;;  %v2177_v39 = vpop.f32.mrf.mxu0  ;;  %3190 = vmatpush2.bf16.msra.mxu0 %v5515_v52  ;;  %v5527_v52 = vld [vmem:[#allocation5 + $0x568] ss:$16 sps:$4 sm:$0xff]  }
 0x195   :  { %v2370_v42 = vpop.f32.mrf.mxu1  ;;  %3383 = vmatpush2.bf16.msra.mxu1 %v5518_v21  ;;  %v6307_v18 = vadd.f32 %v2368_v53, %v2176_v15  ;;  %v2178_v4 = vadd.f32 %v2177_v39, %v6040_v55  ;;  %3191 = vmatprep.subr.bf16.mxu0 %v5523_v54  ;;  %v5530_v21 = vld [vmem:[#allocation5 + $0x768] ss:$16 sps:$4 sm:$0xff]   ;;  %v5535_v54 = vld [vmem:[#allocation5 + $0x54c] ss:$16 sps:$4 sm:$0xff]  }
 0x196   :  { %3384 = vmatprep.subr.bf16.mxu1 %v5526_v9  ;;  %v2179_v44 = vpop.f32.mrf.mxu0  ;;  %v5538_v9 = vld [vmem:[#allocation5 + $0x74c] ss:$16 sps:$4 sm:$0xff]  }
 0x197   :  { %v2372_v45 = vpop.f32.mrf.mxu1  ;;  %v6310_v16 = vadd.f32 %v2370_v42, %v2178_v4  ;;  %v2180_v6 = vadd.f32 %v2179_v44, %v6034_v24 }
 0x198   :  { %v2181_v7 = vpop.f32.mrf.mxu0  ;;  %3192 = vmatpush2.bf16.msra.mxu0 %v5521_v43 }
 0x199   :  { %v2374_v26 = vpop.f32.mrf.mxu1  ;;  %3385 = vmatpush2.bf16.msra.mxu1 %v5524_v61  ;;  %v6313_v59 = vadd.f32 %v2372_v45, %v2180_v6  ;;  %v2182_v53 = vadd.f32 %v2181_v7, %v6040_v55  ;;  %3193 = vmatprep.subr.bf16.mxu0 %v5529_v5  ;;  %v5533_v5 = vld [vmem:[#allocation5 + $0x548] ss:$16 sps:$4 sm:$0xff]   ;;  %v5544_v45 = vld [vmem:[#allocation5 + $0x72c] ss:$16 sps:$4 sm:$0xff]  }
 0x19a   :  { %3386 = vmatprep.subr.bf16.mxu1 %v5532_v19  ;;  %v2185_v15 = vpop.f32.mrf.mxu0  ;;  %2876 = vmatmul.mubr.bf16.gmra.mxu0 %v5807_v31  ;;  %v5536_v19 = vld [vmem:[#allocation5 + $0x748] ss:$16 sps:$4 sm:$0xff]  }
 0x19b   :  { %v2378_v39 = vpop.f32.mrf.mxu1  ;;  %3069 = vmatmul.mubr.bf16.gmra.mxu1 %v5809_v32  ;;  %v6318_v42 = vadd.f32 %v2374_v26, %v2182_v53  ;;  %v2186_v43 = vadd.f32 %v2185_v15, %v6034_v24  ;;  %2885 = vmatprep.mubr.bf16.mxu0 %v5811_v34  ;;  %v5541_v32 = vld [vmem:[#allocation5 + $0x52c] ss:$16 sps:$4 sm:$0xff]  }
 0x19c   :  { %3078 = vmatprep.mubr.bf16.mxu1 %v5813_v35  ;;  %v2187_v61 = vpop.f32.mrf.mxu0  ;;  %3194 = vmatpush2.bf16.msra.mxu0 %v5527_v52  ;;  %v5539_v52 = vld [vmem:[#allocation5 + $0x528] ss:$16 sps:$4 sm:$0xff]  }
 0x19d   :  { %v2380_v4 = vpop.f32.mrf.mxu1  ;;  %3387 = vmatpush2.bf16.msra.mxu1 %v5530_v21  ;;  %v6323_v44 = vadd.f32 %v2378_v39, %v2186_v43  ;;  %v2188_v31 = vadd.f32 %v2187_v61, %v6040_v55  ;;  %3195 = vmatprep.subr.bf16.mxu0 %v5535_v54  ;;  %v5542_v21 = vld [vmem:[#allocation5 + $0x728] ss:$16 sps:$4 sm:$0xff]   ;;  %v5547_v54 = vld [vmem:[#allocation5 + $0x50c] ss:$16 sps:$4 sm:$0xff]  }
 0x19e   :  { %3388 = vmatprep.subr.bf16.mxu1 %v5538_v9  ;;  %v2189_v6 = vpop.f32.mrf.mxu0  ;;  %v5550_v9 = vld [vmem:[#allocation5 + $0x70c] ss:$16 sps:$4 sm:$0xff]  }
 0x19f   :  { %v2382_v7 = vpop.f32.mrf.mxu1  ;;  %v6326_v26 = vadd.f32 %v2380_v4, %v2188_v31  ;;  %v2190_v34 = vadd.f32 %v2189_v6, %v6034_v24 }
 0x1a0   :  { %v2191_v35 = vpop.f32.mrf.mxu0  ;;  %3196 = vmatpush2.bf16.msra.mxu0 %v5533_v5 }
 0x1a1   :  { %v2384_v53 = vpop.f32.mrf.mxu1  ;;  %3389 = vmatpush2.bf16.msra.mxu1 %v5536_v19  ;;  %v6329_v15 = vadd.f32 %v2382_v7, %v2190_v34  ;;  %v2192_v39 = vadd.f32 %v2191_v35, %v6040_v55  ;;  %3197 = vmatprep.subr.bf16.mxu0 %v5541_v32  ;;  %v5545_v32 = vld [vmem:[#allocation5 + $0x508] ss:$16 sps:$4 sm:$0xff]  }
 0x1a2   :  { %3390 = vmatprep.subr.bf16.mxu1 %v5544_v45  ;;  %v2195_v43 = vpop.f32.mrf.mxu0  ;;  %2886 = vmatmul.mubr.bf16.gmra.mxu0 %v5819_v0  ;;  %v5548_v45 = vld [vmem:[#allocation5 + $0x708] ss:$16 sps:$4 sm:$0xff]  }
 0x1a3   :  { %v2388_v61 = vpop.f32.mrf.mxu1  ;;  %3079 = vmatmul.mubr.bf16.gmra.mxu1 %v5821_v1  ;;  %v6334_v4 = vadd.f32 %v2384_v53, %v2192_v39  ;;  %v2196_v5 = vadd.f32 %v2195_v43, %v6034_v24  ;;  %2895 = vmatprep.mubr.bf16.mxu0 %v5823_v2 }
 0x1a4   :  { %3088 = vmatprep.mubr.bf16.mxu1 %v5825_v3  ;;  %v2197_v19 = vpop.f32.mrf.mxu0  ;;  %3198 = vmatpush2.bf16.msra.mxu0 %v5539_v52 }
 0x1a5   :  { %v2390_v31 = vpop.f32.mrf.mxu1  ;;  %3391 = vmatpush2.bf16.msra.mxu1 %v5542_v21  ;;  %v6339_v6 = vadd.f32 %v2388_v61, %v2196_v5  ;;  %v2198_v0 = vadd.f32 %v2197_v19, %v6040_v55  ;;  %3199 = vmatprep.subr.bf16.mxu0 %v5547_v54  ;;  %v7359_v19 = vld [vmem:[#allocation80_spill] sm:$0xff] }
 0x1a6   :  { %3392 = vmatprep.subr.bf16.mxu1 %v5550_v9  ;;  %v2199_v1 = vpop.f32.mrf.mxu0 }
 0x1a7   :  { %v2392_v7 = vpop.f32.mrf.mxu1  ;;  %v6342_v34 = vadd.f32 %v2390_v31, %v2198_v0  ;;  %v2200_v2 = vadd.f32 %v2199_v1, %v6034_v24  ;;  %v7358_v24 = vld [vmem:[#allocation12_spill] sm:$0xff]  ;;  %v7360_v0 = vld [vmem:[#allocation83_spill] sm:$0xff] }
 0x1a8   :  { %v2201_v35 = vpop.f32.mrf.mxu0  ;;  %3200 = vmatpush2.bf16.msra.mxu0 %v5545_v32 }
 0x1a9   :  { %7355 = vst [vmem:[#allocation126_spill] sm:$0xff] %v6342_v34  ;;  %v2394_v3 = vpop.f32.mrf.mxu1  ;;  %3393 = vmatpush2.bf16.msra.mxu1 %v5548_v45  ;;  %v6345_v53 = vadd.f32 %v2392_v7, %v2200_v2  ;;  %v2202_v52 = vadd.f32 %v2201_v35, %v6040_v55  ;;  %v7361_v2 = vld [vmem:[#allocation84_spill] sm:$0xff] }
 0x1aa   :  { %v2431_v21 = vpop.f32.mrf.mxu0  ;;  %2896 = vmatmul.mubr.bf16.gmra.mxu0 %v5831_v30 }
 0x1ab   :  { %7356 = vst [vmem:[#allocation127_spill] sm:$0xff] %v6345_v53  ;;  %v2624_v39 = vpop.f32.mrf.mxu1  ;;  %3089 = vmatmul.mubr.bf16.gmra.mxu1 %v5833_v33  ;;  %v6350_v54 = vadd.f32 %v2394_v3, %v2202_v52  ;;  %v2432_v9 = vadd.f32 %v2431_v21, %v6047_v13  ;;  %2905 = vmatprep.mubr.bf16.mxu0 %v5835_v46  ;;  %v7362_v46 = vld [vmem:[#allocation13_spill] sm:$0xff]  ;;  %v7363_v52 = vld [vmem:[#allocation14_spill] sm:$0xff] }
 0x1ac   :  { %3098 = vmatprep.mubr.bf16.mxu1 %v7358_v24  ;;  %v2433_v43 = vpop.f32.mrf.mxu0  ;;  %v7364_v24 = vld [vmem:[#allocation85_spill] sm:$0xff] }
 0x1ad   :  { %7357 = vst [vmem:[#allocation128_spill] sm:$0xff] %v6350_v54  ;;  %v2626_v61 = vpop.f32.mrf.mxu1  ;;  %v2625_v5 = vadd.f32 %v2624_v39, %v2432_v9  ;;  %v2434_v31 = vadd.f32 %v2433_v43, %v7359_v19  ;;  %v7365_v19 = vld [vmem:[#allocation15_spill] sm:$0xff] }
 0x1ae   :  { %v2435_v55 = vpop.f32.mrf.mxu0 }
 0x1af   :  { %v2628_v32 = vpop.f32.mrf.mxu1  ;;  %v2627_v45 = vadd.f32 %v2626_v61, %v2434_v31  ;;  %v2436_v30 = vadd.f32 %v2435_v55, %v7360_v0  ;;  %v3555_v21 = vmax.f32 %v2625_v5, 0.0  ;;  %v7366_v61 = vld [vmem:[#allocation16_spill] sm:$0xff] }
 0x1b0   :  { %v2437_v1 = vpop.f32.mrf.mxu0 }
 0x1b1   :  { %v2630_v33 = vpop.f32.mrf.mxu1  ;;  %v2629_v7 = vadd.f32 %v2628_v32, %v2436_v30  ;;  %v2438_v35 = vadd.f32 %v2437_v1, %v7361_v2  ;;  %v3556_v31 = vmax.f32 %v2627_v45, 0.0  ;;  %v7368_v2 = vld [vmem:[#allocation88_spill] sm:$0xff] }
 0x1b2   :  { %v2441_v13 = vpop.f32.mrf.mxu0  ;;  %2906 = vmatmul.mubr.bf16.gmra.mxu0 %v7362_v46 }
 0x1b3   :  { %v2634_v3 = vpop.f32.mrf.mxu1  ;;  %3099 = vmatmul.mubr.bf16.gmra.mxu1 %v7363_v52  ;;  %v3559_v39 = vmax.f32 %v2629_v7, 0.0  ;;  %v2631_v9 = vadd.f32 %v2630_v33, %v2438_v35  ;;  %v2442_v43 = vadd.f32 %v2441_v13, %v7364_v24  ;;  %2915 = vmatprep.mubr.bf16.mxu0 %v7365_v19  ;;  %v7369_v7 = vld [vmem:[#allocation91_spill] sm:$0xff] }
 0x1b4   :  { %3108 = vmatprep.mubr.bf16.mxu1 %v7366_v61  ;;  %v2443_v55 = vpop.f32.mrf.mxu0  ;;  %v7371_v61 = vld [vmem:[#allocation92_spill] sm:$0xff] }
 0x1b5   :  { %v2636_v32 = vpop.f32.mrf.mxu1  ;;  %v6363_v0 = vpack.c.bf16 %v3559_v39, %v3555_v21  ;;  %v3560_v30 = vmax.f32 %v2631_v9, 0.0  ;;  %v2635_v1 = vadd.f32 %v2634_v3, %v2442_v43  ;;  %v2444_v46 = vadd.f32 %v2443_v55, %v7368_v2  ;;  %v7372_v21 = vld [vmem:[#allocation17_spill] sm:$0xff]  ;;  %v7373_v39 = vld [vmem:[#allocation18_spill] sm:$0xff]  ;;  %v7375_v2 = vld [vmem:[#allocation19_spill] sm:$0xff] }
 0x1b6   :  { %v2445_v54 = vpop.f32.mrf.mxu0  ;;  %v7374_v55 = vld [vmem:[#allocation93_spill] sm:$0xff] }
 0x1b7   :  { %7367 = vst [vmem:[#allocation12_spill] sm:$0xff] %v6363_v0  ;;  %v2638_v52 = vpop.f32.mrf.mxu1  ;;  %v2637_v5 = vadd.f32 %v2636_v32, %v2444_v46  ;;  %v2446_v33 = vadd.f32 %v2445_v54, %v7369_v7  ;;  %v6367_v35 = vpack.c.bf16 %v3560_v30, %v3556_v31  ;;  %v3563_v3 = vmax.f32 %v2635_v1, 0.0  ;;  %v7376_v54 = vld [vmem:[#allocation20_spill] sm:$0xff]  ;;  %v5551_v31 = vld [vmem:[#allocation7 + $0x78] sm:$0xff]  }
 0x1b8   :  { %v2447_v13 = vpop.f32.mrf.mxu0  ;;  %4931 = vmatprep.subr.bf16.mxu0 %v5551_v31  ;;  %v5553_v1 = vld [vmem:[#allocation7 + $0xf8] sm:$0xff]   ;;  %v7381_v0 = vld [vmem:[#allocation100_spill] sm:$0xff] }
 0x1b9   :  { %7370 = vst [vmem:[#allocation80_spill] sm:$0xff] %v6367_v35  ;;  %v2640_v24 = vpop.f32.mrf.mxu1  ;;  %v2639_v19 = vadd.f32 %v2638_v52, %v2446_v33  ;;  %v2448_v45 = vadd.f32 %v2447_v13, %v7371_v61  ;;  %v3564_v30 = vmax.f32 %v2637_v5, 0.0  ;;  %v7378_v61 = vld [vmem:[#allocation96_spill] sm:$0xff]  ;;  %5043 = vmatprep.subr.bf16.mxu1 %v5553_v1 }
 0x1ba   :  { %v2451_v53 = vpop.f32.mrf.mxu0  ;;  %2916 = vmatmul.mubr.bf16.gmra.mxu0 %v7372_v21 }
 0x1bb   :  { %v2644_v34 = vpop.f32.mrf.mxu1  ;;  %3109 = vmatmul.mubr.bf16.gmra.mxu1 %v7373_v39  ;;  %v3567_v9 = vmax.f32 %v2639_v19, 0.0  ;;  %v2641_v43 = vadd.f32 %v2640_v24, %v2448_v45  ;;  %v2452_v32 = vadd.f32 %v2451_v53, %v7374_v55  ;;  %2925 = vmatprep.mubr.bf16.mxu0 %v7375_v2  ;;  %v7379_v53 = vld [vmem:[#allocation99_spill] sm:$0xff] }
 0x1bc   :  { %3118 = vmatprep.mubr.bf16.mxu1 %v7376_v54  ;;  %v2453_v46 = vpop.f32.mrf.mxu0 }
 0x1bd   :  { %v2646_v52 = vpop.f32.mrf.mxu1  ;;  %v6375_v7 = vpack.c.bf16 %v3567_v9, %v3563_v3  ;;  %v3568_v33 = vmax.f32 %v2641_v43, 0.0  ;;  %v2645_v13 = vadd.f32 %v2644_v34, %v2452_v32  ;;  %v2454_v21 = vadd.f32 %v2453_v46, %v7378_v61  ;;  %v7382_v34 = vld [vmem:[#allocation21_spill] sm:$0xff]  ;;  %v7383_v32 = vld [vmem:[#allocation22_spill] sm:$0xff] }
 0x1be   :  { %v2455_v19 = vpop.f32.mrf.mxu0 }
 0x1bf   :  { %7377 = vst [vmem:[#allocation83_spill] sm:$0xff] %v6375_v7  ;;  %v2648_v24 = vpop.f32.mrf.mxu1  ;;  %v2647_v45 = vadd.f32 %v2646_v52, %v2454_v21  ;;  %v2456_v39 = vadd.f32 %v2455_v19, %v7379_v53  ;;  %v6379_v55 = vpack.c.bf16 %v3568_v33, %v3564_v30  ;;  %v3571_v31 = vmax.f32 %v2645_v13, 0.0  ;;  %v7384_v52 = vld [vmem:[#allocation101_spill] sm:$0xff]  ;;  %v7385_v19 = vld [vmem:[#allocation23_spill] sm:$0xff]  ;;  %v7386_v30 = vld [vmem:[#allocation24_spill] sm:$0xff] }
 0x1c0   :  { %v2457_v2 = vpop.f32.mrf.mxu0 }
 0x1c1   :  { %7380 = vst [vmem:[#allocation84_spill] sm:$0xff] %v6379_v55  ;;  %v2650_v5 = vpop.f32.mrf.mxu1  ;;  %v2649_v54 = vadd.f32 %v2648_v24, %v2456_v39  ;;  %v2458_v3 = vadd.f32 %v2457_v2, %v7381_v0  ;;  %v3572_v33 = vmax.f32 %v2647_v45, 0.0  ;;  %v7388_v2 = vld [vmem:[#allocation104_spill] sm:$0xff] }
 0x1c2   :  { %v2461_v9 = vpop.f32.mrf.mxu0  ;;  %2926 = vmatmul.mubr.bf16.gmra.mxu0 %v7382_v34 }
 0x1c3   :  { %v2654_v43 = vpop.f32.mrf.mxu1  ;;  %3119 = vmatmul.mubr.bf16.gmra.mxu1 %v7383_v32  ;;  %v3575_v46 = vmax.f32 %v2649_v54, 0.0  ;;  %v2651_v61 = vadd.f32 %v2650_v5, %v2458_v3  ;;  %v2462_v21 = vadd.f32 %v2461_v9, %v7384_v52  ;;  %2935 = vmatprep.mubr.bf16.mxu0 %v7385_v19  ;;  %v7389_v54 = vld [vmem:[#allocation107_spill] sm:$0xff] }
 0x1c4   :  { %3128 = vmatprep.mubr.bf16.mxu1 %v7386_v30  ;;  %v2463_v1 = vpop.f32.mrf.mxu0  ;;  %v7391_v30 = vld [vmem:[#allocation108_spill] sm:$0xff] }
 0x1c5   :  { %v2656_v24 = vpop.f32.mrf.mxu1  ;;  %v6387_v53 = vpack.c.bf16 %v3575_v46, %v3571_v31  ;;  %v3576_v0 = vmax.f32 %v2651_v61, 0.0  ;;  %v2655_v39 = vadd.f32 %v2654_v43, %v2462_v21  ;;  %v2464_v34 = vadd.f32 %v2463_v1, %v7388_v2  ;;  %v7392_v31 = vld [vmem:[#allocation25_spill] sm:$0xff]  ;;  %v7393_v46 = vld [vmem:[#allocation26_spill] sm:$0xff]  ;;  %v7395_v2 = vld [vmem:[#allocation27_spill] sm:$0xff] }
 0x1c6   :  { %v2465_v7 = vpop.f32.mrf.mxu0  ;;  %v7394_v1 = vld [vmem:[#allocation109_spill] sm:$0xff] }
 0x1c7   :  { %7387 = vst [vmem:[#allocation13_spill] sm:$0xff] %v6387_v53  ;;  %v2658_v32 = vpop.f32.mrf.mxu1  ;;  %v2657_v13 = vadd.f32 %v2656_v24, %v2464_v34  ;;  %v2466_v5 = vadd.f32 %v2465_v7, %v7389_v54  ;;  %v6391_v3 = vpack.c.bf16 %v3576_v0, %v3572_v33  ;;  %v3579_v43 = vmax.f32 %v2655_v39, 0.0  ;;  %v7396_v7 = vld [vmem:[#allocation28_spill] sm:$0xff] }
 0x1c8   :  { %v2467_v9 = vpop.f32.mrf.mxu0 }
 0x1c9   :  { %7390 = vst [vmem:[#allocation14_spill] sm:$0xff] %v6391_v3  ;;  %v2660_v52 = vpop.f32.mrf.mxu1  ;;  %v2659_v19 = vadd.f32 %v2658_v32, %v2466_v5  ;;  %v2468_v45 = vadd.f32 %v2467_v9, %v7391_v30  ;;  %v3580_v33 = vmax.f32 %v2657_v13, 0.0  ;;  %v7397_v9 = vld [vmem:[#allocation112_spill] sm:$0xff] }
 0x1ca   :  { %v2471_v55 = vpop.f32.mrf.mxu0  ;;  %2936 = vmatmul.mubr.bf16.gmra.mxu0 %v7392_v31 }
 0x1cb   :  { %v2664_v35 = vpop.f32.mrf.mxu1  ;;  %3129 = vmatmul.mubr.bf16.gmra.mxu1 %v7393_v46  ;;  %v3583_v61 = vmax.f32 %v2659_v19, 0.0  ;;  %v2661_v21 = vadd.f32 %v2660_v52, %v2468_v45  ;;  %v2472_v24 = vadd.f32 %v2471_v55, %v7394_v1  ;;  %2945 = vmatprep.mubr.bf16.mxu0 %v7395_v2  ;;  %v7398_v19 = vld [vmem:[#allocation115_spill] sm:$0xff] }
 0x1cc   :  { %3138 = vmatprep.mubr.bf16.mxu1 %v7396_v7  ;;  %v2473_v0 = vpop.f32.mrf.mxu0  ;;  %v7399_v7 = vld [vmem:[#allocation116_spill] sm:$0xff] }
 0x1cd   :  { %v2666_v34 = vpop.f32.mrf.mxu1  ;;  %v6399_v32 = vpack.c.bf16 %v3583_v61, %v3579_v43  ;;  %v3584_v54 = vmax.f32 %v2661_v21, 0.0  ;;  %v2665_v5 = vadd.f32 %v2664_v35, %v2472_v24  ;;  %v2474_v30 = vadd.f32 %v2473_v0, %v7397_v9  ;;  %v7400_v43 = vld [vmem:[#allocation29_spill] sm:$0xff]  ;;  %v7401_v61 = vld [vmem:[#allocation30_spill] sm:$0xff]  ;;  %v7403_v9 = vld [vmem:[#allocation31_spill] sm:$0xff] }
 0x1ce   :  { %v2475_v31 = vpop.f32.mrf.mxu0  ;;  %v7402_v0 = vld [vmem:[#allocation117_spill] sm:$0xff] }
 0x1cf   :  { %v2668_v46 = vpop.f32.mrf.mxu1  ;;  %v2667_v39 = vadd.f32 %v2666_v34, %v2474_v30  ;;  %v2476_v52 = vadd.f32 %v2475_v31, %v7398_v19  ;;  %v6403_v45 = vpack.c.bf16 %v3584_v54, %v3580_v33  ;;  %v3587_v35 = vmax.f32 %v2665_v5, 0.0  ;;  %v7404_v33 = vld [vmem:[#allocation32_spill] sm:$0xff] }
 0x1d0   :  { %v2477_v55 = vpop.f32.mrf.mxu0 }
 0x1d1   :  { %v2670_v1 = vpop.f32.mrf.mxu1  ;;  %v2669_v2 = vadd.f32 %v2668_v46, %v2476_v52  ;;  %v2478_v13 = vadd.f32 %v2477_v55, %v7399_v7  ;;  %v3588_v54 = vmax.f32 %v2667_v39, 0.0 }
 0x1d2   :  { %v2481_v53 = vpop.f32.mrf.mxu0  ;;  %2946 = vmatmul.mubr.bf16.gmra.mxu0 %v7400_v43 }
 0x1d3   :  { %v2674_v3 = vpop.f32.mrf.mxu1  ;;  %3139 = vmatmul.mubr.bf16.gmra.mxu1 %v7401_v61  ;;  %v3591_v21 = vmax.f32 %v2669_v2, 0.0  ;;  %v2671_v24 = vadd.f32 %v2670_v1, %v2478_v13  ;;  %v2482_v34 = vadd.f32 %v2481_v53, %v7402_v0  ;;  %2955 = vmatprep.mubr.bf16.mxu0 %v7403_v9 }
 0x1d4   :  { %3148 = vmatprep.mubr.bf16.mxu1 %v7404_v33  ;;  %v2483_v30 = vpop.f32.mrf.mxu0  ;;  %v7407_v33 = vld [vmem:[#allocation35_spill] sm:$0xff] }
 0x1d5   :  { %v2676_v31 = vpop.f32.mrf.mxu1  ;;  %v6411_v46 = vpack.c.bf16 %v3591_v21, %v3587_v35  ;;  %v3592_v19 = vmax.f32 %v2671_v24, 0.0  ;;  %v2675_v52 = vadd.f32 %v2674_v3, %v2482_v34  ;;  %v2484_v55 = vadd.f32 %v2483_v30, %v6174_v25  ;;  %v7405_v35 = vld [vmem:[#allocation33_spill] sm:$0xff]  ;;  %v7406_v21 = vld [vmem:[#allocation34_spill] sm:$0xff] }
 0x1d6   :  { %v2485_v7 = vpop.f32.mrf.mxu0 }
 0x1d7   :  { %v2678_v43 = vpop.f32.mrf.mxu1  ;;  %v2677_v5 = vadd.f32 %v2676_v31, %v2484_v55  ;;  %v2486_v1 = vadd.f32 %v2485_v7, %v6181_v10  ;;  %v6415_v2 = vpack.c.bf16 %v3592_v19, %v3588_v54  ;;  %v3595_v3 = vmax.f32 %v2675_v52, 0.0  ;;  %v7408_v10 = vld [vmem:[#allocation36_spill] sm:$0xff] }
 0x1d8   :  { %v2487_v53 = vpop.f32.mrf.mxu0 }
 0x1d9   :  { %v2680_v13 = vpop.f32.mrf.mxu1  ;;  %v2679_v61 = vadd.f32 %v2678_v43, %v2486_v1  ;;  %v2488_v39 = vadd.f32 %v2487_v53, %v6186_v62  ;;  %v3596_v54 = vmax.f32 %v2677_v5, 0.0 }
 0x1da   :  { %v2491_v0 = vpop.f32.mrf.mxu0  ;;  %2956 = vmatmul.mubr.bf16.gmra.mxu0 %v7405_v35 }
 0x1db   :  { %v2684_v9 = vpop.f32.mrf.mxu1  ;;  %3149 = vmatmul.mubr.bf16.gmra.mxu1 %v7406_v21  ;;  %v3599_v25 = vmax.f32 %v2679_v61, 0.0  ;;  %v2681_v24 = vadd.f32 %v2680_v13, %v2488_v39  ;;  %v2492_v34 = vadd.f32 %v2491_v0, %v6191_v49  ;;  %2965 = vmatprep.mubr.bf16.mxu0 %v7407_v33  ;;  %v7409_v21 = vld [vmem:[#allocation37_spill] sm:$0xff] }
 0x1dc   :  { %3158 = vmatprep.mubr.bf16.mxu1 %v7408_v10  ;;  %v2493_v30 = vpop.f32.mrf.mxu0 }
 0x1dd   :  { %v2686_v31 = vpop.f32.mrf.mxu1  ;;  %v6423_v19 = vpack.c.bf16 %v3599_v25, %v3595_v3  ;;  %v3600_v62 = vmax.f32 %v2681_v24, 0.0  ;;  %v2685_v55 = vadd.f32 %v2684_v9, %v2492_v34  ;;  %v2494_v7 = vadd.f32 %v2493_v30, %v6198_v41  ;;  %v7410_v3 = vld [vmem:[#allocation38_spill] sm:$0xff]  ;;  %v7411_v34 = vld [vmem:[#allocation39_spill] sm:$0xff] }
 0x1de   :  { %v2495_v43 = vpop.f32.mrf.mxu0 }
 0x1df   :  { %v2688_v1 = vpop.f32.mrf.mxu1  ;;  %v2687_v52 = vadd.f32 %v2686_v31, %v2494_v7  ;;  %v2496_v53 = vadd.f32 %v2495_v43, %v6201_v51  ;;  %v6427_v13 = vpack.c.bf16 %v3600_v62, %v3596_v54  ;;  %v3603_v9 = vmax.f32 %v2685_v55, 0.0  ;;  %v7412_v51 = vld [vmem:[#allocation40_spill] sm:$0xff] }
 0x1e0   :  { %v2497_v49 = vpop.f32.mrf.mxu0 }
 0x1e1   :  { %v2690_v61 = vpop.f32.mrf.mxu1  ;;  %v2689_v39 = vadd.f32 %v2688_v1, %v2496_v53  ;;  %v2498_v5 = vadd.f32 %v2497_v49, %v6206_v8  ;;  %v3604_v33 = vmax.f32 %v2687_v52, 0.0  ;;  %v7413_v1 = vld [vmem:[#allocation124_spill] sm:$0xff] }
 0x1e2   :  { %v2501_v0 = vpop.f32.mrf.mxu0  ;;  %2966 = vmatmul.mubr.bf16.gmra.mxu0 %v7409_v21  ;;  %v5555_v21 = vld [vmem:[#allocation7 + $0x70] sm:$0xff]  }
 0x1e3   :  { %v2694_v35 = vpop.f32.mrf.mxu1  ;;  %3159 = vmatmul.mubr.bf16.gmra.mxu1 %v7410_v3  ;;  %v3607_v41 = vmax.f32 %v2689_v39, 0.0  ;;  %v2691_v25 = vadd.f32 %v2690_v61, %v2498_v5  ;;  %v2502_v24 = vadd.f32 %v2501_v0, %v6211_v23  ;;  %3201 = vmatprep.mubr.bf16.mxu0 %v7411_v34  ;;  %v5552_v39 = vld [vmem:[#allocation7 + $0x38] sm:$0xff]   ;;  %v5557_v3 = vld [vmem:[#allocation7 + $0xf0] sm:$0xff]  }
 0x1e4   :  { %3394 = vmatprep.mubr.bf16.mxu1 %v7412_v51  ;;  %v2503_v10 = vpop.f32.mrf.mxu0  ;;  %v5554_v5 = vld [vmem:[#allocation7 + $0xb8] sm:$0xff]   ;;  %v7416_v51 = vld [vmem:[#allocation125_spill] sm:$0xff] }
 0x1e5   :  { %v2696_v54 = vpop.f32.mrf.mxu1  ;;  %v6435_v30 = vpack.c.bf16 %v3607_v41, %v3603_v9  ;;  %v3608_v8 = vmax.f32 %v2691_v25, 0.0  ;;  %v2695_v31 = vadd.f32 %v2694_v35, %v2502_v24  ;;  %v2504_v62 = vadd.f32 %v2503_v10, %v6214_v29  ;;  %v7414_v41 = vld [vmem:[#allocation41_spill] sm:$0xff]  ;;  %v7415_v29 = vld [vmem:[#allocation42_spill] sm:$0xff]  ;;  %v7417_v10 = vld [vmem:[#allocation43_spill] sm:$0xff] }
 0x1e6   :  { %v2505_v7 = vpop.f32.mrf.mxu0 }
 0x1e7   :  { %v2698_v43 = vpop.f32.mrf.mxu1  ;;  %v2697_v55 = vadd.f32 %v2696_v54, %v2504_v62  ;;  %v2506_v53 = vadd.f32 %v2505_v7, %v7413_v1  ;;  %v6439_v49 = vpack.c.bf16 %v3608_v8, %v3604_v33  ;;  %v3611_v25 = vmax.f32 %v2695_v31, 0.0  ;;  %v7418_v54 = vld [vmem:[#allocation44_spill] sm:$0xff]  ;;  %v5556_v7 = vld [vmem:[#allocation7 + $0x30] sm:$0xff]  }
 0x1e8   :  { %v2507_v23 = vpop.f32.mrf.mxu0 }
 0x1e9   :  { %v2700_v61 = vpop.f32.mrf.mxu1  ;;  %v2699_v52 = vadd.f32 %v2698_v43, %v2506_v53  ;;  %v2508_v0 = vadd.f32 %v2507_v23, %v6222_v57  ;;  %v3612_v8 = vmax.f32 %v2697_v55, 0.0  ;;  %v5558_v43 = vld [vmem:[#allocation7 + $0xb0] sm:$0xff]  }
 0x1ea   :  { %v2511_v9 = vpop.f32.mrf.mxu0  ;;  %3202 = vmatmul.mubr.bf16.vlgmr.msra.gmra.mxu0 %v7414_v41 }
 0x1eb   :  { %v2704_v35 = vpop.f32.mrf.mxu1  ;;  %3395 = vmatmul.mubr.bf16.vlgmr.msra.gmra.mxu1 %v7415_v29  ;;  %v3615_v24 = vmax.f32 %v2699_v52, 0.0  ;;  %v2701_v34 = vadd.f32 %v2700_v61, %v2508_v0  ;;  %v2512_v33 = vadd.f32 %v2511_v9, %v7416_v51  ;;  %3211 = vmatprep.mubr.bf16.mxu0 %v7417_v10  ;;  %v5559_v61 = vld [vmem:[#allocation7 + $0x68] sm:$0xff]  }
 0x1ec   :  { %3404 = vmatprep.mubr.bf16.mxu1 %v7418_v54  ;;  %v2513_v62 = vpop.f32.mrf.mxu0  ;;  %4932 = vmatpush3.bf16.msra.mxu0 %v5552_v39  ;;  %v5564_v52 = vld [vmem:[#allocation7 + $0xe8] sm:$0xff]  }
 0x1ed   :  { %v2706_v57 = vpop.f32.mrf.mxu1  ;;  %5044 = vmatpush3.bf16.msra.mxu1 %v5554_v5  ;;  %v6447_v1 = vpack.c.bf16 %v3615_v24, %v3611_v25  ;;  %v3616_v53 = vmax.f32 %v2701_v34, 0.0  ;;  %v2705_v23 = vadd.f32 %v2704_v35, %v2512_v33  ;;  %v2514_v31 = vadd.f32 %v2513_v62, %v6230_v63  ;;  %4933 = vmatprep.subr.bf16.mxu0 %v5555_v21  ;;  %v5560_v25 = vld [vmem:[#allocation7 + $0x28] sm:$0xff]   ;;  %v5561_v21 = vld [vmem:[#allocation7 + $0x60] sm:$0xff]  }
 0x1ee   :  { %5045 = vmatprep.subr.bf16.mxu1 %v5557_v3  ;;  %v2515_v0 = vpop.f32.mrf.mxu0  ;;  %v5566_v24 = vld [vmem:[#allocation7 + $0xa8] sm:$0xff]   ;;  %v5573_v3 = vld [vmem:[#allocation7 + $0xe0] sm:$0xff]  }
 0x1ef   :  { %v2708_v9 = vpop.f32.mrf.mxu1  ;;  %v2707_v41 = vadd.f32 %v2706_v57, %v2514_v31  ;;  %v2516_v55 = vadd.f32 %v2515_v0, %v6233_v22  ;;  %v6451_v29 = vpack.c.bf16 %v3616_v53, %v3612_v8  ;;  %v7419_v33 = vld [vmem:[#allocation45_spill] sm:$0xff]  ;;  %v7420_v22 = vld [vmem:[#allocation46_spill] sm:$0xff]  ;;  %v3619_v10 = vmax.f32 %v2705_v23, 0.0  ;;  %v7421_v57 = vld [vmem:[#allocation47_spill] sm:$0xff] }
 0x1f0   :  { %v2517_v39 = vpop.f32.mrf.mxu0  ;;  %4934 = vmatpush3.bf16.msra.mxu0 %v5556_v7  ;;  %v7422_v7 = vld [vmem:[#allocation48_spill] sm:$0xff] }
 0x1f1   :  { %v2710_v5 = vpop.f32.mrf.mxu1  ;;  %5046 = vmatpush3.bf16.msra.mxu1 %v5558_v43  ;;  %v2709_v35 = vadd.f32 %v2708_v9, %v2516_v55  ;;  %v2518_v63 = vadd.f32 %v2517_v39, %v6238_v11  ;;  %4935 = vmatprep.subr.bf16.mxu0 %v5559_v61  ;;  %v3620_v11 = vmax.f32 %v2707_v41, 0.0  ;;  %v5562_v31 = vld [vmem:[#allocation7 + $0x20] sm:$0xff]   ;;  %v5563_v55 = vld [vmem:[#allocation7 + $0x58] sm:$0xff]  }
 0x1f2   :  { %5047 = vmatprep.subr.bf16.mxu1 %v5564_v52  ;;  %v2521_v34 = vpop.f32.mrf.mxu0  ;;  %3212 = vmatmul.mubr.bf16.gmra.mxu0 %v7419_v33  ;;  %v5574_v61 = vld [vmem:[#allocation7 + $0xa0] sm:$0xff]  }
 0x1f3   :  { %v2714_v51 = vpop.f32.mrf.mxu1  ;;  %3405 = vmatmul.mubr.bf16.gmra.mxu1 %v7420_v22  ;;  %v3623_v54 = vmax.f32 %v2709_v35, 0.0  ;;  %v2711_v8 = vadd.f32 %v2710_v5, %v2518_v63  ;;  %v2522_v62 = vadd.f32 %v2521_v34, %v6243_v17  ;;  %3221 = vmatprep.mubr.bf16.mxu0 %v7421_v57  ;;  %v7424_v22 = vld [vmem:[#allocation50_spill] sm:$0xff]  ;;  %v7426_v57 = vld [vmem:[#allocation52_spill] sm:$0xff] }
 0x1f4   :  { %3414 = vmatprep.mubr.bf16.mxu1 %v7422_v7  ;;  %v2523_v43 = vpop.f32.mrf.mxu0  ;;  %4936 = vmatpush3.bf16.msra.mxu0 %v5560_v25 }
 0x1f5   :  { %v2716_v53 = vpop.f32.mrf.mxu1  ;;  %5048 = vmatpush3.bf16.msra.mxu1 %v5566_v24  ;;  %v6459_v52 = vpack.c.bf16 %v3623_v54, %v3619_v10  ;;  %v3624_v0 = vmax.f32 %v2711_v8, 0.0  ;;  %v2715_v9 = vadd.f32 %v2714_v51, %v2522_v62  ;;  %v2524_v23 = vadd.f32 %v2523_v43, %v6246_v20  ;;  %4937 = vmatprep.subr.bf16.mxu0 %v5561_v21  ;;  %v5565_v24 = vld [vmem:[#allocation7 + $0x18] sm:$0xff]   ;;  %v5567_v20 = vld [vmem:[#allocation7 + $0x50] sm:$0xff]  }
 0x1f6   :  { %5049 = vmatprep.subr.bf16.mxu1 %v5573_v3  ;;  %v2525_v17 = vpop.f32.mrf.mxu0  ;;  %v7423_v3 = vld [vmem:[#allocation49_spill] sm:$0xff]  ;;  %v7425_v62 = vld [vmem:[#allocation51_spill] sm:$0xff] }
 0x1f7   :  { %v2718_v39 = vpop.f32.mrf.mxu1  ;;  %v2717_v5 = vadd.f32 %v2716_v53, %v2524_v23  ;;  %v2526_v41 = vadd.f32 %v2525_v17, %v6249_v50  ;;  %v6463_v35 = vpack.c.bf16 %v3624_v0, %v3620_v11  ;;  %v3627_v10 = vmax.f32 %v2715_v9, 0.0  ;;  %v5568_v43 = vld [vmem:[#allocation7 + $0x10] sm:$0xff]   ;;  %v5569_v9 = vld [vmem:[#allocation7 + $0x48] sm:$0xff]   ;;  %v5575_v23 = vld [vmem:[#allocation7 + $0xd8] sm:$0xff]  }
 0x1f8   :  { %v2527_v25 = vpop.f32.mrf.mxu0  ;;  %4938 = vmatpush3.bf16.msra.mxu0 %v5562_v31 }
 0x1f9   :  { %v2720_v63 = vpop.f32.mrf.mxu1  ;;  %5050 = vmatpush3.bf16.msra.mxu1 %v5574_v61  ;;  %v2719_v34 = vadd.f32 %v2718_v39, %v2526_v41  ;;  %v2528_v51 = vadd.f32 %v2527_v25, %v6254_v28  ;;  %4939 = vmatprep.subr.bf16.mxu0 %v5563_v55  ;;  %v3628_v7 = vmax.f32 %v2717_v5, 0.0  ;;  %v5576_v55 = vld [vmem:[#allocation7 + $0x98] sm:$0xff]  }
 0x1fa   :  { %v2531_v21 = vpop.f32.mrf.mxu0  ;;  %3222 = vmatmul.mubr.bf16.gmra.mxu0 %v7423_v3  ;;  %5051 = vmatprep.subr.bf16.mxu1 %v5575_v23  ;;  %v7428_v3 = vld [vmem:[#allocation54_spill] sm:$0xff] }
 0x1fb   :  { %v2724_v33 = vpop.f32.mrf.mxu1  ;;  %3415 = vmatmul.mubr.bf16.gmra.mxu1 %v7424_v22  ;;  %v3631_v50 = vmax.f32 %v2719_v34, 0.0  ;;  %v2721_v54 = vadd.f32 %v2720_v63, %v2528_v51  ;;  %v2532_v8 = vadd.f32 %v2531_v21, %v6259_v12  ;;  %3231 = vmatprep.mubr.bf16.mxu0 %v7425_v62  ;;  %v5571_v51 = vld [vmem:[#allocation7 + $0x40] sm:$0xff]  }
 0x1fc   :  { %3424 = vmatprep.mubr.bf16.mxu1 %v7426_v57  ;;  %v2533_v11 = vpop.f32.mrf.mxu0  ;;  %4940 = vmatpush3.bf16.msra.mxu0 %v5565_v24  ;;  %v5570_v24 = vld [vmem:[#allocation7 + $0x8] sm:$0xff]  }
 0x1fd   :  { %v2726_v28 = vpop.f32.mrf.mxu1  ;;  %v6471_v53 = vpack.c.bf16 %v3631_v50, %v3627_v10  ;;  %v3632_v31 = vmax.f32 %v2721_v54, 0.0  ;;  %v2725_v61 = vadd.f32 %v2724_v33, %v2532_v8  ;;  %v2534_v0 = vadd.f32 %v2533_v11, %v6262_v48  ;;  %4941 = vmatprep.subr.bf16.mxu0 %v5567_v20  ;;  %5052 = vmatpush3.bf16.msra.mxu1 %v5576_v55  ;;  %v7427_v33 = vld [vmem:[#allocation53_spill] sm:$0xff]  ;;  %v7429_v54 = vld [vmem:[#allocation55_spill] sm:$0xff]  ;;  %v7430_v8 = vld [vmem:[#allocation56_spill] sm:$0xff] }
 0x1fe   :  { %v2535_v12 = vpop.f32.mrf.mxu0 }
 0x1ff   :  { %v2728_v17 = vpop.f32.mrf.mxu1  ;;  %v2727_v39 = vadd.f32 %v2726_v28, %v2534_v0  ;;  %v2536_v41 = vadd.f32 %v2535_v12, %v6265_v40  ;;  %v6475_v5 = vpack.c.bf16 %v3632_v31, %v3628_v7  ;;  %v3635_v40 = vmax.f32 %v2725_v61, 0.0  ;;  %v5572_v7 = vld [vmem:[#allocation7] sm:$0xff]  }
 0x200   :  { %v2537_v25 = vpop.f32.mrf.mxu0  ;;  %4942 = vmatpush3.bf16.msra.mxu0 %v5568_v43 }
 0x201   :  { %v2730_v63 = vpop.f32.mrf.mxu1  ;;  %v2729_v34 = vadd.f32 %v2728_v17, %v2536_v41  ;;  %v2538_v48 = vadd.f32 %v2537_v25, %v6270_v36  ;;  %4943 = vmatprep.subr.bf16.mxu0 %v5569_v9  ;;  %v3636_v62 = vmax.f32 %v2727_v39, 0.0 }
 0x202   :  { %v2541_v20 = vpop.f32.mrf.mxu0  ;;  %3232 = vmatmul.mubr.bf16.gmra.mxu0 %v7427_v33 }
 0x203   :  { %v2734_v21 = vpop.f32.mrf.mxu1  ;;  %3425 = vmatmul.mubr.bf16.gmra.mxu1 %v7428_v3  ;;  %v3639_v22 = vmax.f32 %v2729_v34, 0.0  ;;  %v2731_v10 = vadd.f32 %v2730_v63, %v2538_v48  ;;  %v2542_v50 = vadd.f32 %v2541_v20, %v6275_v38  ;;  %3241 = vmatprep.mubr.bf16.mxu0 %v7429_v54  ;;  %v7431_v63 = vld [vmem:[#allocation57_spill] sm:$0xff]  ;;  %v7434_v20 = vld [vmem:[#allocation60_spill] sm:$0xff] }
 0x204   :  { %3434 = vmatprep.mubr.bf16.mxu1 %v7430_v8  ;;  %v2543_v57 = vpop.f32.mrf.mxu0  ;;  %4944 = vmatpush3.bf16.msra.mxu0 %v5570_v24  ;;  %v7432_v24 = vld [vmem:[#allocation58_spill] sm:$0xff] }
 0x205   :  { %v2736_v36 = vpop.f32.mrf.mxu1  ;;  %v6483_v11 = vpack.c.bf16 %v3639_v22, %v3635_v40  ;;  %v3640_v28 = vmax.f32 %v2731_v10, 0.0  ;;  %v2735_v43 = vadd.f32 %v2734_v21, %v2542_v50  ;;  %v2544_v31 = vadd.f32 %v2543_v57, %v6278_v27  ;;  %4945 = vmatprep.subr.bf16.mxu0 %v5571_v51  ;;  %v5577_v50 = vld [vmem:[#allocation7 + $0xd0] sm:$0xff]  }
 0x206   :  { %v2545_v61 = vpop.f32.mrf.mxu0  ;;  %v5578_v54 = vld [vmem:[#allocation7 + $0x90] sm:$0xff]   ;;  %5053 = vmatprep.subr.bf16.mxu1 %v5577_v50 }
 0x207   :  { %v2738_v0 = vpop.f32.mrf.mxu1  ;;  %v2737_v9 = vadd.f32 %v2736_v36, %v2544_v31  ;;  %v2546_v38 = vadd.f32 %v2545_v61, %v6281_v56  ;;  %v6487_v23 = vpack.c.bf16 %v3640_v28, %v3636_v62  ;;  %v3643_v27 = vmax.f32 %v2735_v43, 0.0  ;;  %v7433_v56 = vld [vmem:[#allocation59_spill] sm:$0xff]  ;;  %5054 = vmatpush3.bf16.msra.mxu1 %v5578_v54  ;;  %v7439_v50 = vld [vmem:[#allocation66_spill] sm:$0xff] }
 0x208   :  { %v2547_v55 = vpop.f32.mrf.mxu0  ;;  %4946 = vmatpush3.bf16.msra.mxu0 %v5572_v7  ;;  %v7440_v54 = vld [vmem:[#allocation67_spill] sm:$0xff] }
 0x209   :  { %v2740_v12 = vpop.f32.mrf.mxu1  ;;  %v2739_v17 = vadd.f32 %v2738_v0, %v2546_v38  ;;  %v2548_v39 = vadd.f32 %v2547_v55, %v6286_v58  ;;  %v3644_v21 = vmax.f32 %v2737_v9, 0.0  ;;  %v7435_v9 = vld [vmem:[#allocation61_spill] sm:$0xff] }
 0x20a   :  { %v2551_v41 = vpop.f32.mrf.mxu0  ;;  %3242 = vmatmul.mubr.bf16.gmra.mxu0 %v7431_v63 }
 0x20b   :  { %v2744_v25 = vpop.f32.mrf.mxu1  ;;  %3435 = vmatmul.mubr.bf16.gmra.mxu1 %v7432_v24  ;;  %v3647_v34 = vmax.f32 %v2739_v17, 0.0  ;;  %v2741_v48 = vadd.f32 %v2740_v12, %v2548_v39  ;;  %v2552_v51 = vadd.f32 %v2551_v41, %v6291_v60  ;;  %3251 = vmatprep.mubr.bf16.mxu0 %v7433_v56  ;;  %v7437_v17 = vld [vmem:[#allocation63_spill] sm:$0xff]  ;;  %v7438_v39 = vld [vmem:[#allocation64_spill] sm:$0xff] }
 0x20c   :  { %3444 = vmatprep.mubr.bf16.mxu1 %v7434_v20  ;;  %v2553_v33 = vpop.f32.mrf.mxu0 }
 0x20d   :  { %v2746_v3 = vpop.f32.mrf.mxu1  ;;  %v6495_v40 = vpack.c.bf16 %v3647_v34, %v3643_v27  ;;  %v3648_v58 = vmax.f32 %v2741_v48, 0.0  ;;  %v2745_v22 = vadd.f32 %v2744_v25, %v2552_v51  ;;  %v2554_v10 = vadd.f32 %v2553_v33, %v6294_v47  ;;  %v7436_v47 = vld [vmem:[#allocation62_spill] sm:$0xff] }
 0x20e   :  { %v2555_v8 = vpop.f32.mrf.mxu0 }
 0x20f   :  { %v2748_v62 = vpop.f32.mrf.mxu1  ;;  %v2747_v57 = vadd.f32 %v2746_v3, %v2554_v10  ;;  %v2556_v60 = vadd.f32 %v2555_v8, %v6297_v37  ;;  %v6499_v36 = vpack.c.bf16 %v3648_v58, %v3644_v21  ;;  %v3651_v38 = vmax.f32 %v2745_v22, 0.0 }
 0x210   :  { %v2557_v7 = vpop.f32.mrf.mxu0 }
 0x211   :  { %v2750_v28 = vpop.f32.mrf.mxu1  ;;  %v2749_v43 = vadd.f32 %v2748_v62, %v2556_v60  ;;  %v2558_v31 = vadd.f32 %v2557_v7, %v6302_v14  ;;  %v3652_v41 = vmax.f32 %v2747_v57, 0.0  ;;  %v7441_v60 = vld [vmem:[#allocation68_spill] sm:$0xff] }
 0x212   :  { %v2561_v61 = vpop.f32.mrf.mxu0  ;;  %3252 = vmatmul.mubr.bf16.gmra.mxu0 %v7435_v9  ;;  %v5579_v9 = vld [vmem:[#allocation7 + $0xc8] sm:$0xff]  }
 0x213   :  { %v2754_v0 = vpop.f32.mrf.mxu1  ;;  %3445 = vmatmul.mubr.bf16.gmra.mxu1 %v7436_v47  ;;  %v3655_v55 = vmax.f32 %v2749_v43, 0.0  ;;  %v2751_v12 = vadd.f32 %v2750_v28, %v2558_v31  ;;  %v2562_v37 = vadd.f32 %v2561_v61, %v6307_v18  ;;  %3261 = vmatprep.mubr.bf16.mxu0 %v7437_v17  ;;  %v5580_v47 = vld [vmem:[#allocation7 + $0x88] sm:$0xff]  }
 0x214   :  { %3454 = vmatprep.mubr.bf16.mxu1 %v7438_v39  ;;  %v2563_v25 = vpop.f32.mrf.mxu0  ;;  %5055 = vmatprep.subr.bf16.mxu1 %v5579_v9  ;;  %v7451_v9 = vld [vmem:[#allocation128_spill] sm:$0xff] }
 0x215   :  { %v2756_v63 = vpop.f32.mrf.mxu1  ;;  %v6507_v24 = vpack.c.bf16 %v3655_v55, %v3651_v38  ;;  %v3656_v14 = vmax.f32 %v2751_v12, 0.0  ;;  %v2755_v27 = vadd.f32 %v2754_v0, %v2562_v37  ;;  %v2564_v34 = vadd.f32 %v2563_v25, %v6310_v16  ;;  %5056 = vmatpush3.bf16.msra.mxu1 %v5580_v47 }
 0x216   :  { %v2565_v48 = vpop.f32.mrf.mxu0 }
 0x217   :  { %v2758_v51 = vpop.f32.mrf.mxu1  ;;  %v2757_v56 = vadd.f32 %v2756_v63, %v2564_v34  ;;  %v2566_v20 = vadd.f32 %v2565_v48, %v6313_v59  ;;  %v6511_v21 = vpack.c.bf16 %v3656_v14, %v3652_v41  ;;  %v3659_v8 = vmax.f32 %v2755_v27, 0.0  ;;  %v7442_v59 = vld [vmem:[#allocation69_spill] sm:$0xff]  ;;  %v7443_v27 = vld [vmem:[#allocation70_spill] sm:$0xff] }
 0x218   :  { %v2567_v18 = vpop.f32.mrf.mxu0  ;;  %v7445_v34 = vld [vmem:[#allocation65_spill] sm:$0xff] }
 0x219   :  { %v2760_v33 = vpop.f32.mrf.mxu1  ;;  %v2759_v3 = vadd.f32 %v2758_v51, %v2566_v20  ;;  %v2568_v58 = vadd.f32 %v2567_v18, %v6318_v42  ;;  %v3660_v7 = vmax.f32 %v2757_v56, 0.0  ;;  %v721_v48 = vsub.s32 2, %v7445_v34  ;;  %v7446_v18 = vld [vmem:[#allocation72_spill] sm:$0xff] }
 0x21a   :  { %v2571_v22 = vpop.f32.mrf.mxu0  ;;  %3262 = vmatmul.mubr.bf16.gmra.mxu0 %v7439_v50 }
 0x21b   :  { %v2764_v10 = vpop.f32.mrf.mxu1  ;;  %3455 = vmatmul.mubr.bf16.gmra.mxu1 %v7440_v54  ;;  %v3663_v16 = vmax.f32 %v2759_v3, 0.0  ;;  %v2761_v62 = vadd.f32 %v2760_v33, %v2568_v58  ;;  %v2572_v57 = vadd.f32 %v2571_v22, %v6323_v44  ;;  %3271 = vmatprep.mubr.bf16.mxu0 %v7441_v60  ;;  %v7447_v33 = vld [vmem:[#allocation73_spill] sm:$0xff]  ;;  %v725_v22 = vsub.s32 3, %v7445_v34 }
 0x21c   :  { %3464 = vmatprep.mubr.bf16.mxu1 %v7442_v59  ;;  %v2573_v28 = vpop.f32.mrf.mxu0  ;;  %v7450_v59 = vld [vmem:[#allocation127_spill] sm:$0xff] }
 0x21d   :  { %v2766_v43 = vpop.f32.mrf.mxu1  ;;  %v6519_v31 = vpack.c.bf16 %v3663_v16, %v3659_v8  ;;  %v3664_v42 = vmax.f32 %v2761_v62, 0.0  ;;  %v2765_v61 = vadd.f32 %v2764_v10, %v2572_v57  ;;  %v2574_v0 = vadd.f32 %v2573_v28, %v6326_v26  ;;  %v7444_v26 = vld [vmem:[#allocation71_spill] sm:$0xff]  ;;  %v7449_v8 = vld [vmem:[#allocation126_spill] sm:$0xff] }
 0x21e   :  { %v2575_v38 = vpop.f32.mrf.mxu0 }
 0x21f   :  { %v2768_v55 = vpop.f32.mrf.mxu1  ;;  %v2767_v12 = vadd.f32 %v2766_v43, %v2574_v0  ;;  %v2576_v44 = vadd.f32 %v2575_v38, %v6329_v15  ;;  %v6523_v37 = vpack.c.bf16 %v3664_v42, %v3660_v7  ;;  %v3667_v51 = vmax.f32 %v2765_v61, 0.0  ;;  %v5583_v7 = vld [vmem:[%s7142_s2] sm:$0xf] }
 0x220   :  { %v2577_v17 = vpop.f32.mrf.mxu0  ;;  %v6540_v28 = vrot.slane %v5583_v7, %v721_v48  ;;  %v6545_v38 = vrot.slane %v5583_v7, %v725_v22 }
 0x221   :  { %v2770_v39 = vpop.f32.mrf.mxu1  ;;  %v2769_v41 = vadd.f32 %v2768_v55, %v2576_v44  ;;  %v2578_v25 = vadd.f32 %v2577_v17, %v6334_v4  ;;  %v3668_v3 = vmax.f32 %v2767_v12, 0.0  ;;  %v7452_v44 = vld [vmem:[#allocation74_spill] sm:$0xff]  ;;  %v7453_v17 = vld [vmem:[#allocation75_spill] sm:$0xff] }
 0x222   :  { %v2581_v63 = vpop.f32.mrf.mxu0  ;;  %3272 = vmatmul.mubr.bf16.gmra.mxu0 %v7443_v27  ;;  %v7455_v27 = vld [vmem:[#allocation77_spill] sm:$0xff] }
 0x223   :  { %v2774_v14 = vpop.f32.mrf.mxu1  ;;  %3465 = vmatmul.mubr.bf16.gmra.mxu1 %v7444_v26  ;;  %v3671_v56 = vmax.f32 %v2769_v41, 0.0  ;;  %v2771_v15 = vadd.f32 %v2770_v39, %v2578_v25  ;;  %v2582_v20 = vadd.f32 %v2581_v63, %v6339_v6  ;;  %3281 = vmatprep.mubr.bf16.mxu0 %v7446_v18 }
 0x224   :  { %3474 = vmatprep.mubr.bf16.mxu1 %v7447_v33  ;;  %v2583_v58 = vpop.f32.mrf.mxu0 }
 0x225   :  { %v2776_v4 = vpop.f32.mrf.mxu1  ;;  %v6533_v10 = vpack.c.bf16 %v3671_v56, %v3667_v51  ;;  %v3672_v50 = vmax.f32 %v2771_v15, 0.0  ;;  %v2775_v54 = vadd.f32 %v2774_v14, %v2582_v20  ;;  %v2584_v16 = vadd.f32 %v2583_v58, %v7449_v8  ;;  %v7454_v14 = vld [vmem:[#allocation76_spill] sm:$0xff] }
 0x226   :  { %v2585_v62 = vpop.f32.mrf.mxu0  ;;  %v5582_v8 = vld [vmem:[#allocation7 + $0x80] sm:$0xff]  }
 0x227   :  { %7448 = vst [vmem:[#allocation85_spill] sm:$0xff] %v6533_v10  ;;  %v2778_v57 = vpop.f32.mrf.mxu1  ;;  %v2777_v60 = vadd.f32 %v2776_v4, %v2584_v16  ;;  %v2586_v6 = vadd.f32 %v2585_v62, %v7450_v59  ;;  %v6542_v43 = vpack.c.bf16 %v3672_v50, %v3668_v3  ;;  %v3675_v39 = vmax.f32 %v2775_v54, 0.0  ;;  %v5581_v4 = vld [vmem:[#allocation7 + $0xc0] sm:$0xff]   ;;  %v7458_v59 = vld [vmem:[#allocation78_spill] sm:$0xff] }
 0x228   :  { %v2587_v42 = vpop.f32.mrf.mxu0  ;;  %5057 = vmatprep.subr.bf16.mxu1 %v5581_v4 }
 0x229   :  { %v2780_v61 = vpop.f32.mrf.mxu1  ;;  %v2779_v0 = vadd.f32 %v2778_v57, %v2586_v6  ;;  %v2588_v47 = vadd.f32 %v2587_v42, %v7451_v9  ;;  %v3676_v26 = vmax.f32 %v2777_v60, 0.0  ;;  %v7459_v6 = vld [vmem:[#allocation79_spill] sm:$0xff]  ;;  %5058 = vmatpush3.bf16.msra.mxu1 %v5582_v8 }
 0x22a   :  { %v2817_v55 = vpop.f32.mrf.mxu0  ;;  %3282 = vmatmul.mubr.bf16.gmra.mxu0 %v7452_v44 }
 0x22b   :  { %v3010_v12 = vpop.f32.mrf.mxu1  ;;  %3475 = vmatmul.mubr.bf16.gmra.mxu1 %v7453_v17  ;;  %v3679_v41 = vmax.f32 %v2779_v0, 0.0  ;;  %v2781_v25 = vadd.f32 %v2780_v61, %v2588_v47  ;;  %v2818_v63 = vadd.f32 %v2817_v55, %v6540_v28  ;;  %3291 = vmatprep.mubr.bf16.mxu0 %v7454_v14  ;;  %v7460_v61 = vld [vmem:[#allocation81_spill] sm:$0xff]  ;;  %v7461_v0 = vld [vmem:[#allocation82_spill] sm:$0xff] }
 0x22c   :  { %3484 = vmatprep.mubr.bf16.mxu1 %v7455_v27  ;;  %v2819_v34 = vpop.f32.mrf.mxu0 }
 0x22d   :  { %v3012_v48 = vpop.f32.mrf.mxu1  ;;  %v6552_v51 = vpack.c.bf16 %v3679_v41, %v3675_v39  ;;  %v3680_v56 = vmax.f32 %v2781_v25, 0.0  ;;  %v6554_v15 = vadd.f32 %v3010_v12, %v2818_v63  ;;  %v2820_v20 = vadd.f32 %v2819_v34, %v6545_v38 }
 0x22e   :  { %v2821_v18 = vpop.f32.mrf.mxu0 }
 0x22f   :  { %7456 = vst [vmem:[#allocation15_spill] sm:$0xff] %v6552_v51  ;;  %v3014_v33 = vpop.f32.mrf.mxu1  ;;  %v6557_v3 = vadd.f32 %v3012_v48, %v2820_v20  ;;  %v2822_v58 = vadd.f32 %v2821_v18, %v6540_v28  ;;  %v6560_v22 = vpack.c.bf16 %v3680_v56, %v3676_v26  ;;  %v7462_v48 = vld [vmem:[#allocation86_spill] sm:$0xff]  ;;  %v7463_v56 = vld [vmem:[#allocation87_spill] sm:$0xff] }
 0x230   :  { %v2823_v50 = vpop.f32.mrf.mxu0  ;;  %v7481_v51 = vld [vmem:[#allocation118_spill] sm:$0xff] }
 0x231   :  { %7457 = vst [vmem:[#allocation16_spill] sm:$0xff] %v6560_v22  ;;  %v3016_v54 = vpop.f32.mrf.mxu1  ;;  %v6562_v16 = vadd.f32 %v3014_v33, %v2822_v58  ;;  %v2824_v62 = vadd.f32 %v2823_v50, %v6545_v38  ;;  %v7464_v33 = vld [vmem:[#allocation89_spill] sm:$0xff]  ;;  %v7465_v58 = vld [vmem:[#allocation90_spill] sm:$0xff] }
 0x232   :  { %v2827_v57 = vpop.f32.mrf.mxu0  ;;  %3292 = vmatmul.mubr.bf16.gmra.mxu0 %v7458_v59 }
 0x233   :  { %v3020_v60 = vpop.f32.mrf.mxu1  ;;  %3485 = vmatmul.mubr.bf16.gmra.mxu1 %v7459_v6  ;;  %v6567_v7 = vadd.f32 %v3016_v54, %v2824_v62  ;;  %v2828_v42 = vadd.f32 %v2827_v57, %v6540_v28  ;;  %3301 = vmatprep.mubr.bf16.mxu0 %v7460_v61 }
 0x234   :  { %3494 = vmatprep.mubr.bf16.mxu1 %v7461_v0  ;;  %v2829_v9 = vpop.f32.mrf.mxu0 }
 0x235   :  { %v3022_v47 = vpop.f32.mrf.mxu1  ;;  %v6572_v55 = vadd.f32 %v3020_v60, %v2828_v42  ;;  %v2830_v12 = vadd.f32 %v2829_v9, %v6545_v38 }
 0x236   :  { %v2831_v44 = vpop.f32.mrf.mxu0 }
 0x237   :  { %v3024_v17 = vpop.f32.mrf.mxu1  ;;  %v6575_v39 = vadd.f32 %v3022_v47, %v2830_v12  ;;  %v2832_v41 = vadd.f32 %v2831_v44, %v6540_v28  ;;  %v7466_v12 = vld [vmem:[#allocation94_spill] sm:$0xff]  ;;  %v7467_v44 = vld [vmem:[#allocation95_spill] sm:$0xff] }
 0x238   :  { %v2833_v25 = vpop.f32.mrf.mxu0 }
 0x239   :  { %v3026_v63 = vpop.f32.mrf.mxu1  ;;  %v6578_v14 = vadd.f32 %v3024_v17, %v2832_v41  ;;  %v2834_v27 = vadd.f32 %v2833_v25, %v6545_v38  ;;  %v7468_v25 = vld [vmem:[#allocation97_spill] sm:$0xff] }
 0x23a   :  { %v2837_v26 = vpop.f32.mrf.mxu0  ;;  %3302 = vmatmul.mubr.bf16.gmra.mxu0 %v7462_v48 }
 0x23b   :  { %v3030_v34 = vpop.f32.mrf.mxu1  ;;  %3495 = vmatmul.mubr.bf16.gmra.mxu1 %v7463_v56  ;;  %v6583_v20 = vadd.f32 %v3026_v63, %v2834_v27  ;;  %v2838_v18 = vadd.f32 %v2837_v26, %v6540_v28  ;;  %3311 = vmatprep.mubr.bf16.mxu0 %v7464_v33  ;;  %v7469_v63 = vld [vmem:[#allocation98_spill] sm:$0xff] }
 0x23c   :  { %3504 = vmatprep.mubr.bf16.mxu1 %v7465_v58  ;;  %v2839_v4 = vpop.f32.mrf.mxu0 }
 0x23d   :  { %v3032_v50 = vpop.f32.mrf.mxu1  ;;  %v6588_v54 = vadd.f32 %v3030_v34, %v2838_v18  ;;  %v2840_v8 = vadd.f32 %v2839_v4, %v6545_v38 }
 0x23e   :  { %v2841_v62 = vpop.f32.mrf.mxu0 }
 0x23f   :  { %v3034_v57 = vpop.f32.mrf.mxu1  ;;  %v6591_v60 = vadd.f32 %v3032_v50, %v2840_v8  ;;  %v2842_v59 = vadd.f32 %v2841_v62, %v6540_v28 }
 0x240   :  { %v2843_v6 = vpop.f32.mrf.mxu0 }
 0x241   :  { %v3036_v42 = vpop.f32.mrf.mxu1  ;;  %v6594_v61 = vadd.f32 %v3034_v57, %v2842_v59  ;;  %v2844_v0 = vadd.f32 %v2843_v6, %v6545_v38  ;;  %v7470_v6 = vld [vmem:[#allocation102_spill] sm:$0xff] }
 0x242   :  { %v2847_v9 = vpop.f32.mrf.mxu0  ;;  %3312 = vmatmul.mubr.bf16.gmra.mxu0 %v7466_v12  ;;  %v7473_v12 = vld [vmem:[#allocation106_spill] sm:$0xff] }
 0x243   :  { %v3040_v47 = vpop.f32.mrf.mxu1  ;;  %3505 = vmatmul.mubr.bf16.gmra.mxu1 %v7467_v44  ;;  %v6599_v17 = vadd.f32 %v3036_v42, %v2844_v0  ;;  %v2848_v41 = vadd.f32 %v2847_v9, %v6540_v28  ;;  %3321 = vmatprep.mubr.bf16.mxu0 %v7468_v25  ;;  %v7471_v42 = vld [vmem:[#allocation103_spill] sm:$0xff] }
 0x244   :  { %3514 = vmatprep.mubr.bf16.mxu1 %v7469_v63  ;;  %v2849_v27 = vpop.f32.mrf.mxu0 }
 0x245   :  { %v3042_v26 = vpop.f32.mrf.mxu1  ;;  %v6604_v34 = vadd.f32 %v3040_v47, %v2848_v41  ;;  %v2850_v48 = vadd.f32 %v2849_v27, %v6545_v38  ;;  %v7472_v47 = vld [vmem:[#allocation105_spill] sm:$0xff] }
 0x246   :  { %v2851_v56 = vpop.f32.mrf.mxu0 }
 0x247   :  { %v3044_v18 = vpop.f32.mrf.mxu1  ;;  %v6607_v33 = vadd.f32 %v3042_v26, %v2850_v48  ;;  %v2852_v58 = vadd.f32 %v2851_v56, %v6540_v28 }
 0x248   :  { %v2853_v4 = vpop.f32.mrf.mxu0 }
 0x249   :  { %v3046_v50 = vpop.f32.mrf.mxu1  ;;  %v6610_v8 = vadd.f32 %v3044_v18, %v2852_v58  ;;  %v2854_v62 = vadd.f32 %v2853_v4, %v6545_v38 }
 0x24a   :  { %v2857_v57 = vpop.f32.mrf.mxu0  ;;  %3322 = vmatmul.mubr.bf16.gmra.mxu0 %v7470_v6 }
 0x24b   :  { %v3050_v59 = vpop.f32.mrf.mxu1  ;;  %3515 = vmatmul.mubr.bf16.gmra.mxu1 %v7471_v42  ;;  %v6615_v0 = vadd.f32 %v3046_v50, %v2854_v62  ;;  %v2858_v9 = vadd.f32 %v2857_v57, %v6540_v28  ;;  %3331 = vmatprep.mubr.bf16.mxu0 %v7472_v47  ;;  %v7474_v57 = vld [vmem:[#allocation110_spill] sm:$0xff]  ;;  %v7476_v42 = vld [vmem:[#allocation113_spill] sm:$0xff] }
 0x24c   :  { %3524 = vmatprep.mubr.bf16.mxu1 %v7473_v12  ;;  %v2859_v44 = vpop.f32.mrf.mxu0 }
 0x24d   :  { %v3052_v41 = vpop.f32.mrf.mxu1  ;;  %v6620_v25 = vadd.f32 %v3050_v59, %v2858_v9  ;;  %v2860_v63 = vadd.f32 %v2859_v44, %v6545_v38  ;;  %v7475_v59 = vld [vmem:[#allocation111_spill] sm:$0xff]  ;;  %v7477_v9 = vld [vmem:[#allocation114_spill] sm:$0xff] }
 0x24e   :  { %v2861_v27 = vpop.f32.mrf.mxu0 }
 0x24f   :  { %v3054_v26 = vpop.f32.mrf.mxu1  ;;  %v6623_v48 = vadd.f32 %v3052_v41, %v2860_v63  ;;  %v2862_v56 = vadd.f32 %v2861_v27, %v6540_v28 }
 0x250   :  { %v6626_v18 = vpop.f32.mrf.mxu0 }
 0x251   :  { %v6628_v58 = vpop.f32.mrf.mxu1  ;;  %v6630_v4 = vadd.f32 %v3054_v26, %v2862_v56 }
 0x252   :  { %v2867_v50 = vpop.f32.mrf.mxu0  ;;  %3332 = vmatmul.mubr.bf16.gmra.mxu0 %v7474_v57 }
 0x253   :  { %v3060_v62 = vpop.f32.mrf.mxu1  ;;  %3525 = vmatmul.mubr.bf16.gmra.mxu1 %v7475_v59  ;;  %v2868_v6 = vadd.f32 %v2867_v50, %v6540_v28  ;;  %3341 = vmatprep.mubr.bf16.mxu0 %v7476_v42 }
 0x254   :  { %3534 = vmatprep.mubr.bf16.mxu1 %v7477_v9  ;;  %v2869_v47 = vpop.f32.mrf.mxu0 }
 0x255   :  { %v3062_v12 = vpop.f32.mrf.mxu1  ;;  %v6637_v44 = vadd.f32 %v3060_v62, %v2868_v6  ;;  %v2870_v41 = vadd.f32 %v2869_v47, %v6545_v38  ;;  %v7482_v62 = vld [vmem:[#allocation119_spill] sm:$0xff]  ;;  %v7483_v47 = vld [vmem:[#allocation120_spill] sm:$0xff] }
 0x256   :  { %v2871_v63 = vpop.f32.mrf.mxu0 }
 0x257   :  { %v3064_v27 = vpop.f32.mrf.mxu1  ;;  %v6640_v26 = vadd.f32 %v3062_v12, %v2870_v41  ;;  %v2872_v56 = vadd.f32 %v2871_v63, %v6540_v28  ;;  %v7484_v12 = vld [vmem:[#allocation121_spill] sm:$0xff] }
 0x258   :  { %v6643_v57 = vpop.f32.mrf.mxu0 }
 0x259   :  { %7478 = vst [vmem:[#allocation88_spill] sm:$0xff] %v6640_v26  ;;  %v6645_v59 = vpop.f32.mrf.mxu1  ;;  %v6647_v50 = vadd.f32 %v3064_v27, %v2872_v56  ;;  %v7490_v26 = vld [vmem:[#allocation122_spill] sm:$0xff] }
 0x25a   :  { %7479 = vst [vmem:[#allocation91_spill] sm:$0xff] %v6645_v59  ;;  %v2877_v42 = vpop.f32.mrf.mxu0  ;;  %3342 = vmatmul.mubr.bf16.gmra.mxu0 %v7481_v51 }
 0x25b   :  { %7480 = vst [vmem:[#allocation92_spill] sm:$0xff] %v6647_v50  ;;  %v3070_v9 = vpop.f32.mrf.mxu1  ;;  %3535 = vmatmul.mubr.bf16.gmra.mxu1 %v7482_v62  ;;  %v2878_v6 = vadd.f32 %v2877_v42, %v6540_v28  ;;  %3351 = vmatprep.mubr.bf16.mxu0 %v7483_v47 }
 0x25c   :  { %3544 = vmatprep.mubr.bf16.mxu1 %v7484_v12  ;;  %v2879_v41 = vpop.f32.mrf.mxu0 }
 0x25d   :  { %v3072_v63 = vpop.f32.mrf.mxu1  ;;  %v6654_v22 = vadd.f32 %v3070_v9, %v2878_v6  ;;  %v2880_v10 = vadd.f32 %v2879_v41, %v6545_v38  ;;  %v7491_v9 = vld [vmem:[#allocation123_spill] sm:$0xff]  ;;  %v7492_v41 = vld [vmem:[#allocation80_spill] sm:$0xff] }
 0x25e   :  { %v2881_v27 = vpop.f32.mrf.mxu0 }
 0x25f   :  { %7485 = vst [vmem:[#allocation17_spill] sm:$0xff] %v6654_v22  ;;  %v3074_v56 = vpop.f32.mrf.mxu1  ;;  %v6657_v50 = vadd.f32 %v3072_v63, %v2880_v10  ;;  %v2882_v51 = vadd.f32 %v2881_v27, %v6540_v28 }
 0x260   :  { %v6660_v59 = vpop.f32.mrf.mxu0 }
 0x261   :  { %7486 = vst [vmem:[#allocation18_spill] sm:$0xff] %v6657_v50  ;;  %7487 = vst [vmem:[#allocation93_spill] sm:$0xff] %v6660_v59  ;;  %v6662_v62 = vpop.f32.mrf.mxu1  ;;  %v6664_v42 = vadd.f32 %v3074_v56, %v2882_v51  ;;  %v7498_v59 = vld [vmem:[#allocation12_spill] sm:$0xff] }
 0x262   :  { %7488 = vst [vmem:[#allocation19_spill] sm:$0xff] %v6662_v62  ;;  %v2887_v47 = vpop.f32.mrf.mxu0  ;;  %3352 = vmatmul.mubr.bf16.gmra.mxu0 %v7490_v26 }
 0x263   :  { %7489 = vst [vmem:[#allocation20_spill] sm:$0xff] %v6664_v42  ;;  %v3080_v12 = vpop.f32.mrf.mxu1  ;;  %3545 = vmatmul.mubr.bf16.gmra.mxu1 %v7491_v9  ;;  %v2888_v6 = vadd.f32 %v2887_v47, %v6540_v28  ;;  %4042 = vmatprep.mubr.bf16.mxu0 %v7492_v41 }
 0x264   :  { %v2889_v10 = vpop.f32.mrf.mxu0 }
 0x265   :  { %v3082_v63 = vpop.f32.mrf.mxu1  ;;  %v6670_v50 = vadd.f32 %v3080_v12, %v2888_v6  ;;  %v2890_v27 = vadd.f32 %v2889_v10, %v6545_v38  ;;  %v7499_v6 = vld [vmem:[#allocation84_spill] sm:$0xff] }
 0x266   :  { %v2891_v22 = vpop.f32.mrf.mxu0 }
 0x267   :  { %7493 = vst [vmem:[#allocation96_spill] sm:$0xff] %v6670_v50  ;;  %v3084_v62 = vpop.f32.mrf.mxu1  ;;  %v6673_v56 = vadd.f32 %v3082_v63, %v2890_v27  ;;  %v2892_v51 = vadd.f32 %v2891_v22, %v6540_v28 }
 0x268   :  { %v6676_v42 = vpop.f32.mrf.mxu0 }
 0x269   :  { %7494 = vst [vmem:[#allocation99_spill] sm:$0xff] %v6673_v56  ;;  %7495 = vst [vmem:[#allocation100_spill] sm:$0xff] %v6676_v42  ;;  %v6678_v26 = vpop.f32.mrf.mxu1  ;;  %v6680_v9 = vadd.f32 %v3084_v62, %v2892_v51 }
 0x26a   :  { %7496 = vst [vmem:[#allocation21_spill] sm:$0xff] %v6678_v26  ;;  %v2897_v47 = vpop.f32.mrf.mxu0  ;;  %4043 = vmatmul.mubr.bf16.vlgmr.msra.gmra.mxu0 %v7498_v59  ;;  %v7505_v26 = vld [vmem:[#allocation83_spill] sm:$0xff] }
 0x26b   :  { %7497 = vst [vmem:[#allocation22_spill] sm:$0xff] %v6680_v9  ;;  %v3090_v41 = vpop.f32.mrf.mxu1  ;;  %v2898_v12 = vadd.f32 %v2897_v47, %v6540_v28  ;;  %4050 = vmatprep.mubr.bf16.mxu0 %v7499_v6 }
 0x26c   :  { %v2899_v10 = vpop.f32.mrf.mxu0 }
 0x26d   :  { %v3092_v50 = vpop.f32.mrf.mxu1  ;;  %v6685_v63 = vadd.f32 %v3090_v41, %v2898_v12  ;;  %v2900_v22 = vadd.f32 %v2899_v10, %v6545_v38  ;;  %v7506_v12 = vld [vmem:[#allocation14_spill] sm:$0xff] }
 0x26e   :  { %v2901_v27 = vpop.f32.mrf.mxu0 }
 0x26f   :  { %7500 = vst [vmem:[#allocation101_spill] sm:$0xff] %v6685_v63  ;;  %v3094_v56 = vpop.f32.mrf.mxu1  ;;  %v6688_v42 = vadd.f32 %v3092_v50, %v2900_v22  ;;  %v2902_v62 = vadd.f32 %v2901_v27, %v6540_v28 }
 0x270   :  { %v6691_v51 = vpop.f32.mrf.mxu0 }
 0x271   :  { %7501 = vst [vmem:[#allocation23_spill] sm:$0xff] %v6688_v42  ;;  %7502 = vst [vmem:[#allocation24_spill] sm:$0xff] %v6691_v51  ;;  %v6693_v9 = vpop.f32.mrf.mxu1  ;;  %v6695_v59 = vadd.f32 %v3094_v56, %v2902_v62 }
 0x272   :  { %7503 = vst [vmem:[#allocation104_spill] sm:$0xff] %v6693_v9  ;;  %v2907_v47 = vpop.f32.mrf.mxu0  ;;  %4051 = vmatmul.mubr.bf16.gmra.mxu0 %v7505_v26  ;;  %v7510_v9 = vld [vmem:[#allocation13_spill] sm:$0xff] }
 0x273   :  { %7504 = vst [vmem:[#allocation107_spill] sm:$0xff] %v6695_v59  ;;  %v3100_v6 = vpop.f32.mrf.mxu1  ;;  %v2908_v41 = vadd.f32 %v2907_v47, %v6540_v28  ;;  %4058 = vmatprep.mubr.bf16.mxu0 %v7506_v12 }
 0x274   :  { %v2909_v10 = vpop.f32.mrf.mxu0 }
 0x275   :  { %v3102_v63 = vpop.f32.mrf.mxu1  ;;  %v6700_v50 = vadd.f32 %v3100_v6, %v2908_v41  ;;  %v2910_v22 = vadd.f32 %v2909_v10, %v6545_v38 }
 0x276   :  { %v2911_v27 = vpop.f32.mrf.mxu0 }
 0x277   :  { %7507 = vst [vmem:[#allocation108_spill] sm:$0xff] %v6700_v50  ;;  %v3104_v42 = vpop.f32.mrf.mxu1  ;;  %v6703_v51 = vadd.f32 %v3102_v63, %v2910_v22  ;;  %v2912_v56 = vadd.f32 %v2911_v27, %v6540_v28 }
 0x278   :  { %v6706_v62 = vpop.f32.mrf.mxu0 }
 0x279   :  { %7508 = vst [vmem:[#allocation25_spill] sm:$0xff] %v6703_v51  ;;  %v6708_v59 = vpop.f32.mrf.mxu1  ;;  %v6710_v26 = vadd.f32 %v3104_v42, %v2912_v56 }
 0x27a   :  { %v2917_v47 = vpop.f32.mrf.mxu0  ;;  %4059 = vmatmul.mubr.bf16.gmra.mxu0 %v7510_v9 }
 0x27b   :  { %7509 = vst [vmem:[#allocation26_spill] sm:$0xff] %v6710_v26  ;;  %v3110_v12 = vpop.f32.mrf.mxu1  ;;  %v2918_v6 = vadd.f32 %v2917_v47, %v6540_v28  ;;  %4066 = vmatprep.mubr.bf16.mxu0 %v6403_v45 }
 0x27c   :  { %v2919_v41 = vpop.f32.mrf.mxu0 }
 0x27d   :  { %v3112_v10 = vpop.f32.mrf.mxu1  ;;  %v6715_v63 = vadd.f32 %v3110_v12, %v2918_v6  ;;  %v2920_v22 = vadd.f32 %v2919_v41, %v6545_v38 }
 0x27e   :  { %v2921_v27 = vpop.f32.mrf.mxu0 }
 0x27f   :  { %7511 = vst [vmem:[#allocation109_spill] sm:$0xff] %v6715_v63  ;;  %v3114_v51 = vpop.f32.mrf.mxu1  ;;  %v6718_v50 = vadd.f32 %v3112_v10, %v2920_v22  ;;  %v2922_v42 = vadd.f32 %v2921_v27, %v6540_v28 }
 0x280   :  { %v6721_v56 = vpop.f32.mrf.mxu0 }
 0x281   :  { %7512 = vst [vmem:[#allocation27_spill] sm:$0xff] %v6718_v50  ;;  %v6723_v26 = vpop.f32.mrf.mxu1  ;;  %v6725_v9 = vadd.f32 %v3114_v51, %v2922_v42 }
 0x282   :  { %v2927_v47 = vpop.f32.mrf.mxu0  ;;  %4067 = vmatmul.mubr.bf16.gmra.mxu0 %v6399_v32 }
 0x283   :  { %7513 = vst [vmem:[#allocation28_spill] sm:$0xff] %v6725_v9  ;;  %v3120_v45 = vpop.f32.mrf.mxu1  ;;  %v2928_v12 = vadd.f32 %v2927_v47, %v6540_v28  ;;  %4074 = vmatprep.mubr.bf16.mxu0 %v6415_v2 }
 0x284   :  { %v2929_v6 = vpop.f32.mrf.mxu0 }
 0x285   :  { %v3122_v41 = vpop.f32.mrf.mxu1  ;;  %v6730_v10 = vadd.f32 %v3120_v45, %v2928_v12  ;;  %v2930_v22 = vadd.f32 %v2929_v6, %v6545_v38 }
 0x286   :  { %v2931_v27 = vpop.f32.mrf.mxu0 }
 0x287   :  { %7514 = vst [vmem:[#allocation112_spill] sm:$0xff] %v6730_v10  ;;  %v3124_v50 = vpop.f32.mrf.mxu1  ;;  %v6733_v63 = vadd.f32 %v3122_v41, %v2930_v22  ;;  %v2932_v51 = vadd.f32 %v2931_v27, %v6540_v28 }
 0x288   :  { %v6736_v42 = vpop.f32.mrf.mxu0 }
 0x289   :  { %7515 = vst [vmem:[#allocation115_spill] sm:$0xff] %v6733_v63  ;;  %v6738_v9 = vpop.f32.mrf.mxu1  ;;  %v6740_v32 = vadd.f32 %v3124_v50, %v2932_v51 }
 0x28a   :  { %v2937_v47 = vpop.f32.mrf.mxu0  ;;  %4075 = vmatmul.mubr.bf16.gmra.mxu0 %v6411_v46 }
 0x28b   :  { %7516 = vst [vmem:[#allocation116_spill] sm:$0xff] %v6740_v32  ;;  %v3130_v2 = vpop.f32.mrf.mxu1  ;;  %v2938_v45 = vadd.f32 %v2937_v47, %v6540_v28  ;;  %4082 = vmatprep.mubr.bf16.mxu0 %v6427_v13 }
 0x28c   :  { %v2939_v12 = vpop.f32.mrf.mxu0 }
 0x28d   :  { %v3132_v6 = vpop.f32.mrf.mxu1  ;;  %v6745_v41 = vadd.f32 %v3130_v2, %v2938_v45  ;;  %v2940_v22 = vadd.f32 %v2939_v12, %v6545_v38 }
 0x28e   :  { %v2941_v27 = vpop.f32.mrf.mxu0 }
 0x28f   :  { %7517 = vst [vmem:[#allocation29_spill] sm:$0xff] %v6745_v41  ;;  %v3134_v63 = vpop.f32.mrf.mxu1  ;;  %v6748_v10 = vadd.f32 %v3132_v6, %v2940_v22  ;;  %v2942_v50 = vadd.f32 %v2941_v27, %v6540_v28 }
 0x290   :  { %v6751_v51 = vpop.f32.mrf.mxu0 }
 0x291   :  { %7518 = vst [vmem:[#allocation30_spill] sm:$0xff] %v6748_v10  ;;  %v6753_v32 = vpop.f32.mrf.mxu1  ;;  %v6755_v46 = vadd.f32 %v3134_v63, %v2942_v50 }
 0x292   :  { %v2947_v47 = vpop.f32.mrf.mxu0  ;;  %4083 = vmatmul.mubr.bf16.gmra.mxu0 %v6423_v19 }
 0x293   :  { %7519 = vst [vmem:[#allocation117_spill] sm:$0xff] %v6755_v46  ;;  %v3140_v13 = vpop.f32.mrf.mxu1  ;;  %v2948_v2 = vadd.f32 %v2947_v47, %v6540_v28  ;;  %4090 = vmatprep.mubr.bf16.mxu0 %v6439_v49 }
 0x294   :  { %v2949_v45 = vpop.f32.mrf.mxu0 }
 0x295   :  { %v3142_v12 = vpop.f32.mrf.mxu1  ;;  %v6760_v6 = vadd.f32 %v3140_v13, %v2948_v2  ;;  %v2950_v22 = vadd.f32 %v2949_v45, %v6545_v38 }
 0x296   :  { %v2951_v27 = vpop.f32.mrf.mxu0 }
 0x297   :  { %7520 = vst [vmem:[#allocation31_spill] sm:$0xff] %v6760_v6  ;;  %v3144_v10 = vpop.f32.mrf.mxu1  ;;  %v6763_v41 = vadd.f32 %v3142_v12, %v2950_v22  ;;  %v2952_v63 = vadd.f32 %v2951_v27, %v6540_v28 }
 0x298   :  { %v6766_v50 = vpop.f32.mrf.mxu0 }
 0x299   :  { %7521 = vst [vmem:[#allocation32_spill] sm:$0xff] %v6763_v41  ;;  %v6768_v46 = vpop.f32.mrf.mxu1  ;;  %v6770_v19 = vadd.f32 %v3144_v10, %v2952_v63 }
 0x29a   :  { %v2957_v47 = vpop.f32.mrf.mxu0  ;;  %4091 = vmatmul.mubr.bf16.gmra.mxu0 %v6435_v30 }
 0x29b   :  { %7522 = vst [vmem:[#allocation33_spill] sm:$0xff] %v6770_v19  ;;  %v3150_v49 = vpop.f32.mrf.mxu1  ;;  %v2958_v13 = vadd.f32 %v2957_v47, %v6540_v28  ;;  %4098 = vmatprep.mubr.bf16.mxu0 %v6451_v29 }
 0x29c   :  { %v2959_v2 = vpop.f32.mrf.mxu0 }
 0x29d   :  { %v3152_v45 = vpop.f32.mrf.mxu1  ;;  %v6775_v12 = vadd.f32 %v3150_v49, %v2958_v13  ;;  %v2960_v22 = vadd.f32 %v2959_v2, %v6545_v38 }
 0x29e   :  { %v2961_v27 = vpop.f32.mrf.mxu0 }
 0x29f   :  { %7523 = vst [vmem:[#allocation34_spill] sm:$0xff] %v6775_v12  ;;  %v3154_v41 = vpop.f32.mrf.mxu1  ;;  %v6778_v6 = vadd.f32 %v3152_v45, %v2960_v22  ;;  %v2962_v10 = vadd.f32 %v2961_v27, %v6540_v28 }
 0x2a0   :  { %v6781_v63 = vpop.f32.mrf.mxu0 }
 0x2a1   :  { %7524 = vst [vmem:[#allocation35_spill] sm:$0xff] %v6778_v6  ;;  %v6783_v19 = vpop.f32.mrf.mxu1  ;;  %v6785_v30 = vadd.f32 %v3154_v41, %v2962_v10 }
 0x2a2   :  { %v2967_v47 = vpop.f32.mrf.mxu0  ;;  %4099 = vmatmul.mubr.bf16.gmra.mxu0 %v6447_v1 }
 0x2a3   :  { %7525 = vst [vmem:[#allocation36_spill] sm:$0xff] %v6785_v30  ;;  %v3160_v29 = vpop.f32.mrf.mxu1  ;;  %v2968_v49 = vadd.f32 %v2967_v47, %v6540_v28  ;;  %4106 = vmatprep.mubr.bf16.mxu0 %v6463_v35 }
 0x2a4   :  { %v2969_v13 = vpop.f32.mrf.mxu0 }
 0x2a5   :  { %v3162_v2 = vpop.f32.mrf.mxu1  ;;  %v6790_v45 = vadd.f32 %v3160_v29, %v2968_v49  ;;  %v2970_v22 = vadd.f32 %v2969_v13, %v6545_v38 }
 0x2a6   :  { %v2971_v27 = vpop.f32.mrf.mxu0 }
 0x2a7   :  { %7526 = vst [vmem:[#allocation37_spill] sm:$0xff] %v6790_v45  ;;  %v3164_v6 = vpop.f32.mrf.mxu1  ;;  %v6793_v12 = vadd.f32 %v3162_v2, %v2970_v22  ;;  %v2972_v41 = vadd.f32 %v2971_v27, %v6540_v28 }
 0x2a8   :  { %v6796_v10 = vpop.f32.mrf.mxu0 }
 0x2a9   :  { %7527 = vst [vmem:[#allocation38_spill] sm:$0xff] %v6793_v12  ;;  %7528 = vst [vmem:[#allocation39_spill] sm:$0xff] %v6796_v10  ;;  %v6798_v30 = vpop.f32.mrf.mxu1  ;;  %v6800_v1 = vadd.f32 %v3164_v6, %v2972_v41 }
 0x2aa   :  { %7529 = vst [vmem:[#allocation40_spill] sm:$0xff] %v6798_v30  ;;  %v3203_v47 = vpop.f32.mrf.mxu0  ;;  %4107 = vmatmul.mubr.bf16.gmra.mxu0 %v6459_v52 }
 0x2ab   :  { %7530 = vst [vmem:[#allocation124_spill] sm:$0xff] %v6800_v1  ;;  %v3396_v35 = vpop.f32.mrf.mxu1  ;;  %v3204_v29 = vadd.f32 %v3203_v47, %v6554_v15  ;;  %4114 = vmatprep.mubr.bf16.mxu0 %v6475_v5 }
 0x2ac   :  { %v3205_v49 = vpop.f32.mrf.mxu0 }
 0x2ad   :  { %v3398_v13 = vpop.f32.mrf.mxu1  ;;  %v3206_v2 = vadd.f32 %v3205_v49, %v6557_v3  ;;  %v3397_v27 = vadd.f32 %v3396_v35, %v3204_v29 }
 0x2ae   :  { %v3207_v22 = vpop.f32.mrf.mxu0 }
 0x2af   :  { %v3400_v28 = vpop.f32.mrf.mxu1  ;;  %v3208_v12 = vadd.f32 %v3207_v22, %v6562_v16  ;;  %v3399_v41 = vadd.f32 %v3398_v13, %v3206_v2  ;;  %v3557_v5 = vmax.f32 %v3397_v27, 0.0 }
 0x2b0   :  { %v3209_v30 = vpop.f32.mrf.mxu0 }
 0x2b1   :  { %v3402_v6 = vpop.f32.mrf.mxu1  ;;  %v3401_v1 = vadd.f32 %v3400_v28, %v3208_v12  ;;  %v3210_v45 = vadd.f32 %v3209_v30, %v6567_v7  ;;  %v3558_v16 = vmax.f32 %v3399_v41, 0.0 }
 0x2b2   :  { %v3213_v52 = vpop.f32.mrf.mxu0  ;;  %4115 = vmatmul.mubr.bf16.gmra.mxu0 %v6471_v53 }
 0x2b3   :  { %v3406_v10 = vpop.f32.mrf.mxu1  ;;  %v3561_v15 = vmax.f32 %v3401_v1, 0.0  ;;  %v3403_v47 = vadd.f32 %v3402_v6, %v3210_v45  ;;  %v3214_v3 = vadd.f32 %v3213_v52, %v6572_v55  ;;  %4122 = vmatprep.mubr.bf16.mxu0 %v6487_v23 }
 0x2b4   :  { %v3215_v35 = vpop.f32.mrf.mxu0 }
 0x2b5   :  { %v3408_v29 = vpop.f32.mrf.mxu1  ;;  %v3685_v49 = vpack.c.bf16 %v3561_v15, %v3557_v5  ;;  %v3562_v22 = vmax.f32 %v3403_v47, 0.0  ;;  %v3216_v12 = vadd.f32 %v3215_v35, %v6575_v39  ;;  %v3407_v30 = vadd.f32 %v3406_v10, %v3214_v3 }
 0x2b6   :  { %v3217_v13 = vpop.f32.mrf.mxu0 }
 0x2b7   :  { %v3410_v7 = vpop.f32.mrf.mxu1  ;;  %v3218_v2 = vadd.f32 %v3217_v13, %v6578_v14  ;;  %v3686_v53 = vpack.c.bf16 %v3562_v22, %v3558_v16  ;;  %v3409_v45 = vadd.f32 %v3408_v29, %v3216_v12  ;;  %v3565_v41 = vmax.f32 %v3407_v30, 0.0 }
 0x2b8   :  { %v3219_v28 = vpop.f32.mrf.mxu0 }
 0x2b9   :  { %v3412_v1 = vpop.f32.mrf.mxu1  ;;  %v3411_v27 = vadd.f32 %v3410_v7, %v3218_v2  ;;  %v3220_v55 = vadd.f32 %v3219_v28, %v6583_v20  ;;  %4203 = vmatprep.mubr.bf16.mxu1 %v3686_v53  ;;  %v3566_v15 = vmax.f32 %v3409_v45, 0.0 }
 0x2ba   :  { %v3223_v23 = vpop.f32.mrf.mxu0  ;;  %4123 = vmatmul.mubr.bf16.gmra.mxu0 %v6483_v11  ;;  %4204 = vmatmul.mubr.bf16.vlgmr.msra.gmra.mxu1 %v3685_v49 }
 0x2bb   :  { %v3416_v6 = vpop.f32.mrf.mxu1  ;;  %v3569_v39 = vmax.f32 %v3411_v27, 0.0  ;;  %v3413_v52 = vadd.f32 %v3412_v1, %v3220_v55  ;;  %v3224_v10 = vadd.f32 %v3223_v23, %v6588_v54  ;;  %4130 = vmatprep.mubr.bf16.mxu0 %v6499_v36 }
 0x2bc   :  { %v3225_v14 = vpop.f32.mrf.mxu0 }
 0x2bd   :  { %v3418_v5 = vpop.f32.mrf.mxu1  ;;  %v3689_v47 = vpack.c.bf16 %v3569_v39, %v3565_v41  ;;  %v3570_v3 = vmax.f32 %v3413_v52, 0.0  ;;  %v3226_v20 = vadd.f32 %v3225_v14, %v6591_v60  ;;  %v3417_v16 = vadd.f32 %v3416_v6, %v3224_v10 }
 0x2be   :  { %v3227_v35 = vpop.f32.mrf.mxu0 }
 0x2bf   :  { %v3420_v29 = vpop.f32.mrf.mxu1  ;;  %v3228_v11 = vadd.f32 %v3227_v35, %v6594_v61  ;;  %v3690_v49 = vpack.c.bf16 %v3570_v3, %v3566_v15  ;;  %v3419_v13 = vadd.f32 %v3418_v5, %v3226_v20  ;;  %v3573_v2 = vmax.f32 %v3417_v16, 0.0 }
 0x2c0   :  { %v3229_v22 = vpop.f32.mrf.mxu0 }
 0x2c1   :  { %v3422_v12 = vpop.f32.mrf.mxu1  ;;  %v3421_v7 = vadd.f32 %v3420_v29, %v3228_v11  ;;  %v3230_v54 = vadd.f32 %v3229_v22, %v6599_v17  ;;  %4211 = vmatprep.mubr.bf16.mxu1 %v3690_v49  ;;  %v3574_v45 = vmax.f32 %v3419_v13, 0.0 }
 0x2c2   :  { %v3233_v36 = vpop.f32.mrf.mxu0  ;;  %4131 = vmatmul.mubr.bf16.gmra.mxu0 %v6495_v40  ;;  %4212 = vmatmul.mubr.bf16.gmra.mxu1 %v3689_v47 }
 0x2c3   :  { %v3426_v30 = vpop.f32.mrf.mxu1  ;;  %v3577_v60 = vmax.f32 %v3421_v7, 0.0  ;;  %v3423_v53 = vadd.f32 %v3422_v12, %v3230_v54  ;;  %v3234_v28 = vadd.f32 %v3233_v36, %v6604_v34  ;;  %4138 = vmatprep.mubr.bf16.mxu0 %v6511_v21  ;;  %v2864_v21 = vadd.f32 %v6626_v18, %v6545_v38 }
 0x2c4   :  { %v3235_v61 = vpop.f32.mrf.mxu0 }
 0x2c5   :  { %v3428_v1 = vpop.f32.mrf.mxu1  ;;  %v3693_v27 = vpack.c.bf16 %v3577_v60, %v3573_v2  ;;  %v3578_v55 = vmax.f32 %v3423_v53, 0.0  ;;  %v3236_v17 = vadd.f32 %v3235_v61, %v6607_v33  ;;  %v3427_v41 = vadd.f32 %v3426_v30, %v3234_v28 }
 0x2c6   :  { %v3237_v23 = vpop.f32.mrf.mxu0  ;;  %v3057_v12 = vadd.f32 %v6628_v58, %v2864_v21  ;;  %v2874_v2 = vadd.f32 %v6643_v57, %v6545_v38 }
 0x2c7   :  { %v3430_v6 = vpop.f32.mrf.mxu1  ;;  %v3238_v40 = vadd.f32 %v3237_v23, %v6610_v8  ;;  %v3694_v39 = vpack.c.bf16 %v3578_v55, %v3574_v45  ;;  %v3429_v14 = vadd.f32 %v3428_v1, %v3236_v17  ;;  %v3581_v33 = vmax.f32 %v3427_v41, 0.0  ;;  %v7531_v17 = vld [vmem:[#allocation88_spill] sm:$0xff] }
 0x2c8   :  { %v3239_v52 = vpop.f32.mrf.mxu0  ;;  %v5678_v1 = vmov 0  }
 0x2c9   :  { %v3432_v10 = vpop.f32.mrf.mxu1  ;;  %v3431_v5 = vadd.f32 %v3430_v6, %v3238_v40  ;;  %v3240_v34 = vadd.f32 %v3239_v52, %v6615_v0  ;;  %4219 = vmatprep.mubr.bf16.mxu1 %v3694_v39  ;;  %v3582_v16 = vmax.f32 %v3429_v14, 0.0  ;;  %5165 = vset.pattern.permute.xlu0 %v5678_v1  ;;  %v4381_v40 = vld [vmem:[%s7145_s5 + $0x8] sm:$0xff] }
 0x2ca   :  { %v3243_v15 = vpop.f32.mrf.mxu0  ;;  %4139 = vmatmul.mubr.bf16.gmra.mxu0 %v6507_v24  ;;  %4220 = vmatmul.mubr.bf16.gmra.mxu1 %v3693_v27 }
 0x2cb   :  { %v3436_v47 = vpop.f32.mrf.mxu1  ;;  %v3585_v3 = vmax.f32 %v3431_v5, 0.0  ;;  %v3433_v20 = vadd.f32 %v3432_v10, %v3240_v34  ;;  %v3244_v8 = vadd.f32 %v3243_v15, %v6620_v25  ;;  %4146 = vmatprep.mubr.bf16.mxu0 %v6523_v37  ;;  %5166 = vset.pattern.permute.xlu1 %v5678_v1  ;;  %v7533_v10 = vld [vmem:[#allocation92_spill] sm:$0xff] }
 0x2cc   :  { %v3245_v35 = vpop.f32.mrf.mxu0 }
 0x2cd   :  { %v3438_v29 = vpop.f32.mrf.mxu1  ;;  %v3697_v0 = vpack.c.bf16 %v3585_v3, %v3581_v33  ;;  %v3586_v11 = vmax.f32 %v3433_v20, 0.0  ;;  %v3246_v49 = vadd.f32 %v3245_v35, %v6623_v48  ;;  %v3437_v24 = vadd.f32 %v3436_v47, %v3244_v8  ;;  %v4380_v48 = vld [vmem:[%s7145_s5] sm:$0xff]  ;;  %v7534_v33 = vld [vmem:[#allocation93_spill] sm:$0xff] }
 0x2ce   :  { %v3247_v18 = vpop.f32.mrf.mxu0  ;;  %4430 = vperm.xlu0 %5165, %v4380_v48   ;;  %v2884_v3 = vadd.f32 %v7534_v33, %v6545_v38  ;;  %v7535_v35 = vld [vmem:[#allocation85_spill] sm:$0xff] }
 0x2cf   :  { %v3440_v22 = vpop.f32.mrf.mxu1  ;;  %v3248_v13 = vadd.f32 %v3247_v18, %v6630_v4  ;;  %v3698_v7 = vpack.c.bf16 %v3586_v11, %v3582_v16  ;;  %v3439_v25 = vadd.f32 %v3438_v29, %v3246_v49  ;;  %v3589_v58 = vmax.f32 %v3437_v24, 0.0  ;;  %v4384_v29 = vld [vmem:[%s7145_s5 + $0x20] sm:$0xff]  ;;  %v7536_v49 = vld [vmem:[#allocation17_spill] sm:$0xff] }
 0x2d0   :  { %v3249_v54 = vpop.f32.mrf.mxu0 }
 0x2d1   :  { %v3442_v36 = vpop.f32.mrf.mxu1  ;;  %v3441_v30 = vadd.f32 %v3440_v22, %v3248_v13  ;;  %v3250_v37 = vadd.f32 %v3249_v54, %v3057_v12  ;;  %4227 = vmatprep.mubr.bf16.mxu1 %v3698_v7  ;;  %v3590_v27 = vmax.f32 %v3439_v25, 0.0  ;;  %v7537_v22 = vld [vmem:[#allocation16_spill] sm:$0xff] }
 0x2d2   :  { %v3253_v60 = vpop.f32.mrf.mxu0  ;;  %4147 = vmatmul.mubr.bf16.gmra.mxu0 %v6519_v31  ;;  %4228 = vmatmul.mubr.bf16.gmra.mxu1 %v3697_v0 }
 0x2d3   :  { %v3446_v53 = vpop.f32.mrf.mxu1  ;;  %v3593_v4 = vmax.f32 %v3441_v30, 0.0  ;;  %v3443_v28 = vadd.f32 %v3442_v36, %v3250_v37  ;;  %v3254_v61 = vadd.f32 %v3253_v60, %v6637_v44  ;;  %4154 = vmatprep.mubr.bf16.mxu0 %v6542_v43  ;;  %v7532_v44 = vld [vmem:[#allocation91_spill] sm:$0xff]  ;;  %4435 = vperm.xlu0 %5165, %v4381_v40   ;;  %v7538_v36 = vld [vmem:[#allocation18_spill] sm:$0xff] }
 0x2d4   :  { %v3255_v45 = vpop.f32.mrf.mxu0  ;;  %v3067_v39 = vadd.f32 %v7532_v44, %v2874_v2  ;;  %v4386_v2 = vld [vmem:[%s7145_s5 + $0x30] sm:$0xff]  ;;  %v7539_v60 = vld [vmem:[#allocation19_spill] sm:$0xff] }
 0x2d5   :  { %v3448_v57 = vpop.f32.mrf.mxu1  ;;  %v3701_v31 = vpack.c.bf16 %v3593_v4, %v3589_v58  ;;  %v3594_v55 = vmax.f32 %v3443_v28, 0.0  ;;  %v3256_v23 = vadd.f32 %v3255_v45, %v7531_v17  ;;  %v3447_v52 = vadd.f32 %v3446_v53, %v3254_v61  ;;  %v7540_v4 = vld [vmem:[#allocation20_spill] sm:$0xff] }
 0x2d6   :  { %v3257_v6 = vpop.f32.mrf.mxu0  ;;  %v3077_v53 = vadd.f32 %v7539_v60, %v2884_v3  ;;  %v7548_v60 = vld [vmem:[#allocation101_spill] sm:$0xff] }
 0x2d7   :  { %v3450_v41 = vpop.f32.mrf.mxu1  ;;  %v3702_v43 = vpack.c.bf16 %v3594_v55, %v3590_v27  ;;  %v3258_v14 = vadd.f32 %v3257_v6, %v7533_v10  ;;  %v3449_v21 = vadd.f32 %v3448_v57, %v3256_v23  ;;  %v3597_v16 = vmax.f32 %v3447_v52, 0.0  ;;  %4450 = vperm.xlu0 %5165, %v4384_v29   ;;  %v7542_v6 = vld [vmem:[#allocation15_spill] sm:$0xff] }
 0x2d8   :  { %v3259_v5 = vpop.f32.mrf.mxu0 }
 0x2d9   :  { %v3452_v34 = vpop.f32.mrf.mxu1  ;;  %v3451_v15 = vadd.f32 %v3450_v41, %v3258_v14  ;;  %v3260_v47 = vadd.f32 %v3259_v5, %v3067_v39  ;;  %4235 = vmatprep.mubr.bf16.mxu1 %v3702_v43  ;;  %v3598_v13 = vmax.f32 %v3449_v21, 0.0  ;;  %v4388_v41 = vld [vmem:[%s7145_s5 + $0x40] sm:$0xff] }
 0x2da   :  { %v3263_v20 = vpop.f32.mrf.mxu0  ;;  %4155 = vmatmul.mubr.bf16.gmra.mxu0 %v7535_v35  ;;  %4236 = vmatmul.mubr.bf16.gmra.mxu1 %v3701_v31  ;;  %v7541_v31 = vld [vmem:[#allocation100_spill] sm:$0xff] }
 0x2db   :  { %v3456_v8 = vpop.f32.mrf.mxu1  ;;  %v3601_v0 = vmax.f32 %v3451_v15, 0.0  ;;  %v3453_v11 = vadd.f32 %v3452_v34, %v3260_v47  ;;  %v3264_v18 = vadd.f32 %v3263_v20, %v7536_v49  ;;  %4162 = vmatprep.mubr.bf16.mxu0 %v7537_v22  ;;  %4460 = vperm.xlu0 %5165, %v4386_v2   ;;  %v2894_v55 = vadd.f32 %v7541_v31, %v6545_v38  ;;  %v7543_v43 = vld [vmem:[#allocation96_spill] sm:$0xff]  ;;  %v7544_v15 = vld [vmem:[#allocation99_spill] sm:$0xff]  ;;  %v4390_v20 = vld [vmem:[%s7145_s5 + $0x50] sm:$0xff] }
 0x2dc   :  { %v3265_v12 = vpop.f32.mrf.mxu0  ;;  %v7550_v31 = vld [vmem:[#allocation104_spill] sm:$0xff] }
 0x2dd   :  { %v3458_v24 = vpop.f32.mrf.mxu1  ;;  %v3705_v7 = vpack.c.bf16 %v3601_v0, %v3597_v16  ;;  %v3602_v54 = vmax.f32 %v3453_v11, 0.0  ;;  %v3266_v25 = vadd.f32 %v3265_v12, %v7538_v36  ;;  %v3457_v58 = vadd.f32 %v3456_v8, %v3264_v18  ;;  %v7545_v8 = vld [vmem:[#allocation21_spill] sm:$0xff]  ;;  %v7546_v0 = vld [vmem:[#allocation22_spill] sm:$0xff] }
 0x2de   :  { %v3267_v30 = vpop.f32.mrf.mxu0  ;;  %v3087_v35 = vadd.f32 %v7545_v8, %v2894_v55 }
 0x2df   :  { %v3460_v37 = vpop.f32.mrf.mxu1  ;;  %v3706_v48 = vpack.c.bf16 %v3602_v54, %v3598_v13  ;;  %v3268_v28 = vadd.f32 %v3267_v30, %v7540_v4  ;;  %v3459_v45 = vadd.f32 %v3458_v24, %v3266_v25  ;;  %v3605_v40 = vmax.f32 %v3457_v58, 0.0  ;;  %4470 = vperm.xlu0 %5165, %v4388_v41   ;;  %v7547_v13 = vld [vmem:[#allocation24_spill] sm:$0xff] }
 0x2e0   :  { %v3269_v61 = vpop.f32.mrf.mxu0  ;;  %v4392_v25 = vld [vmem:[%s7145_s5 + $0x60] sm:$0xff] }
 0x2e1   :  { %v3462_v1 = vpop.f32.mrf.mxu1  ;;  %v3461_v57 = vadd.f32 %v3460_v37, %v3268_v28  ;;  %v3270_v27 = vadd.f32 %v3269_v61, %v3077_v53  ;;  %4243 = vmatprep.mubr.bf16.mxu1 %v3706_v48  ;;  %v3606_v5 = vmax.f32 %v3459_v45, 0.0 }
 0x2e2   :  { %v3273_v17 = vpop.f32.mrf.mxu0  ;;  %4163 = vmatmul.mubr.bf16.gmra.mxu0 %v7542_v6  ;;  %4244 = vmatmul.mubr.bf16.gmra.mxu1 %v3705_v7  ;;  %v2904_v7 = vadd.f32 %v7547_v13, %v6545_v38  ;;  %v7551_v6 = vld [vmem:[#allocation107_spill] sm:$0xff] }
 0x2e3   :  { %v3466_v23 = vpop.f32.mrf.mxu1  ;;  %v3609_v44 = vmax.f32 %v3461_v57, 0.0  ;;  %v3463_v39 = vadd.f32 %v3462_v1, %v3270_v27  ;;  %v3274_v52 = vadd.f32 %v3273_v17, %v7543_v43  ;;  %4480 = vperm.xlu0 %5165, %v4390_v20   ;;  %v7549_v1 = vld [vmem:[#allocation23_spill] sm:$0xff] }
 0x2e4   :  { %v3275_v10 = vpop.f32.mrf.mxu0  ;;  %v3097_v55 = vadd.f32 %v7550_v31, %v2904_v7 }
 0x2e5   :  { %v3468_v14 = vpop.f32.mrf.mxu1  ;;  %v3709_v34 = vpack.c.bf16 %v3609_v44, %v3605_v40  ;;  %v3610_v21 = vmax.f32 %v3463_v39, 0.0  ;;  %v3276_v47 = vadd.f32 %v3275_v10, %v7544_v15  ;;  %v3467_v16 = vadd.f32 %v3466_v23, %v3274_v52 }
 0x2e6   :  { %v3277_v33 = vpop.f32.mrf.mxu0  ;;  %v2914_v10 = vadd.f32 %v6706_v62, %v6545_v38 }
 0x2e7   :  { %v3470_v3 = vpop.f32.mrf.mxu1  ;;  %v3710_v29 = vpack.c.bf16 %v3610_v21, %v3606_v5  ;;  %v3278_v11 = vadd.f32 %v3277_v33, %v7546_v0  ;;  %v3469_v22 = vadd.f32 %v3468_v14, %v3276_v47  ;;  %v3613_v30 = vmax.f32 %v3467_v16, 0.0  ;;  %4490 = vperm.xlu0 %5165, %v4392_v25   ;;  %v7552_v47 = vld [vmem:[#allocation108_spill] sm:$0xff]  ;;  %v7553_v16 = vld [vmem:[#allocation25_spill] sm:$0xff] }
 0x2e8   :  { %v3279_v49 = vpop.f32.mrf.mxu0 }
 0x2e9   :  { %v3472_v18 = vpop.f32.mrf.mxu1  ;;  %v3471_v12 = vadd.f32 %v3470_v3, %v3278_v11  ;;  %v3280_v24 = vadd.f32 %v3279_v49, %v3087_v35  ;;  %4251 = vmatprep.mubr.bf16.mxu1 %v3710_v29  ;;  %v3614_v4 = vmax.f32 %v3469_v22, 0.0 }
 0x2ea   :  { %v3283_v54 = vpop.f32.mrf.mxu0  ;;  %4252 = vmatmul.mubr.bf16.gmra.mxu1 %v3709_v34 }
 0x2eb   :  { %v3476_v36 = vpop.f32.mrf.mxu1  ;;  %v3617_v37 = vmax.f32 %v3471_v12, 0.0  ;;  %v3473_v2 = vadd.f32 %v3472_v18, %v3280_v24  ;;  %v3284_v53 = vadd.f32 %v3283_v54, %v7548_v60  ;;  %v3107_v18 = vadd.f32 %v6708_v59, %v2914_v10  ;;  %v7554_v12 = vld [vmem:[#allocation26_spill] sm:$0xff]  ;;  %v7555_v59 = vld [vmem:[#allocation109_spill] sm:$0xff] }
 0x2ec   :  { %v3285_v48 = vpop.f32.mrf.mxu0  ;;  %v2934_v10 = vadd.f32 %v6736_v42, %v6545_v38 }
 0x2ed   :  { %v3478_v58 = vpop.f32.mrf.mxu1  ;;  %v3713_v28 = vpack.c.bf16 %v3617_v37, %v3613_v30  ;;  %v3618_v61 = vmax.f32 %v3473_v2, 0.0  ;;  %v3286_v45 = vadd.f32 %v3285_v48, %v7549_v1  ;;  %v3477_v23 = vadd.f32 %v3476_v36, %v3284_v53 }
 0x2ee   :  { %v3287_v57 = vpop.f32.mrf.mxu0  ;;  %v2924_v30 = vadd.f32 %v6721_v56, %v6545_v38 }
 0x2ef   :  { %v3480_v27 = vpop.f32.mrf.mxu1  ;;  %v3714_v17 = vpack.c.bf16 %v3618_v61, %v3614_v4  ;;  %v3288_v41 = vadd.f32 %v3287_v57, %v7551_v6  ;;  %v3479_v39 = vadd.f32 %v3478_v58, %v3286_v45  ;;  %v3621_v34 = vmax.f32 %v3477_v23, 0.0  ;;  %v7556_v57 = vld [vmem:[#allocation27_spill] sm:$0xff]  ;;  %v7557_v6 = vld [vmem:[#allocation28_spill] sm:$0xff] }
 0x2f0   :  { %v3289_v40 = vpop.f32.mrf.mxu0 }
 0x2f1   :  { %v3482_v44 = vpop.f32.mrf.mxu1  ;;  %v3481_v43 = vadd.f32 %v3480_v27, %v3288_v41  ;;  %v3290_v52 = vadd.f32 %v3289_v40, %v3097_v55  ;;  %4259 = vmatprep.mubr.bf16.mxu1 %v3714_v17  ;;  %v3622_v8 = vmax.f32 %v3479_v39, 0.0  ;;  %v3117_v17 = vadd.f32 %v6723_v26, %v2924_v30  ;;  %v7558_v26 = vld [vmem:[#allocation112_spill] sm:$0xff] }
 0x2f2   :  { %v3293_v14 = vpop.f32.mrf.mxu0  ;;  %4260 = vmatmul.mubr.bf16.gmra.mxu1 %v3713_v28 }
 0x2f3   :  { %v3486_v5 = vpop.f32.mrf.mxu1  ;;  %v3625_v21 = vmax.f32 %v3481_v43, 0.0  ;;  %v3483_v15 = vadd.f32 %v3482_v44, %v3290_v52  ;;  %v3294_v33 = vadd.f32 %v3293_v14, %v7552_v47 }
 0x2f4   :  { %v3295_v3 = vpop.f32.mrf.mxu0 }
 0x2f5   :  { %v3488_v20 = vpop.f32.mrf.mxu1  ;;  %v3717_v35 = vpack.c.bf16 %v3625_v21, %v3621_v34  ;;  %v3626_v29 = vmax.f32 %v3483_v15, 0.0  ;;  %v3296_v0 = vadd.f32 %v3295_v3, %v7553_v16  ;;  %v3487_v22 = vadd.f32 %v3486_v5, %v3294_v33 }
 0x2f6   :  { %v3297_v11 = vpop.f32.mrf.mxu0 }
 0x2f7   :  { %v3490_v49 = vpop.f32.mrf.mxu1  ;;  %v3718_v62 = vpack.c.bf16 %v3626_v29, %v3622_v8  ;;  %v3298_v24 = vadd.f32 %v3297_v11, %v7554_v12  ;;  %v3489_v54 = vadd.f32 %v3488_v20, %v3296_v0  ;;  %v3629_v60 = vmax.f32 %v3487_v22, 0.0  ;;  %v7559_v29 = vld [vmem:[#allocation115_spill] sm:$0xff] }
 0x2f8   :  { %v3299_v13 = vpop.f32.mrf.mxu0 }
 0x2f9   :  { %v3492_v7 = vpop.f32.mrf.mxu1  ;;  %v3491_v36 = vadd.f32 %v3490_v49, %v3298_v24  ;;  %v3300_v25 = vadd.f32 %v3299_v13, %v3107_v18  ;;  %4267 = vmatprep.mubr.bf16.mxu1 %v3718_v62  ;;  %v3630_v61 = vmax.f32 %v3489_v54, 0.0  ;;  %v3127_v49 = vadd.f32 %v6738_v9, %v2934_v10  ;;  %v7560_v62 = vld [vmem:[#allocation116_spill] sm:$0xff]  ;;  %v7561_v9 = vld [vmem:[#allocation29_spill] sm:$0xff] }
 0x2fa   :  { %v3303_v37 = vpop.f32.mrf.mxu0  ;;  %4268 = vmatmul.mubr.bf16.gmra.mxu1 %v3717_v35 }
 0x2fb   :  { %v3496_v2 = vpop.f32.mrf.mxu1  ;;  %v3633_v53 = vmax.f32 %v3491_v36, 0.0  ;;  %v3493_v48 = vadd.f32 %v3492_v7, %v3300_v25  ;;  %v3304_v58 = vadd.f32 %v3303_v37, %v7555_v59  ;;  %v2944_v36 = vadd.f32 %v6751_v51, %v6545_v38 }
 0x2fc   :  { %v3305_v4 = vpop.f32.mrf.mxu0 }
 0x2fd   :  { %v3498_v28 = vpop.f32.mrf.mxu1  ;;  %v3721_v1 = vpack.c.bf16 %v3633_v53, %v3629_v60  ;;  %v3634_v45 = vmax.f32 %v3493_v48, 0.0  ;;  %v3306_v27 = vadd.f32 %v3305_v4, %v7556_v57  ;;  %v3497_v23 = vadd.f32 %v3496_v2, %v3304_v58 }
 0x2fe   :  { %v3307_v31 = vpop.f32.mrf.mxu0 }
 0x2ff   :  { %v3500_v55 = vpop.f32.mrf.mxu1  ;;  %v3722_v56 = vpack.c.bf16 %v3634_v45, %v3630_v61  ;;  %v3308_v41 = vadd.f32 %v3307_v31, %v7557_v6  ;;  %v3499_v39 = vadd.f32 %v3498_v28, %v3306_v27  ;;  %v3637_v34 = vmax.f32 %v3497_v23, 0.0  ;;  %v7562_v61 = vld [vmem:[#allocation30_spill] sm:$0xff] }
 0x300   :  { %v3309_v40 = vpop.f32.mrf.mxu0  ;;  %v4382_v45 = vld [vmem:[%s7145_s5 + $0x10] sm:$0xff]  ;;  %v3137_v27 = vadd.f32 %v6753_v32, %v2944_v36 }
 0x301   :  { %v3502_v44 = vpop.f32.mrf.mxu1  ;;  %v3501_v43 = vadd.f32 %v3500_v55, %v3308_v41  ;;  %v3310_v52 = vadd.f32 %v3309_v40, %v3117_v17  ;;  %4275 = vmatprep.mubr.bf16.mxu1 %v3722_v56  ;;  %v3638_v20 = vmax.f32 %v3499_v39, 0.0  ;;  %4440 = vperm.xlu1 %5166, %v4382_v45   ;;  %v7563_v17 = vld [vmem:[#allocation117_spill] sm:$0xff]  ;;  %v4383_v39 = vld [vmem:[%s7145_s5 + $0x18] sm:$0xff] }
 0x302   :  { %v3313_v14 = vpop.f32.mrf.mxu0  ;;  %4276 = vmatmul.mubr.bf16.gmra.mxu1 %v3721_v1 }
 0x303   :  { %v3506_v5 = vpop.f32.mrf.mxu1  ;;  %v3641_v21 = vmax.f32 %v3501_v43, 0.0  ;;  %v3503_v15 = vadd.f32 %v3502_v44, %v3310_v52  ;;  %v3314_v47 = vadd.f32 %v3313_v14, %v7558_v26  ;;  %v2954_v43 = vadd.f32 %v6766_v50, %v6545_v38  ;;  %v4385_v50 = vld [vmem:[%s7145_s5 + $0x28] sm:$0xff] }
 0x304   :  { %v3315_v33 = vpop.f32.mrf.mxu0 }
 0x305   :  { %v3508_v3 = vpop.f32.mrf.mxu1  ;;  %v3725_v8 = vpack.c.bf16 %v3641_v21, %v3637_v34  ;;  %v3642_v35 = vmax.f32 %v3503_v15, 0.0  ;;  %v3316_v16 = vadd.f32 %v3315_v33, %v7559_v29  ;;  %v3507_v18 = vadd.f32 %v3506_v5, %v3314_v47  ;;  %4445 = vperm.xlu1 %5166, %v4383_v39   ;;  %v7564_v34 = vld [vmem:[#allocation31_spill] sm:$0xff] }
 0x306   :  { %v3317_v0 = vpop.f32.mrf.mxu0 }
 0x307   :  { %v3510_v11 = vpop.f32.mrf.mxu1  ;;  %v3726_v42 = vpack.c.bf16 %v3642_v35, %v3638_v20  ;;  %v3318_v22 = vadd.f32 %v3317_v0, %v7560_v62  ;;  %v3509_v13 = vadd.f32 %v3508_v3, %v3316_v16  ;;  %v3645_v37 = vmax.f32 %v3507_v18, 0.0  ;;  %v7565_v20 = vld [vmem:[#allocation32_spill] sm:$0xff] }
 0x308   :  { %v3319_v12 = vpop.f32.mrf.mxu0  ;;  %v3147_v16 = vadd.f32 %v6768_v46, %v2954_v43 }
 0x309   :  { %v3512_v24 = vpop.f32.mrf.mxu1  ;;  %v3511_v7 = vadd.f32 %v3510_v11, %v3318_v22  ;;  %v3320_v54 = vadd.f32 %v3319_v12, %v3127_v49  ;;  %4283 = vmatprep.mubr.bf16.mxu1 %v3726_v42  ;;  %v3646_v58 = vmax.f32 %v3509_v13, 0.0  ;;  %4455 = vperm.xlu1 %5166, %v4385_v50   ;;  %v7566_v49 = vld [vmem:[#allocation33_spill] sm:$0xff]  ;;  %v4387_v13 = vld [vmem:[%s7145_s5 + $0x38] sm:$0xff] }
 0x30a   :  { %v3323_v25 = vpop.f32.mrf.mxu0  ;;  %4284 = vmatmul.mubr.bf16.gmra.mxu1 %v3725_v8 }
 0x30b   :  { %v3516_v30 = vpop.f32.mrf.mxu1  ;;  %v3649_v2 = vmax.f32 %v3511_v7, 0.0  ;;  %v3513_v60 = vadd.f32 %v3512_v24, %v3320_v54  ;;  %v3324_v53 = vadd.f32 %v3323_v25, %v7561_v9  ;;  %v2964_v7 = vadd.f32 %v6781_v63, %v6545_v38  ;;  %v4389_v63 = vld [vmem:[%s7145_s5 + $0x48] sm:$0xff] }
 0x30c   :  { %v3325_v48 = vpop.f32.mrf.mxu0 }
 0x30d   :  { %v3518_v59 = vpop.f32.mrf.mxu1  ;;  %v3729_v4 = vpack.c.bf16 %v3649_v2, %v3645_v37  ;;  %v3650_v28 = vmax.f32 %v3513_v60, 0.0  ;;  %v3326_v1 = vadd.f32 %v3325_v48, %v7562_v61  ;;  %v3517_v55 = vadd.f32 %v3516_v30, %v3324_v53  ;;  %4465 = vperm.xlu1 %5166, %v4387_v13   ;;  %v7567_v37 = vld [vmem:[#allocation34_spill] sm:$0xff] }
 0x30e   :  { %v3327_v51 = vpop.f32.mrf.mxu0 }
 0x30f   :  { %v3520_v57 = vpop.f32.mrf.mxu1  ;;  %v3730_v31 = vpack.c.bf16 %v3650_v28, %v3646_v58  ;;  %v3328_v56 = vadd.f32 %v3327_v51, %v7563_v17  ;;  %v3519_v41 = vadd.f32 %v3518_v59, %v3326_v1  ;;  %v3653_v32 = vmax.f32 %v3517_v55, 0.0  ;;  %v7568_v58 = vld [vmem:[#allocation35_spill] sm:$0xff] }
 0x310   :  { %v3329_v23 = vpop.f32.mrf.mxu0  ;;  %v3157_v1 = vadd.f32 %v6783_v19, %v2964_v7 }
 0x311   :  { %v3522_v6 = vpop.f32.mrf.mxu1  ;;  %v3521_v40 = vadd.f32 %v3520_v57, %v3328_v56  ;;  %v3330_v44 = vadd.f32 %v3329_v23, %v3137_v27  ;;  %4291 = vmatprep.mubr.bf16.mxu1 %v3730_v31  ;;  %v3654_v47 = vmax.f32 %v3519_v41, 0.0  ;;  %4475 = vperm.xlu1 %5166, %v4389_v63   ;;  %v7569_v57 = vld [vmem:[#allocation36_spill] sm:$0xff]  ;;  %v7570_v41 = vld [vmem:[#allocation39_spill] sm:$0xff] }
 0x312   :  { %v3333_v52 = vpop.f32.mrf.mxu0  ;;  %4292 = vmatmul.mubr.bf16.gmra.mxu1 %v3729_v4 }
 0x313   :  { %v3526_v10 = vpop.f32.mrf.mxu1  ;;  %v3657_v14 = vmax.f32 %v3521_v40, 0.0  ;;  %v3523_v5 = vadd.f32 %v3522_v6, %v3330_v44  ;;  %v3334_v21 = vadd.f32 %v3333_v52, %v7564_v34  ;;  %v4391_v6 = vld [vmem:[%s7145_s5 + $0x58] sm:$0xff]  ;;  %v2974_v40 = vadd.f32 %v7570_v41, %v6545_v38  ;;  %v4393_v38 = vld [vmem:[%s7145_s5 + $0x68] sm:$0xff] }
 0x314   :  { %v3335_v15 = vpop.f32.mrf.mxu0 }
 0x315   :  { %v3528_v26 = vpop.f32.mrf.mxu1  ;;  %v3733_v33 = vpack.c.bf16 %v3657_v14, %v3653_v32  ;;  %v3658_v3 = vmax.f32 %v3523_v5, 0.0  ;;  %v3336_v8 = vadd.f32 %v3335_v15, %v7565_v20  ;;  %v3527_v11 = vadd.f32 %v3526_v10, %v3334_v21  ;;  %4485 = vperm.xlu1 %5166, %v4391_v6   ;;  %v7571_v10 = vld [vmem:[#allocation37_spill] sm:$0xff]  ;;  %v7573_v20 = vld [vmem:[#allocation40_spill] sm:$0xff] }
 0x316   :  { %v3337_v35 = vpop.f32.mrf.mxu0 }
 0x317   :  { %v3530_v29 = vpop.f32.mrf.mxu1  ;;  %v3734_v0 = vpack.c.bf16 %v3658_v3, %v3654_v47  ;;  %v3338_v42 = vadd.f32 %v3337_v35, %v7566_v49  ;;  %v3529_v22 = vadd.f32 %v3528_v26, %v3336_v8  ;;  %v3661_v46 = vmax.f32 %v3527_v11, 0.0  ;;  %v7572_v26 = vld [vmem:[#allocation38_spill] sm:$0xff] }
 0x318   :  { %v3339_v18 = vpop.f32.mrf.mxu0  ;;  %v3167_v8 = vadd.f32 %v7573_v20, %v2974_v40 }
 0x319   :  { %v3532_v62 = vpop.f32.mrf.mxu1  ;;  %v3531_v12 = vadd.f32 %v3530_v29, %v3338_v42  ;;  %v3340_v24 = vadd.f32 %v3339_v18, %v3147_v16  ;;  %4299 = vmatprep.mubr.bf16.mxu1 %v3734_v0  ;;  %v3662_v53 = vmax.f32 %v3529_v22, 0.0  ;;  %4495 = vperm.xlu1 %5166, %v4393_v38   ;;  %v7574_v29 = vld [vmem:[#allocation124_spill] sm:$0xff] }
 0x31a   :  { %v3343_v54 = vpop.f32.mrf.mxu0  ;;  %4300 = vmatmul.mubr.bf16.gmra.mxu1 %v3733_v33 }
 0x31b   :  { %v3536_v36 = vpop.f32.mrf.mxu1  ;;  %v3665_v25 = vmax.f32 %v3531_v12, 0.0  ;;  %v3533_v30 = vadd.f32 %v3532_v62, %v3340_v24  ;;  %v3344_v2 = vadd.f32 %v3343_v54, %v7567_v37 }
 0x31c   :  { %v3345_v60 = vpop.f32.mrf.mxu0 }
 0x31d   :  { %v3538_v9 = vpop.f32.mrf.mxu1  ;;  %v3737_v48 = vpack.c.bf16 %v3665_v25, %v3661_v46  ;;  %v3666_v59 = vmax.f32 %v3533_v30, 0.0  ;;  %v3346_v4 = vadd.f32 %v3345_v60, %v7568_v58  ;;  %v3537_v51 = vadd.f32 %v3536_v36, %v3344_v2 }
 0x31e   :  { %v3347_v28 = vpop.f32.mrf.mxu0 }
 0x31f   :  { %v3540_v61 = vpop.f32.mrf.mxu1  ;;  %v3738_v45 = vpack.c.bf16 %v3666_v59, %v3662_v53  ;;  %v3348_v27 = vadd.f32 %v3347_v28, %v7569_v57  ;;  %v3539_v17 = vadd.f32 %v3538_v9, %v3346_v4  ;;  %v3669_v19 = vmax.f32 %v3537_v51, 0.0 }
 0x320   :  { %v3349_v31 = vpop.f32.mrf.mxu0 }
 0x321   :  { %v3542_v55 = vpop.f32.mrf.mxu1  ;;  %v3541_v56 = vadd.f32 %v3540_v61, %v3348_v27  ;;  %v3350_v23 = vadd.f32 %v3349_v31, %v3157_v1  ;;  %4307 = vmatprep.mubr.bf16.mxu1 %v3738_v45  ;;  %v3670_v34 = vmax.f32 %v3539_v17, 0.0 }
 0x322   :  { %v3353_v44 = vpop.f32.mrf.mxu0  ;;  %4308 = vmatmul.mubr.bf16.gmra.mxu1 %v3737_v48 }
 0x323   :  { %v3546_v39 = vpop.f32.mrf.mxu1  ;;  %v3673_v43 = vmax.f32 %v3541_v56, 0.0  ;;  %v3543_v52 = vadd.f32 %v3542_v55, %v3350_v23  ;;  %v3354_v32 = vadd.f32 %v3353_v44, %v7571_v10 }
 0x324   :  { %v3355_v14 = vpop.f32.mrf.mxu0 }
 0x325   :  { %v3548_v5 = vpop.f32.mrf.mxu1  ;;  %v3741_v21 = vpack.c.bf16 %v3673_v43, %v3669_v19  ;;  %v3674_v15 = vmax.f32 %v3543_v52, 0.0  ;;  %v3356_v47 = vadd.f32 %v3355_v14, %v7572_v26  ;;  %v3547_v35 = vadd.f32 %v3546_v39, %v3354_v32  ;;  %v6994_v14 = vld [vmem:[%s7144_s4] ss:$0 sm:$0xff] }
 0x326   :  { %v3357_v33 = vpop.f32.mrf.mxu0 }
 0x327   :  { %v3550_v3 = vpop.f32.mrf.mxu1  ;;  %v3742_v50 = vpack.c.bf16 %v3674_v15, %v3670_v34  ;;  %v3358_v16 = vadd.f32 %v3357_v33, %v7574_v29  ;;  %v3549_v11 = vadd.f32 %v3548_v5, %v3356_v47  ;;  %v3677_v22 = vmax.f32 %v3547_v35, 0.0 }
 0x328   :  { %v3359_v0 = vpop.f32.mrf.mxu0 }
 0x329   :  { %v3551_v49 = vadd.f32 %v3550_v3, %v3358_v16  ;;  %v3360_v42 = vadd.f32 %v3359_v0, %v3167_v8  ;;  %4315 = vmatprep.mubr.bf16.mxu1 %v3742_v50  ;;  %v3552_v18 = vpop.f32.mrf.mxu1  ;;  %v3678_v7 = vmax.f32 %v3549_v11, 0.0 }
 0x32a   :  { %v4947_v62 = vpop.f32.mrf.mxu0  ;;  %4316 = vmatmul.mubr.bf16.gmra.mxu1 %v3741_v21 }
 0x32b   :  { %v3681_v12 = vmax.f32 %v3551_v49, 0.0  ;;  %v3553_v24 = vadd.f32 %v3552_v18, %v3360_v42 }
 0x32c   :  { %v4948_v13 = vpop.f32.mrf.mxu0 }
 0x32d   :  { %v3745_v54 = vpack.c.bf16 %v3681_v12, %v3677_v22  ;;  %v3682_v36 = vmax.f32 %v3553_v24, 0.0  ;;  %v4949_v32 = vadd.f32 %v4948_v13, %v4947_v62 }
 0x32e   :  { %v4950_v46 = vpop.f32.mrf.mxu0 }
 0x32f   :  { %v3746_v25 = vpack.c.bf16 %v3682_v36, %v3678_v7  ;;  %v4045_v47 = vadd.f32 %v4949_v32, %v6994_v14 }
 0x330   :  { %v4951_v30 = vpop.f32.mrf.mxu0 }
 0x331   :  { %4323 = vmatprep.mubr.bf16.mxu1 %v3746_v25  ;;  %v4952_v34 = vadd.f32 %v4951_v30, %v4950_v46 }
 0x332   :  { %v4953_v37 = vpop.f32.mrf.mxu0  ;;  %4324 = vmatmul.mubr.bf16.gmra.mxu1 %v3745_v54 }
 0x333   :  { %v4048_v33 = vadd.f32 %v4952_v34, %v6994_v14 }
 0x334   :  { %v4954_v2 = vpop.f32.mrf.mxu0 }
 0x335   :  { %v4955_v35 = vadd.f32 %v4954_v2, %v4953_v37 }
 0x336   :  { %v4956_v60 = vpop.f32.mrf.mxu0 }
 0x337   :  { %v4053_v22 = vadd.f32 %v4955_v35, %v6994_v14 }
 0x338   :  { %v4957_v9 = vpop.f32.mrf.mxu0 }
 0x339   :  { %v4958_v0 = vadd.f32 %v4957_v9, %v4956_v60 }
 0x33a   :  { %v4959_v53 = vpop.f32.mrf.mxu0 }
 0x33b   :  { %v4056_v13 = vadd.f32 %v4958_v0, %v6994_v14 }
 0x33c   :  { %v4960_v48 = vpop.f32.mrf.mxu0 }
 0x33d   :  { %v4961_v25 = vadd.f32 %v4960_v48, %v4959_v53 }
 0x33e   :  { %v4962_v59 = vpop.f32.mrf.mxu0 }
 0x33f   :  { %v4061_v34 = vadd.f32 %v4961_v25, %v6994_v14 }
 0x340   :  { %v4963_v58 = vpop.f32.mrf.mxu0 }
 0x341   :  { %v4964_v2 = vadd.f32 %v4963_v58, %v4962_v59 }
 0x342   :  { %v6947_v4 = vpop.f32.mrf.mxu0 }
 0x344   :  { %v6949_v63 = vpop.f32.mrf.mxu0 }
 0x345   :  { %v4967_v48 = vadd.f32 %v6949_v63, %v6947_v4 }
 0x346   :  { %v6951_v28 = vpop.f32.mrf.mxu0 }
 0x348   :  { %v6953_v61 = vpop.f32.mrf.mxu0 }
 0x34a   :  { %v6955_v1 = vpop.f32.mrf.mxu0 }
 0x34c   :  { %v6957_v45 = vpop.f32.mrf.mxu0 }
 0x34e   :  { %v6959_v51 = vpop.f32.mrf.mxu0 }
 0x350   :  { %v6961_v57 = vpop.f32.mrf.mxu0 }
 0x352   :  { %v6963_v27 = vpop.f32.mrf.mxu0 }
 0x354   :  { %v6965_v31 = vpop.f32.mrf.mxu0 }
 0x356   :  { %v6967_v55 = vpop.f32.mrf.mxu0 }
 0x358   :  { %v6969_v17 = vpop.f32.mrf.mxu0 }
 0x35a   :  { %v6971_v56 = vpop.f32.mrf.mxu0 }
 0x35c   :  { %v6973_v23 = vpop.f32.mrf.mxu0 }
 0x35e   :  { %v6975_v6 = vpop.f32.mrf.mxu0 }
 0x360   :  { %v6977_v41 = vpop.f32.mrf.mxu0 }
 0x362   :  { %v6979_v40 = vpop.f32.mrf.mxu0 }
 0x364   :  { %v6981_v44 = vpop.f32.mrf.mxu0 }
 0x366   :  { %v6983_v39 = vpop.f32.mrf.mxu0 }
 0x368   :  { %v6985_v19 = vpop.f32.mrf.mxu0 }
 0x36a   :  { %v6987_v43 = vpop.f32.mrf.mxu0 }
 0x36c   :  { %v6989_v52 = vpop.f32.mrf.mxu0 }
 0x36e   :  { %v6996_v15 = vpop.f32.mrf.mxu0 }
 0x370   :  { %v7000_v8 = vpop.f32.mrf.mxu0 }
 0x372   :  { %v7002_v18 = vpop.f32.mrf.mxu0 }
 0x374   :  { %v7006_v36 = vpop.f32.mrf.mxu0 }
 0x376   :  { %v7008_v32 = vpop.f32.mrf.mxu0 }
 0x37a   :  { %v5059_v10 = vpop.f32.mrf.mxu1 }
 0x37c   :  { %v5060_v5 = vpop.f32.mrf.mxu1 }
 0x37d   :  { %v5061_v21 = vadd.f32 %v5060_v5, %v5059_v10 }
 0x37e   :  { %v5062_v26 = vpop.f32.mrf.mxu1 }
 0x37f   :  { %v4206_v3 = vadd.f32 %v5061_v21, %v4045_v47  ;;  %v4064_v47 = vadd.f32 %v4964_v2, %v6994_v14 }
 0x380   :  { %v5063_v38 = vpop.f32.mrf.mxu1 }
 0x381   :  { %v5064_v20 = vadd.f32 %v5063_v38, %v5062_v26  ;;  %v4332_v11 = vmax.f32 %v4206_v3, 0.0  ;;  %v7012_v3 = vpop.f32.mrf.mxu0 }
 0x382   :  { %v5065_v50 = vpop.f32.mrf.mxu1 }
 0x383   :  { %v4209_v29 = vadd.f32 %v5064_v20, %v4048_v33  ;;  %v4970_v20 = vadd.f32 %v6953_v61, %v6951_v28  ;;  %v4973_v28 = vadd.f32 %v6957_v45, %v6955_v1 }
 0x384   :  { %v5066_v16 = vpop.f32.mrf.mxu1 }
 0x385   :  { %v4333_v49 = vmax.f32 %v4209_v29, 0.0  ;;  %v5067_v42 = vadd.f32 %v5066_v16, %v5065_v50  ;;  %v7018_v16 = vpop.f32.mrf.mxu0 }
 0x386   :  { %v5068_v62 = vpop.f32.mrf.mxu1 }
 0x387   :  { %v4364_v12 = vpack.c.bf16 %v4333_v49, %v4332_v11  ;;  %v4214_v7 = vadd.f32 %v5067_v42, %v4053_v22  ;;  %v4069_v11 = vadd.f32 %v4967_v48, %v6994_v14  ;;  %v7022_v4 = vpop.f32.mrf.mxu0 }
 0x388   :  { %v5069_v24 = vpop.f32.mrf.mxu1 }
 0x389   :  { %v5070_v54 = vadd.f32 %v5069_v24, %v5068_v62  ;;  %4396 = vxpose.xlu0.c.b16.start [1/8] %v4364_v12, 128  ;;  %v4334_v60 = vmax.f32 %v4214_v7, 0.0  ;;  %v4072_v62 = vadd.f32 %v4970_v20, %v6994_v14  ;;  %v7028_v25 = vpop.f32.mrf.mxu0 }
 0x38a   :  { %v5071_v46 = vpop.f32.mrf.mxu1 }
 0x38b   :  { %v4217_v30 = vadd.f32 %v5070_v54, %v4056_v13  ;;  %v4976_v13 = vadd.f32 %v6961_v57, %v6959_v51  ;;  %v7032_v1 = vpop.f32.mrf.mxu0  ;;  %v4979_v51 = vadd.f32 %v6965_v31, %v6963_v27 }
 0x38c   :  { %v5072_v37 = vpop.f32.mrf.mxu1 }
 0x38d   :  { %v4335_v9 = vmax.f32 %v4217_v30, 0.0  ;;  %v5073_v10 = vadd.f32 %v5072_v37, %v5071_v46  ;;  %v4077_v37 = vadd.f32 %v4973_v28, %v6994_v14  ;;  %v4085_v48 = vadd.f32 %v4979_v51, %v6994_v14 }
 0x38e   :  { %v5074_v5 = vpop.f32.mrf.mxu1 }
 0x38f   :  { %v4365_v21 = vpack.c.bf16 %v4335_v9, %v4334_v60  ;;  %v4222_v38 = vadd.f32 %v5073_v10, %v4061_v34  ;;  %v4080_v9 = vadd.f32 %v4976_v13, %v6994_v14 }
 0x390   :  { %v5075_v26 = vpop.f32.mrf.mxu1 }
 0x391   :  { %v5076_v33 = vadd.f32 %v5075_v26, %v5074_v5  ;;  %4397 = vxpose.xlu0.c.b16.cont [2/8] %v4365_v21, 128  ;;  %v4336_v50 = vmax.f32 %v4222_v38, 0.0  ;;  %v4982_v21 = vadd.f32 %v6969_v17, %v6967_v55  ;;  %v4985_v55 = vadd.f32 %v6973_v23, %v6971_v56 }
 0x392   :  { %v5077_v53 = vpop.f32.mrf.mxu1 }
 0x393   :  { %v4225_v59 = vadd.f32 %v5076_v33, %v4064_v47  ;;  %v7038_v33 = vpop.f32.mrf.mxu0  ;;  %v4088_v20 = vadd.f32 %v4982_v21, %v6994_v14  ;;  %v5000_v21 = vadd.f32 %v7000_v8, %v6996_v15  ;;  %v5003_v15 = vadd.f32 %v7006_v36, %v7002_v18 }
 0x394   :  { %v5078_v58 = vpop.f32.mrf.mxu1 }
 0x395   :  { %v4337_v35 = vmax.f32 %v4225_v59, 0.0  ;;  %v5079_v29 = vadd.f32 %v5078_v58, %v5077_v53  ;;  %v7042_v27 = vpop.f32.mrf.mxu0 }
 0x396   :  { %v5080_v0 = vpop.f32.mrf.mxu1 }
 0x397   :  { %v4366_v49 = vpack.c.bf16 %v4337_v35, %v4336_v50  ;;  %v4230_v22 = vadd.f32 %v5079_v29, %v4069_v11 }
 0x398   :  { %v5081_v42 = vpop.f32.mrf.mxu1 }
 0x399   :  { %v5082_v12 = vadd.f32 %v5081_v42, %v5080_v0  ;;  %4398 = vxpose.xlu0.c.b16.cont [3/8] %v4366_v49, 128  ;;  %v4338_v7 = vmax.f32 %v4230_v22, 0.0  ;;  %v4988_v0 = vadd.f32 %v6977_v41, %v6975_v6  ;;  %v4991_v6 = vadd.f32 %v6981_v44, %v6979_v40 }
 0x39a   :  { %v5083_v63 = vpop.f32.mrf.mxu1 }
 0x39b   :  { %v4233_v61 = vadd.f32 %v5082_v12, %v4072_v62  ;;  %v7048_v62 = vpop.f32.mrf.mxu0  ;;  %v4093_v12 = vadd.f32 %v4985_v55, %v6994_v14 }
 0x39c   :  { %v5084_v24 = vpop.f32.mrf.mxu1 }
 0x39d   :  { %v4339_v54 = vmax.f32 %v4233_v61, 0.0  ;;  %v5085_v46 = vadd.f32 %v5084_v24, %v5083_v63  ;;  %v4096_v61 = vadd.f32 %v4988_v0, %v6994_v14  ;;  %v7052_v56 = vpop.f32.mrf.mxu0 }
 0x39e   :  { %v5086_v30 = vpop.f32.mrf.mxu1 }
 0x39f   :  { %v4367_v2 = vpack.c.bf16 %v4339_v54, %v4338_v7  ;;  %v4238_v10 = vadd.f32 %v5085_v46, %v4077_v37  ;;  %v4994_v54 = vadd.f32 %v6985_v19, %v6983_v39  ;;  %v4997_v39 = vadd.f32 %v6989_v52, %v6987_v43 }
 0x3a0   :  { %v5087_v60 = vpop.f32.mrf.mxu1 }
 0x3a1   :  { %v5088_v5 = vadd.f32 %v5087_v60, %v5086_v30  ;;  %4399 = vxpose.xlu0.c.b16.cont [4/8] %v4367_v2, 128  ;;  %v4340_v26 = vmax.f32 %v4238_v10, 0.0  ;;  %v7058_v2 = vpop.f32.mrf.mxu0 }
 0x3a2   :  { %v5089_v45 = vpop.f32.mrf.mxu1 }
 0x3a3   :  { %v4241_v57 = vadd.f32 %v5088_v5, %v4080_v9  ;;  %v4101_v9 = vadd.f32 %v4991_v6, %v6994_v14  ;;  %v7062_v40 = vpop.f32.mrf.mxu0  ;;  %v5012_v6 = vadd.f32 %v7032_v1, %v7028_v25 }
 0x3a4   :  { %v5090_v34 = vpop.f32.mrf.mxu1 }
 0x3a5   :  { %v4341_v47 = vmax.f32 %v4241_v57, 0.0  ;;  %v5091_v38 = vadd.f32 %v5090_v34, %v5089_v45  ;;  %v4104_v45 = vadd.f32 %v4994_v54, %v6994_v14 }
 0x3a6   :  { %v5092_v53 = vpop.f32.mrf.mxu1 }
 0x3a7   :  { %v4368_v59 = vpack.c.bf16 %v4341_v47, %v4340_v26  ;;  %v4246_v50 = vadd.f32 %v5091_v38, %v4085_v48 }
 0x3a8   :  { %v5093_v58 = vpop.f32.mrf.mxu1 }
 0x3a9   :  { %v5094_v35 = vadd.f32 %v5093_v58, %v5092_v53  ;;  %4400 = vxpose.xlu0.c.b16.cont [5/8] %v4368_v59, 128  ;;  %v4342_v11 = vmax.f32 %v4246_v50, 0.0  ;;  %v7068_v53 = vpop.f32.mrf.mxu0  ;;  %v4109_v59 = vadd.f32 %v4997_v39, %v6994_v14  ;;  %v4112_v50 = vadd.f32 %v5000_v21, %v6994_v14 }
 0x3aa   :  { %v5095_v31 = vpop.f32.mrf.mxu1 }
 0x3ab   :  { %v4249_v17 = vadd.f32 %v5094_v35, %v4088_v20  ;;  %v5023_v43 = vpop.f32.mrf.mxu0 }
 0x3ac   :  { %v5096_v29 = vpop.f32.mrf.mxu1 }
 0x3ad   :  { %v4343_v49 = vmax.f32 %v4249_v17, 0.0  ;;  %v5097_v42 = vadd.f32 %v5096_v29, %v5095_v31  ;;  %v5006_v17 = vadd.f32 %v7012_v3, %v7008_v32 }
 0x3ae   :  { %v5098_v22 = vpop.f32.mrf.mxu1 }
 0x3af   :  { %v4369_v63 = vpack.c.bf16 %v4343_v49, %v4342_v11  ;;  %v4254_v24 = vadd.f32 %v5097_v42, %v4093_v12  ;;  %v7076_v49 = vpop.f32.mrf.mxu0  ;;  %v4120_v18 = vadd.f32 %v5006_v17, %v6994_v14 }
 0x3b0   :  { %v5099_v28 = vpop.f32.mrf.mxu1 }
 0x3b1   :  { %v5100_v13 = vadd.f32 %v5099_v28, %v5098_v22  ;;  %4401 = vxpose.xlu0.c.b16.cont [6/8] %v4369_v63, 128  ;;  %v4344_v46 = vmax.f32 %v4254_v24, 0.0  ;;  %v4117_v22 = vadd.f32 %v5003_v15, %v6994_v14  ;;  %v4394_v63 = vld [vmem:[%s7145_s5 + $0x70] sm:$0xff]  ;;  %v5026_v32 = vpop.f32.mrf.mxu0  ;;  %v5009_v24 = vadd.f32 %v7022_v4, %v7018_v16 }
 0x3b2   :  { %v5101_v23 = vpop.f32.mrf.mxu1 }
 0x3b3   :  { %v4257_v41 = vadd.f32 %v5100_v13, %v4096_v61 }
 0x3b4   :  { %v5102_v7 = vpop.f32.mrf.mxu1 }
 0x3b5   :  { %v4345_v30 = vmax.f32 %v4257_v41, 0.0  ;;  %v5103_v37 = vadd.f32 %v5102_v7, %v5101_v23 }
 0x3b6   :  { %v5104_v60 = vpop.f32.mrf.mxu1 }
 0x3b7   :  { %v4370_v10 = vpack.c.bf16 %v4345_v30, %v4344_v46  ;;  %v4262_v51 = vadd.f32 %v5103_v37, %v4101_v9  ;;  %v5028_v46 = vpop.f32.mrf.mxu0  ;;  %v4125_v37 = vadd.f32 %v5009_v24, %v6994_v14 }
 0x3b8   :  { %v5105_v5 = vpop.f32.mrf.mxu1 }
 0x3b9   :  { %v5106_v57 = vadd.f32 %v5105_v5, %v5104_v60  ;;  %4402 = vxpose.xlu0.c.b16.cont [7/8] %v4370_v10, 128  ;;  %v4346_v26 = vmax.f32 %v4262_v51, 0.0  ;;  %v4128_v10 = vadd.f32 %v5012_v6, %v6994_v14  ;;  %v5029_v16 = vpop.f32.mrf.mxu0  ;;  %v5015_v51 = vadd.f32 %v7042_v27, %v7038_v33 }
 0x3ba   :  { %v5107_v44 = vpop.f32.mrf.mxu1 }
 0x3bb   :  { %v4265_v19 = vadd.f32 %v5106_v57, %v4104_v45  ;;  %v5018_v57 = vadd.f32 %v7052_v56, %v7048_v62 }
 0x3bc   :  { %v5108_v34 = vpop.f32.mrf.mxu1 }
 0x3bd   :  { %v4347_v47 = vmax.f32 %v4265_v19, 0.0  ;;  %v5109_v38 = vadd.f32 %v5108_v34, %v5107_v44  ;;  %v5031_v34 = vpop.f32.mrf.mxu0 }
 0x3be   :  { %v5110_v48 = vpop.f32.mrf.mxu1 }
 0x3bf   :  { %v4371_v58 = vpack.c.bf16 %v4347_v47, %v4346_v26  ;;  %v4270_v35 = vadd.f32 %v5109_v38, %v4109_v59  ;;  %v4133_v26 = vadd.f32 %v5015_v51, %v6994_v14  ;;  %v5032_v33 = vpop.f32.mrf.mxu0 }
 0x3c0   :  { %v5111_v20 = vpop.f32.mrf.mxu1 }
 0x3c1   :  { %v5112_v31 = vadd.f32 %v5111_v20, %v5110_v48  ;;  %4403 = vxpose.xlu0.c.b16.end [8/8] %v4371_v58, 128  ;;  %v4348_v29 = vmax.f32 %v4270_v35, 0.0  ;;  %v4136_v48 = vadd.f32 %v5018_v57, %v6994_v14  ;;  %v5021_v20 = vadd.f32 %v7062_v40, %v7058_v2  ;;  %v5034_v15 = vpop.f32.mrf.mxu0 }
 0x3c2   :  { %v5113_v52 = vpop.f32.mrf.mxu1  ;;  %v5027_v40 = vadd.f32 %v5026_v32, %v7076_v49  ;;  %v5033_v49 = vadd.f32 %v5032_v33, %v5031_v34 }
 0x3c3   :  { %v4273_v8 = vadd.f32 %v5112_v31, %v4112_v50  ;;  %v5024_v50 = vadd.f32 %v5023_v43, %v7068_v53  ;;  %v5030_v43 = vadd.f32 %v5029_v16, %v5028_v46 }
 0x3c4   :  { %v5114_v55 = vpop.f32.mrf.mxu1 }
 0x3c5   :  { %v4349_v0 = vmax.f32 %v4273_v8, 0.0  ;;  %v5115_v11 = vadd.f32 %v5114_v55, %v5113_v52  ;;  %v4141_v55 = vadd.f32 %v5021_v20, %v6994_v14 }
 0x3c6   :  { %v5116_v42 = vpop.f32.mrf.mxu1 }
 0x3c7   :  { %v4372_v12 = vpack.c.bf16 %v4349_v0, %v4348_v29  ;;  %v4278_v36 = vadd.f32 %v5115_v11, %v4117_v22  ;;  %v4144_v0 = vadd.f32 %v5024_v50, %v6994_v14  ;;  %v5035_v22 = vpop.f32.mrf.mxu0 }
 0x3c8   :  { %v5117_v28 = vpop.f32.mrf.mxu1  ;;  %v5036_v46 = vadd.f32 %v5035_v22, %v5034_v15  ;;  %v4431_v15 = vpop.permute.xlu0 %4430 }
 0x3c9   :  { %v5118_v61 = vadd.f32 %v5117_v28, %v5116_v42  ;;  %4545 = vxpose.xlu1.c.b16.start [1/8] %v4372_v12, 128  ;;  %v4350_v41 = vmax.f32 %v4278_v36, 0.0  ;;  %v5037_v36 = vpop.f32.mrf.mxu0 }
 0x3ca   :  { %v5119_v3 = vpop.f32.mrf.mxu1  ;;  %4500 = vperm.xlu0 %5165, %v4394_v63   ;;  %v4160_v51 = vadd.f32 %v5036_v46, %v6994_v14 }
 0x3cb   :  { %v4281_v13 = vadd.f32 %v5118_v61, %v4120_v18 }
 0x3cc   :  { %v5120_v23 = vpop.f32.mrf.mxu1 }
 0x3cd   :  { %v4351_v7 = vmax.f32 %v4281_v13, 0.0  ;;  %v5121_v54 = vadd.f32 %v5120_v23, %v5119_v3  ;;  %v4149_v3 = vadd.f32 %v5027_v40, %v6994_v14  ;;  %v4152_v23 = vadd.f32 %v5030_v43, %v6994_v14 }
 0x3ce   :  { %v5122_v30 = vpop.f32.mrf.mxu1 }
 0x3cf   :  { %v4373_v60 = vpack.c.bf16 %v4351_v7, %v4350_v41  ;;  %v4286_v5 = vadd.f32 %v5121_v54, %v4125_v37  ;;  %v5038_v7 = vpop.f32.mrf.mxu0 }
 0x3d0   :  { %v5123_v9 = vpop.f32.mrf.mxu1 }
 0x3d1   :  { %v5124_v45 = vadd.f32 %v5123_v9, %v5122_v30  ;;  %4546 = vxpose.xlu1.c.b16.cont [2/8] %v4373_v60, 128  ;;  %v4352_v44 = vmax.f32 %v4286_v5, 0.0 }
 0x3d2   :  { %v5125_v4 = vpop.f32.mrf.mxu1 }
 0x3d3   :  { %v4289_v25 = vadd.f32 %v5124_v45, %v4128_v10  ;;  %v5040_v10 = vpop.f32.mrf.mxu0  ;;  %v4157_v45 = vadd.f32 %v5033_v49, %v6994_v14 }
 0x3d4   :  { %v5126_v1 = vpop.f32.mrf.mxu1 }
 0x3d5   :  { %v4353_v39 = vmax.f32 %v4289_v25, 0.0  ;;  %v5127_v19 = vadd.f32 %v5126_v1, %v5125_v4  ;;  %v5041_v57 = vpop.f32.mrf.mxu0 }
 0x3d6   :  { %v5128_v21 = vpop.f32.mrf.mxu1 }
 0x3d7   :  { %v4374_v47 = vpack.c.bf16 %v4353_v39, %v4352_v44  ;;  %v4294_v59 = vadd.f32 %v5127_v19, %v4133_v26  ;;  %v5039_v39 = vadd.f32 %v5038_v7, %v5037_v36 }
 0x3d8   :  { %v5129_v38 = vpop.f32.mrf.mxu1 }
 0x3d9   :  { %v5130_v58 = vadd.f32 %v5129_v38, %v5128_v21  ;;  %4547 = vxpose.xlu1.c.b16.cont [3/8] %v4374_v47, 128  ;;  %v4354_v35 = vmax.f32 %v4294_v59, 0.0  ;;  %v5042_v21 = vadd.f32 %v5041_v57, %v5040_v10  ;;  %v4165_v59 = vadd.f32 %v5039_v39, %v6994_v14 }
 0x3da   :  { %v5131_v27 = vpop.f32.mrf.mxu1 }
 0x3db   :  { %v4297_v62 = vadd.f32 %v5130_v58, %v4136_v48 }
 0x3dc   :  { %v5132_v56 = vpop.f32.mrf.mxu1 }
 0x3dd   :  { %v4355_v31 = vmax.f32 %v4297_v62, 0.0  ;;  %v5133_v52 = vadd.f32 %v5132_v56, %v5131_v27  ;;  %v4168_v27 = vadd.f32 %v5042_v21, %v6994_v14 }
 0x3de   :  { %v5134_v8 = vpop.f32.mrf.mxu1 }
 0x3df   :  { %v4375_v17 = vpack.c.bf16 %v4355_v31, %v4354_v35  ;;  %v4302_v11 = vadd.f32 %v5133_v52, %v4141_v55  ;;  %v4395_v52 = vld [vmem:[%s7145_s5 + $0x78] sm:$0xff]  ;;  %v4441_v55 = vpop.permute.xlu1 %4440 }
 0x3e0   :  { %v5135_v29 = vpop.f32.mrf.mxu1 }
 0x3e1   :  { %v5136_v42 = vadd.f32 %v5135_v29, %v5134_v8  ;;  %4548 = vxpose.xlu1.c.b16.cont [4/8] %v4375_v17, 128  ;;  %v4356_v63 = vmax.f32 %v4302_v11, 0.0  ;;  %v4436_v8 = vpop.permute.xlu0 %4435 }
 0x3e2   :  { %v5137_v2 = vpop.f32.mrf.mxu1 }
 0x3e3   :  { %v4305_v12 = vadd.f32 %v5136_v42, %v4144_v0  ;;  %v4446_v29 = vpop.permute.xlu1 %4445 }
 0x3e4   :  { %v5138_v53 = vpop.f32.mrf.mxu1 }
 0x3e5   :  { %v4357_v28 = vmax.f32 %v4305_v12, 0.0  ;;  %v5139_v18 = vadd.f32 %v5138_v53, %v5137_v2  ;;  %v4451_v17 = vpop.permute.xlu0 %4450 }
 0x3e6   :  { %v5140_v61 = vpop.f32.mrf.mxu1 }
 0x3e7   :  { %v4376_v24 = vpack.c.bf16 %v4357_v28, %v4356_v63  ;;  %v4310_v6 = vadd.f32 %v5139_v18, %v4149_v3  ;;  %v4456_v14 = vpop.permute.xlu1 %4455 }
 0x3e8   :  { %v5141_v13 = vpop.f32.mrf.mxu1 }
 0x3e9   :  { %v5142_v41 = vadd.f32 %v5141_v13, %v5140_v61  ;;  %4549 = vxpose.xlu1.c.b16.cont [5/8] %v4376_v24, 128  ;;  %v4358_v37 = vmax.f32 %v4310_v6, 0.0  ;;  %v4461_v0 = vpop.permute.xlu0 %4460 }
 0x3ea   :  { %v5143_v54 = vpop.f32.mrf.mxu1 }
 0x3eb   :  { %v4313_v32 = vadd.f32 %v5142_v41, %v4152_v23  ;;  %v4466_v42 = vpop.permute.xlu1 %4465 }
 0x3ec   :  { %v5144_v30 = vpop.f32.mrf.mxu1 }
 0x3ed   :  { %v4359_v60 = vmax.f32 %v4313_v32, 0.0  ;;  %v5145_v9 = vadd.f32 %v5144_v30, %v5143_v54  ;;  %v7110_v11 = vpop.permute.xlu0 %4470 }
 0x3ee   :  { %v5146_v5 = vpop.f32.mrf.mxu1 }
 0x3ef   :  { %v4377_v16 = vpack.c.bf16 %v4359_v60, %v4358_v37  ;;  %v4318_v25 = vadd.f32 %v5145_v9, %v4157_v45  ;;  %v7114_v2 = vpop.permute.xlu1 %4475 }
 0x3f0   :  { %v5147_v4 = vpop.f32.mrf.mxu1 }
 0x3f1   :  { %v5148_v1 = vadd.f32 %v5147_v4, %v5146_v5  ;;  %4550 = vxpose.xlu1.c.b16.cont [6/8] %v4377_v16, 128  ;;  %v4360_v26 = vmax.f32 %v4318_v25, 0.0  ;;  %v7112_v22 = vpop.permute.xlu0 %4480 }
 0x3f2   :  { %v5149_v44 = vpop.f32.mrf.mxu1 }
 0x3f3   :  { %v4321_v19 = vadd.f32 %v5148_v1, %v4160_v51  ;;  %v7118_v12 = vpop.permute.xlu1 %4485 }
 0x3f4   :  { %v5150_v34 = vpop.f32.mrf.mxu1 }
 0x3f5   :  { %v4361_v47 = vmax.f32 %v4321_v19, 0.0  ;;  %v5151_v38 = vadd.f32 %v5150_v34, %v5149_v44  ;;  %v7116_v40 = vpop.permute.xlu0 %4490 }
 0x3f6   :  { %v5152_v48 = vpop.f32.mrf.mxu1 }
 0x3f7   :  { %v4378_v58 = vpack.c.bf16 %v4361_v47, %v4360_v26  ;;  %v4326_v20 = vadd.f32 %v5151_v38, %v4165_v59  ;;  %v7120_v43 = vpop.permute.xlu1 %4495 }
 0x3f8   :  { %v5153_v33 = vpop.f32.mrf.mxu1 }
 0x3f9   :  { %v5154_v62 = vadd.f32 %v5153_v33, %v5152_v48  ;;  %4551 = vxpose.xlu1.c.b16.cont [7/8] %v4378_v58, 128  ;;  %v4362_v50 = vmax.f32 %v4326_v20, 0.0 }
 0x3fb   :  { %v4329_v56 = vadd.f32 %v5154_v62, %v4168_v27 }
 0x3fd   :  { %v4363_v35 = vmax.f32 %v4329_v56, 0.0 }
 0x3ff   :  { %v4379_v31 = vpack.c.bf16 %v4363_v35, %v4362_v50 }
 0x401   :  { %4552 = vxpose.xlu1.c.b16.end [8/8] %v4379_v31, 128 }
 0x405   :  { %4505 = vperm.xlu1 %5166, %v4395_v52  }
 0x407   :  { %v4404_v53 = vpop.trf.xlu0 }
 0x408   :  { %v4412_v63 = vunpack.c.l.bf16 %v4404_v53  ;;  %v4413_v28 = vunpack.c.h.bf16 %v4404_v53 }
 0x40a   :  { %v4508_v24 = vmul.f32 %v4431_v15, %v4412_v63  ;;  %v4509_v13 = vmul.f32 %v4436_v8, %v4413_v28 }
 0x40b   :  { %v4405_v36 = vpop.trf.xlu0 }
 0x40c   :  { %v4414_v23 = vunpack.c.l.bf16 %v4405_v36  ;;  %v4524_v49 = vadd.f32 %v4509_v13, %v4508_v24  ;;  %v4415_v30 = vunpack.c.h.bf16 %v4405_v36 }
 0x40e   :  { %v4510_v46 = vmul.f32 %v4441_v55, %v4414_v23  ;;  %v4511_v16 = vmul.f32 %v4446_v29, %v4415_v30 }
 0x40f   :  { %v4406_v10 = vpop.trf.xlu0 }
 0x410   :  { %v4525_v4 = vadd.f32 %v4524_v49, %v4510_v46  ;;  %v4416_v51 = vunpack.c.l.bf16 %v4406_v10  ;;  %v4417_v19 = vunpack.c.h.bf16 %v4406_v10 }
 0x412   :  { %v4526_v39 = vadd.f32 %v4525_v4, %v4511_v16  ;;  %v4512_v34 = vmul.f32 %v4451_v17, %v4416_v51  ;;  %v4513_v48 = vmul.f32 %v4456_v14, %v4417_v19 }
 0x413   :  { %v4407_v26 = vpop.trf.xlu0 }
 0x414   :  { %v4527_v59 = vadd.f32 %v4526_v39, %v4512_v34  ;;  %v4418_v58 = vunpack.c.l.bf16 %v4407_v26  ;;  %v4419_v50 = vunpack.c.h.bf16 %v4407_v26 }
 0x416   :  { %v4528_v56 = vadd.f32 %v4527_v59, %v4513_v48  ;;  %v4514_v35 = vmul.f32 %v4461_v0, %v4418_v58 }
 0x417   :  { %v4408_v52 = vpop.trf.xlu0 }
 0x41b   :  { %v4409_v24 = vpop.trf.xlu0 }
 0x41c   :  { %v4423_v30 = vunpack.c.h.bf16 %v4409_v24 }
 0x41e   :  { %v4519_v10 = vmul.f32 %v7118_v12, %v4423_v30 }
 0x447   :  { %v4553_v18 = vpop.trf.xlu1 }
 0x448   :  { %v4561_v61 = vunpack.c.l.bf16 %v4553_v18  ;;  %v4562_v3 = vunpack.c.h.bf16 %v4553_v18 }
 0x44a   :  { %v4577_v6 = vmul.f32 %v4561_v61, %v4431_v15  ;;  %v4578_v41 = vmul.f32 %v4562_v3, %v4436_v8 }
 0x44b   :  { %v4554_v7 = vpop.trf.xlu1 }
 0x44c   :  { %v4563_v54 = vunpack.c.l.bf16 %v4554_v7  ;;  %v4593_v37 = vadd.f32 %v4578_v41, %v4577_v6  ;;  %v4564_v60 = vunpack.c.h.bf16 %v4554_v7  ;;  %v4422_v41 = vunpack.c.l.bf16 %v4409_v24 }
 0x44e   :  { %v4579_v32 = vmul.f32 %v4563_v54, %v4441_v55  ;;  %v4580_v25 = vmul.f32 %v4564_v60, %v4446_v29  ;;  %v4515_v55 = vmul.f32 %v4466_v42, %v4419_v50  ;;  %v4420_v29 = vunpack.c.l.bf16 %v4408_v52 }
 0x44f   :  { %v4555_v9 = vpop.trf.xlu1  ;;  %v4518_v46 = vmul.f32 %v7112_v22, %v4422_v41 }
 0x450   :  { %v4594_v5 = vadd.f32 %v4593_v37, %v4579_v32  ;;  %v4565_v45 = vunpack.c.l.bf16 %v4555_v9  ;;  %v4566_v21 = vunpack.c.h.bf16 %v4555_v9  ;;  %v4516_v61 = vmul.f32 %v7110_v11, %v4420_v29 }
 0x452   :  { %v4595_v1 = vadd.f32 %v4594_v5, %v4580_v25  ;;  %v4581_v57 = vmul.f32 %v4565_v45, %v4451_v17  ;;  %v4582_v33 = vmul.f32 %v4566_v21, %v4456_v14  ;;  %v4529_v17 = vadd.f32 %v4528_v56, %v4514_v35 }
 0x453   :  { %v4556_v44 = vpop.trf.xlu1  ;;  %v4421_v14 = vunpack.c.h.bf16 %v4408_v52 }
 0x454   :  { %v4596_v47 = vadd.f32 %v4595_v1, %v4581_v57  ;;  %v4567_v38 = vunpack.c.l.bf16 %v4556_v44  ;;  %v4568_v31 = vunpack.c.h.bf16 %v4556_v44  ;;  %v4530_v36 = vadd.f32 %v4529_v17, %v4515_v55 }
 0x455   :  { %v4517_v23 = vmul.f32 %v7114_v2, %v4421_v14  ;;  %v4930_v14 = vld [vmem:[%s7146_s6] ss:$0 sm:$0xff] }
 0x456   :  { %v4597_v27 = vadd.f32 %v4596_v47, %v4582_v33  ;;  %v4583_v20 = vmul.f32 %v4567_v38, %v4461_v0  ;;  %v4584_v53 = vmul.f32 %v4568_v31, %v4466_v42  ;;  %v4531_v6 = vadd.f32 %v4530_v36, %v4516_v61 }
 0x457   :  { %v4557_v62 = vpop.trf.xlu1 }
 0x458   :  { %v4598_v15 = vadd.f32 %v4597_v27, %v4583_v20  ;;  %v4569_v8 = vunpack.c.l.bf16 %v4557_v62  ;;  %v4570_v3 = vunpack.c.h.bf16 %v4557_v62  ;;  %v4532_v32 = vadd.f32 %v4531_v6, %v4517_v23 }
 0x45a   :  { %v4599_v63 = vadd.f32 %v4598_v15, %v4584_v53  ;;  %v4585_v28 = vmul.f32 %v4569_v8, %v7110_v11  ;;  %v4586_v7 = vmul.f32 %v4570_v3, %v7114_v2  ;;  %v4410_v11 = vpop.trf.xlu0  ;;  %v4533_v5 = vadd.f32 %v4532_v32, %v4518_v46 }
 0x45b   :  { %v4558_v18 = vpop.trf.xlu1  ;;  %v4424_v45 = vunpack.c.l.bf16 %v4410_v11  ;;  %v4425_v57 = vunpack.c.h.bf16 %v4410_v11 }
 0x45c   :  { %v4600_v13 = vadd.f32 %v4599_v63, %v4585_v28  ;;  %v4571_v0 = vunpack.c.l.bf16 %v4558_v18  ;;  %v4572_v37 = vunpack.c.h.bf16 %v4558_v18  ;;  %v4534_v1 = vadd.f32 %v4533_v5, %v4519_v10 }
 0x45d   :  { %v4520_v44 = vmul.f32 %v7116_v40, %v4424_v45  ;;  %v4521_v26 = vmul.f32 %v7120_v43, %v4425_v57 }
 0x45e   :  { %v4601_v54 = vadd.f32 %v4600_v13, %v4586_v7  ;;  %v4587_v42 = vmul.f32 %v4571_v0, %v7112_v22  ;;  %v4588_v16 = vmul.f32 %v4572_v37, %v7118_v12  ;;  %v4411_v4 = vpop.trf.xlu0 }
 0x45f   :  { %v4559_v49 = vpop.trf.xlu1  ;;  %v4426_v39 = vunpack.c.l.bf16 %v4411_v4  ;;  %v4535_v47 = vadd.f32 %v4534_v1, %v4520_v44  ;;  %v4427_v33 = vunpack.c.h.bf16 %v4411_v4 }
 0x460   :  { %v4602_v60 = vadd.f32 %v4601_v54, %v4587_v42  ;;  %v4573_v9 = vunpack.c.l.bf16 %v4559_v49  ;;  %v4574_v22 = vunpack.c.h.bf16 %v4559_v49 }
 0x461   :  { %v4536_v58 = vadd.f32 %v4535_v47, %v4521_v26 }
 0x462   :  { %v4603_v2 = vadd.f32 %v4602_v60, %v4588_v16  ;;  %v4589_v51 = vmul.f32 %v4573_v9, %v7116_v40  ;;  %v4501_v21 = vpop.permute.xlu0 %4500  ;;  %v4590_v38 = vmul.f32 %v4574_v22, %v7120_v43 }
 0x463   :  { %v4560_v25 = vpop.trf.xlu1  ;;  %v4522_v12 = vmul.f32 %v4501_v21, %v4426_v39 }
 0x464   :  { %v4604_v19 = vadd.f32 %v4603_v2, %v4589_v51  ;;  %v4575_v34 = vunpack.c.l.bf16 %v4560_v25  ;;  %v4576_v27 = vunpack.c.h.bf16 %v4560_v25 }
 0x465   :  { %v4537_v62 = vadd.f32 %v4536_v58, %v4522_v12 }
 0x466   :  { %v4605_v48 = vadd.f32 %v4604_v19, %v4590_v38  ;;  %v4591_v59 = vmul.f32 %v4575_v34, %v4501_v21 }
 0x468   :  { %v4606_v50 = vadd.f32 %v4605_v48, %v4591_v59 }
 0x480   :  { %v4506_v20 = vpop.permute.xlu1 %4505 }
 0x481   :  { %v4523_v56 = vmul.f32 %v4506_v20, %v4427_v33  ;;  %v4592_v40 = vmul.f32 %v4576_v27, %v4506_v20 }
 0x483   :  { %v4538_v35 = vadd.f32 %v4537_v62, %v4523_v56  ;;  %v4607_v31 = vadd.f32 %v4606_v50, %v4592_v40 }
 0x485   :  { %v4539_v52 = vrot.slane %v4538_v35, 4  ;;  %v4608_v15 = vrot.slane %v4607_v31, 4 }
 0x487   :  { %v4540_v8 = vadd.f32 %v4539_v52, %v4538_v35  ;;  %v4609_v55 = vadd.f32 %v4608_v15, %v4607_v31 }
 0x489   :  { %v4541_v17 = vrot.slane %v4540_v8, 2  ;;  %v4610_v29 = vrot.slane %v4609_v55, 2 }
 0x48b   :  { %v4542_v43 = vadd.f32 %v4541_v17, %v4540_v8  ;;  %v4611_v53 = vadd.f32 %v4610_v29, %v4609_v55 }
 0x48d   :  { %v4543_v63 = vrot.slane %v4542_v43, 1  ;;  %v4612_v28 = vrot.slane %v4611_v53, 1 }
 0x48f   :  { %v4544_v18 = vadd.f32 %v4543_v63, %v4542_v43  ;;  %v4613_v36 = vadd.f32 %v4612_v28, %v4611_v53 }
 0x491   :  { %v4615_v61 = vsel %vm4614_vm0, %v4544_v18, %v4613_v36 }
 0x492   :  { %v4623_v3 = vadd.f32 %v4930_v14, %v4615_v61 }
 0x494   :  { %4624 = vst [vmem:[#allocation8] sm:$0x3] %v4623_v3 }
 0x495   :  { %5655 = shalt.err (!%p5652_p5)
}
 0x496   :  { %4634 = dma.vmem_to_hbm [thread:$0]  %s4632_s29, 32, %s7147_s7, [#allocation4]  }
 0x497   :  { %5668 = dma.done.wait [#allocation4], 32  }
 0x498   :  { %5669 = vsyncadd [#allocation4], 4294967264 }
 0x499   :  { %4638 = vsyncpa [#allocation3], 1 }
 0x49a   :  { %4639 = vsyncpa [#allocation6], 1 }
 0x49b   :  { %4640 = vsyncpa [#allocation4], 1 }

</bundles_post_ra>
